<compile_context>
chip_gen: v5e
topology: v5e:2x2
jax: 0.10.0
libtpu: 0.0.40
codegen_flags: <defaults>
</compile_context>

<pallas_src>
import functools

import jax
import jax.numpy as jnp
from jax.experimental import pallas as pl
from jax.experimental.pallas import tpu as pltpu


def _cdiv(a, b):
    return -(-a // b)


def _round_up(a, b):
    return _cdiv(a, b) * b


def conv3d_transpose_block(x, weight, bias, gamma, beta, *, stride=2, eps=1e-5):
    """Forward pass of Conv3DTransposeBlock.

    x:      (N, Cin, D, H, W)
    weight: (Cin, Cout, K, K, K)  -- PyTorch ConvTranspose3d layout
    bias:   (Cout,)               -- exactly cancelled by training-mode BN mean subtraction
    gamma, beta: (Cout,)          -- BatchNorm affine parameters
    """
    del bias  # conv bias only shifts the per-channel mean, removed exactly by batch-stat BN.

    N, Cin, D, H, W = x.shape
    _, Cout, K, _, _ = weight.shape
    assert K == 3 and stride == 2, "implements the module defaults (k=3, s=2, p=1, op=1)"
    Do, Ho, Wo = 2 * D, 2 * H, 2 * W
    NC = 8 * Cout                                  # 8 output parities x Cout

    # ---- glue: parity-packed weight W8[tap=(sd,sh,sw), ci, (pd,ph,pw,co)] -------------------
    # even output parity uses kernel tap 1 (input shift 0); odd parity uses tap 2 (shift 0)
    # and tap 0 (shift 1); unused (parity, shift) combinations are zero.
    KIDX = {(0, 0): 1, (0, 1): -1, (1, 0): 2, (1, 1): 0}
    w_f32 = weight.astype(jnp.float32)
    W8 = jnp.zeros((2, 2, 2, Cin, 2, 2, 2, Cout), jnp.float32)
    for sd in (0, 1):
        for sh in (0, 1):
            for sw in (0, 1):
                for pd in (0, 1):
                    for ph in (0, 1):
                        for pw in (0, 1):
                            kd, kh, kw = KIDX[(pd, sd)], KIDX[(ph, sh)], KIDX[(pw, sw)]
                            if kd < 0 or kh < 0 or kw < 0:
                                continue
                            W8 = W8.at[sd, sh, sw, :, pd, ph, pw, :].set(w_f32[:, :, kd, kh, kw])
    W8 = W8.reshape(8, Cin, NC).astype(jnp.bfloat16)

    # ---- glue: channels-last zero-padded input, flattened so every tap is a constant row
    #      offset (no 8x patch replication in HBM).
    Dp, Hp, Wp = D + 1, H + 1, W + 1
    x_cl = jnp.transpose(x, (0, 2, 3, 4, 1)).astype(jnp.bfloat16)          # (N,D,H,W,Cin)
    x_pad = jnp.pad(x_cl, ((0, 0), (0, 1), (0, 1), (0, 1), (0, 0)))        # (N,Dp,Hp,Wp,Cin)
    Mp = N * Dp * Hp * Wp
    x_flat = x_pad.reshape(Mp, Cin)
    offsets = tuple(sd * Hp * Wp + sh * Wp + sw
                    for sd in (0, 1) for sh in (0, 1) for sw in (0, 1))
    off_max = offsets[-1]

    # Row validity mask: pad rows (d==D or h==H or w==W) produce garbage conv rows that are
    # dropped by the epilogue but must be excluded from the BN statistics.
    valid = ((jnp.arange(Dp) < D)[:, None, None]
             & (jnp.arange(Hp) < H)[None, :, None]
             & (jnp.arange(Wp) < W)[None, None, :])
    mask_flat = jnp.broadcast_to(valid[None], (N, Dp, Hp, Wp)).reshape(Mp).astype(jnp.float32)

    # ---- tiling: VMEM-aware, weight block + f32 accumulator accounted, tm multiple of 16,
    #      prefer >=4 (even) grid steps so v7x gets >=2 pipelined steps per TensorCore.
    try:
        vmem_cap = int(getattr(pltpu.get_tpu_info(), "vmem_capacity_bytes", 64 << 20))
    except Exception:
        vmem_cap = 64 << 20                        # conservative fallback (v7x per-TC VMEM)
    usable = max(8 << 20, min(int(vmem_cap * 0.45), 48 << 20))   # ~29MB v7x, 48MB v5e/v6e
    w_resident = 2 * 8 * Cin * NC * 2              # weight block is double-buffered by default
    # per-row VMEM bytes: 2 dbl-buffered bf16 input blocks, mask, bf16 out block,
    # in-kernel window + slices (bf16), f32 accumulator + masked copy, bf16 store temp.
    bytes_per_row = (2 * 2 * Cin * 2) + (2 * 4) + (2 * NC * 2) \
        + (4 * Cin * 2) + (2 * NC * 4) + NC * 2
    tm_min = _round_up(max(off_max + 1, 16), 16)   # halo (tile i+1) must cover all tap offsets
    budget_tm = (max(usable - w_resident, 1 << 20) // bytes_per_row) // 16 * 16
    tm_cap = max(tm_min, budget_tm)
    n_tiles = max(4, _cdiv(Mp, tm_cap))
    if n_tiles % 2:
        n_tiles += 1
    tm = max(tm_min, _round_up(_cdiv(Mp, n_tiles), 16))
    n_tiles = _cdiv(Mp, tm)
    rows_out = n_tiles * tm
    rows_in = rows_out + tm                        # one extra zero tile so the i+1 halo block is in range

    x_flat = jnp.pad(x_flat, ((0, rows_in - Mp), (0, 0)))
    mask_flat = jnp.pad(mask_flat, (0, rows_out - Mp)).reshape(rows_out, 1)

    vmem_est = w_resident + bytes_per_row * tm + (2 << 20)
    vmem_limit = int(min(0.9 * vmem_cap, max(2 * vmem_est, 32 << 20)))

    # ---- Pallas kernel: in-VMEM 8-tap window assembly + conv matmul + BN partial stats ------
    def conv_stats_kernel(x0_ref, x1_ref, w_ref, m_ref, y_ref, s_ref, ss_ref):
        # Current row tile plus the next tile (halo); all 8 tap windows are static row slices.
        window = jnp.concatenate([x0_ref[...], x1_ref[...]], axis=0)       # (2*tm, Cin) bf16
        acc = jnp.dot(window[offsets[0]:offsets[0] + tm, :], w_ref[0],
                      preferred_element_type=jnp.float32)
        for t in range(1, 8):
            o = offsets[t]
            acc = acc + jnp.dot(window[o:o + tm, :], w_ref[t],
                                preferred_element_type=jnp.float32)
        msk = m_ref[...]                                                   # (tm, 1) 0/1 f32
        ym = acc * msk
        s_ref[...] = jnp.sum(ym, axis=0, keepdims=True)[None]              # (1,1,NC) partial sum
        ss_ref[...] = jnp.sum(ym * acc, axis=0, keepdims=True)[None]       # partial sum of squares
        y_ref[...] = acc.astype(y_ref.dtype)                               # bf16 intermediate

    flops = 2 * rows_out * 8 * Cin * NC
    bytes_accessed = (2 * rows_out * Cin * 2 + 8 * Cin * NC * 2 + rows_out * 4
                      + rows_out * NC * 2 + 2 * n_tiles * NC * 4)

    conv_out, psum, psumsq = pl.pallas_call(
        conv_stats_kernel,
        out_shape=[jax.ShapeDtypeStruct((rows_out, NC), jnp.bfloat16),
                   jax.ShapeDtypeStruct((n_tiles, 1, NC), jnp.float32),
                   jax.ShapeDtypeStruct((n_tiles, 1, NC), jnp.float32)],
        grid=(n_tiles,),
        in_specs=[pl.BlockSpec((tm, Cin), lambda i: (i, 0)),       # row tile i
                  pl.BlockSpec((tm, Cin), lambda i: (i + 1, 0)),   # halo: row tile i+1
                  pl.BlockSpec((8, Cin, NC), lambda i: (0, 0, 0)),  # constant weight (2 bufs accounted)
                  pl.BlockSpec((tm, 1), lambda i: (i, 0))],
        out_specs=[pl.BlockSpec((tm, NC), lambda i: (i, 0)),
                   pl.BlockSpec((1, 1, NC), lambda i: (i, 0, 0)),
                   pl.BlockSpec((1, 1, NC), lambda i: (i, 0, 0))],
        compiler_params=pltpu.CompilerParams(
            dimension_semantics=("parallel",),
            vmem_limit_bytes=vmem_limit),
        cost_estimate=pl.CostEstimate(flops=flops, transcendentals=0,
                                      bytes_accessed=bytes_accessed),
    )(x_flat, x_flat, W8, mask_flat)

    # ---- glue: finalize BatchNorm batch statistics (training mode, biased variance) ----------
    count = jnp.float32(N * Do * Ho * Wo)                        # true element count per channel
    ch_sum = psum.sum(axis=(0, 1)).reshape(8, Cout).sum(axis=0)
    ch_ssq = psumsq.sum(axis=(0, 1)).reshape(8, Cout).sum(axis=0)
    mean = ch_sum / count
    var = jnp.maximum(ch_ssq / count - mean * mean, 0.0)
    inv_std = jax.lax.rsqrt(var + eps)
    scale_c = gamma.astype(jnp.float32) * inv_std
    shift_c = beta.astype(jnp.float32) - mean * scale_c
    # TODO(synk): BatchNorm3d running_mean/running_var buffer updates (training-time side
    # effect) are not produced; the activation matches training-mode batch-stat normalization.

    # ---- glue: BN affine + ReLU fused by XLA into the pixel-shuffle transpose epilogue -------
    y = conv_out[:Mp].reshape(N, Dp, Hp, Wp, 2, 2, 2, Cout)[:, :D, :H, :W]
    y = jnp.maximum(y.astype(jnp.float32) * scale_c + shift_c, 0.0)
    out = jnp.transpose(y, (0, 7, 1, 4, 2, 5, 3, 6)).reshape(N, Cout, Do, Ho, Wo)
    return out


if __name__ == "__main__":
    key = jax.random.PRNGKey(0)
    k1, k2, k3, k4, k5 = jax.random.split(key, 5)

    N, Cin, Cout, D, H, W, K = 2, 4, 8, 8, 8, 8, 3
    stride, eps = 2, 1e-5

    x = jax.random.normal(k1, (N, Cin, D, H, W), jnp.float32)
    weight = 0.1 * jax.random.normal(k2, (Cin, Cout, K, K, K), jnp.float32)   # ConvTranspose3d weight
    bias = 0.1 * jax.random.normal(k3, (Cout,), jnp.float32)
    gamma = 1.0 + 0.1 * jax.random.normal(k4, (Cout,), jnp.float32)           # BN weight
    beta = 0.1 * jax.random.normal(k5, (Cout,), jnp.float32)                  # BN bias

    fwd = jax.jit(functools.partial(conv3d_transpose_block, stride=stride, eps=eps))
    out = jax.block_until_ready(fwd(x, weight, bias, gamma, beta))

    # ---- independent pure-JAX reference (lhs-dilated conv == transposed conv) ----
    w_ref = jnp.transpose(weight, (1, 0, 2, 3, 4))[:, :, ::-1, ::-1, ::-1]    # (Cout, Cin, flipped)
    pad_lo, pad_hi = K - 1 - K // 2, K - 1 - K // 2 + 1
    conv_ref = jax.lax.conv_general_dilated(
        x, w_ref, window_strides=(1, 1, 1),
        padding=[(pad_lo, pad_hi)] * 3, lhs_dilation=(stride,) * 3,
        dimension_numbers=("NCDHW", "OIDHW", "NCDHW"),
    ) + bias.reshape(1, Cout, 1, 1, 1)
    m = conv_ref.mean(axis=(0, 2, 3, 4), keepdims=True)
    v = conv_ref.var(axis=(0, 2, 3, 4), keepdims=True)
    ref = jnp.maximum((conv_ref - m) / jnp.sqrt(v + eps) * gamma.reshape(1, Cout, 1, 1, 1)
                      + beta.reshape(1, Cout, 1, 1, 1), 0.0)

    err = float(jnp.max(jnp.abs(out - ref)))
    assert out.shape == (N, Cout, 2 * D, 2 * H, 2 * W), out.shape
    assert err < 5e-2, f"max abs error {err}"
    print("KERNEL_OK")
</pallas_src>

<mosaic_0001>
module attributes {stable_mosaic.version = 11 : i64} {
  func.func @conv_stats_kernel(%arg0: i32, %arg1: memref<368x4xbf16, #tpu.memory_space<vmem>>, %arg2: memref<368x4xbf16, #tpu.memory_space<vmem>>, %arg3: memref<8x4x64xbf16, #tpu.memory_space<vmem>>, %arg4: memref<368x1xf32, #tpu.memory_space<vmem>>, %arg5: memref<368x64xbf16, #tpu.memory_space<vmem>>, %arg6: memref<1x1x64xf32, #tpu.memory_space<vmem>>, %arg7: memref<1x1x64xf32, #tpu.memory_space<vmem>>) attributes {dimension_semantics = [#tpu.dimension_semantics<parallel>], iteration_bounds = array<i64: 4>, scalar_prefetch = 0 : i64, scratch_operands = 0 : i64, tpu.core_type = #tpu.core_type<tc>, window_params = [{transform_indices = @transform_0, window_bounds = array<i64: 368, 4>}, {transform_indices = @transform_1, window_bounds = array<i64: 368, 4>}, {pipeline_mode = #tpu.pipeline_mode<synchronous>, transform_indices = @transform_2, window_bounds = array<i64: 8, 4, 64>}, {transform_indices = @transform_3, window_bounds = array<i64: 368, 1>}, {transform_indices = @transform_4, window_bounds = array<i64: 368, 64>}, {transform_indices = @transform_5, window_bounds = array<i64: 1, 1, 64>}, {transform_indices = @transform_6, window_bounds = array<i64: 1, 1, 64>}]} {
    %c0 = arith.constant 0 : index
    %c0_0 = arith.constant 0 : index
    %0 = vector.load %arg1[%c0, %c0_0] : memref<368x4xbf16, #tpu.memory_space<vmem>>, vector<368x4xbf16>
    %c0_1 = arith.constant 0 : index
    %c0_2 = arith.constant 0 : index
    %1 = vector.load %arg2[%c0_1, %c0_2] : memref<368x4xbf16, #tpu.memory_space<vmem>>, vector<368x4xbf16>
    %2 = tpu.concatenate %0, %1 in 0 : vector<368x4xbf16>, vector<368x4xbf16> -> vector<736x4xbf16>
    %3 = vector.extract_strided_slice %2 {offsets = [0, 0], sizes = [368, 4], strides = [1, 1]} : vector<736x4xbf16> to vector<368x4xbf16>
    %c0_3 = arith.constant 0 : index
    %c0_4 = arith.constant 0 : index
    %c0_5 = arith.constant 0 : index
    %4 = vector.load %arg3[%c0_3, %c0_4, %c0_5] : memref<8x4x64xbf16, #tpu.memory_space<vmem>>, vector<1x4x64xbf16>
    %5 = vector.shape_cast %4 : vector<1x4x64xbf16> to vector<4x64xbf16>
    %cst = arith.constant dense<0.000000e+00> : vector<368x64xf32>
    %6 = tpu.matmul %3, %5, %cst {dimension_numbers = #tpu.dot_dimension_numbers<[1], [0], [0], [1], [0, 0, 1, 1], [], []>} : vector<368x4xbf16>, vector<4x64xbf16>, vector<368x64xf32> -> vector<368x64xf32>
    %7 = vector.extract_strided_slice %2 {offsets = [1, 0], sizes = [368, 4], strides = [1, 1]} : vector<736x4xbf16> to vector<368x4xbf16>
    %c1 = arith.constant 1 : index
    %c0_6 = arith.constant 0 : index
    %c0_7 = arith.constant 0 : index
    %8 = vector.load %arg3[%c1, %c0_6, %c0_7] : memref<8x4x64xbf16, #tpu.memory_space<vmem>>, vector<1x4x64xbf16>
    %9 = vector.shape_cast %8 : vector<1x4x64xbf16> to vector<4x64xbf16>
    %cst_8 = arith.constant dense<0.000000e+00> : vector<368x64xf32>
    %10 = tpu.matmul %7, %9, %cst_8 {dimension_numbers = #tpu.dot_dimension_numbers<[1], [0], [0], [1], [0, 0, 1, 1], [], []>} : vector<368x4xbf16>, vector<4x64xbf16>, vector<368x64xf32> -> vector<368x64xf32>
    %11 = arith.addf %6, %10 : vector<368x64xf32>
    %12 = vector.extract_strided_slice %2 {offsets = [9, 0], sizes = [368, 4], strides = [1, 1]} : vector<736x4xbf16> to vector<368x4xbf16>
    %c2 = arith.constant 2 : index
    %c0_9 = arith.constant 0 : index
    %c0_10 = arith.constant 0 : index
    %13 = vector.load %arg3[%c2, %c0_9, %c0_10] : memref<8x4x64xbf16, #tpu.memory_space<vmem>>, vector<1x4x64xbf16>
    %14 = vector.shape_cast %13 : vector<1x4x64xbf16> to vector<4x64xbf16>
    %cst_11 = arith.constant dense<0.000000e+00> : vector<368x64xf32>
    %15 = tpu.matmul %12, %14, %cst_11 {dimension_numbers = #tpu.dot_dimension_numbers<[1], [0], [0], [1], [0, 0, 1, 1], [], []>} : vector<368x4xbf16>, vector<4x64xbf16>, vector<368x64xf32> -> vector<368x64xf32>
    %16 = arith.addf %11, %15 : vector<368x64xf32>
    %17 = vector.extract_strided_slice %2 {offsets = [10, 0], sizes = [368, 4], strides = [1, 1]} : vector<736x4xbf16> to vector<368x4xbf16>
    %c3 = arith.constant 3 : index
    %c0_12 = arith.constant 0 : index
    %c0_13 = arith.constant 0 : index
    %18 = vector.load %arg3[%c3, %c0_12, %c0_13] : memref<8x4x64xbf16, #tpu.memory_space<vmem>>, vector<1x4x64xbf16>
    %19 = vector.shape_cast %18 : vector<1x4x64xbf16> to vector<4x64xbf16>
    %cst_14 = arith.constant dense<0.000000e+00> : vector<368x64xf32>
    %20 = tpu.matmul %17, %19, %cst_14 {dimension_numbers = #tpu.dot_dimension_numbers<[1], [0], [0], [1], [0, 0, 1, 1], [], []>} : vector<368x4xbf16>, vector<4x64xbf16>, vector<368x64xf32> -> vector<368x64xf32>
    %21 = arith.addf %16, %20 : vector<368x64xf32>
    %22 = vector.extract_strided_slice %2 {offsets = [81, 0], sizes = [368, 4], strides = [1, 1]} : vector<736x4xbf16> to vector<368x4xbf16>
    %c4 = arith.constant 4 : index
    %c0_15 = arith.constant 0 : index
    %c0_16 = arith.constant 0 : index
    %23 = vector.load %arg3[%c4, %c0_15, %c0_16] : memref<8x4x64xbf16, #tpu.memory_space<vmem>>, vector<1x4x64xbf16>
    %24 = vector.shape_cast %23 : vector<1x4x64xbf16> to vector<4x64xbf16>
    %cst_17 = arith.constant dense<0.000000e+00> : vector<368x64xf32>
    %25 = tpu.matmul %22, %24, %cst_17 {dimension_numbers = #tpu.dot_dimension_numbers<[1], [0], [0], [1], [0, 0, 1, 1], [], []>} : vector<368x4xbf16>, vector<4x64xbf16>, vector<368x64xf32> -> vector<368x64xf32>
    %26 = arith.addf %21, %25 : vector<368x64xf32>
    %27 = vector.extract_strided_slice %2 {offsets = [82, 0], sizes = [368, 4], strides = [1, 1]} : vector<736x4xbf16> to vector<368x4xbf16>
    %c5 = arith.constant 5 : index
    %c0_18 = arith.constant 0 : index
    %c0_19 = arith.constant 0 : index
    %28 = vector.load %arg3[%c5, %c0_18, %c0_19] : memref<8x4x64xbf16, #tpu.memory_space<vmem>>, vector<1x4x64xbf16>
    %29 = vector.shape_cast %28 : vector<1x4x64xbf16> to vector<4x64xbf16>
    %cst_20 = arith.constant dense<0.000000e+00> : vector<368x64xf32>
    %30 = tpu.matmul %27, %29, %cst_20 {dimension_numbers = #tpu.dot_dimension_numbers<[1], [0], [0], [1], [0, 0, 1, 1], [], []>} : vector<368x4xbf16>, vector<4x64xbf16>, vector<368x64xf32> -> vector<368x64xf32>
    %31 = arith.addf %26, %30 : vector<368x64xf32>
    %32 = vector.extract_strided_slice %2 {offsets = [90, 0], sizes = [368, 4], strides = [1, 1]} : vector<736x4xbf16> to vector<368x4xbf16>
    %c6 = arith.constant 6 : index
    %c0_21 = arith.constant 0 : index
    %c0_22 = arith.constant 0 : index
    %33 = vector.load %arg3[%c6, %c0_21, %c0_22] : memref<8x4x64xbf16, #tpu.memory_space<vmem>>, vector<1x4x64xbf16>
    %34 = vector.shape_cast %33 : vector<1x4x64xbf16> to vector<4x64xbf16>
    %cst_23 = arith.constant dense<0.000000e+00> : vector<368x64xf32>
    %35 = tpu.matmul %32, %34, %cst_23 {dimension_numbers = #tpu.dot_dimension_numbers<[1], [0], [0], [1], [0, 0, 1, 1], [], []>} : vector<368x4xbf16>, vector<4x64xbf16>, vector<368x64xf32> -> vector<368x64xf32>
    %36 = arith.addf %31, %35 : vector<368x64xf32>
    %37 = vector.extract_strided_slice %2 {offsets = [91, 0], sizes = [368, 4], strides = [1, 1]} : vector<736x4xbf16> to vector<368x4xbf16>
    %c7 = arith.constant 7 : index
    %c0_24 = arith.constant 0 : index
    %c0_25 = arith.constant 0 : index
    %38 = vector.load %arg3[%c7, %c0_24, %c0_25] : memref<8x4x64xbf16, #tpu.memory_space<vmem>>, vector<1x4x64xbf16>
    %39 = vector.shape_cast %38 : vector<1x4x64xbf16> to vector<4x64xbf16>
    %cst_26 = arith.constant dense<0.000000e+00> : vector<368x64xf32>
    %40 = tpu.matmul %37, %39, %cst_26 {dimension_numbers = #tpu.dot_dimension_numbers<[1], [0], [0], [1], [0, 0, 1, 1], [], []>} : vector<368x4xbf16>, vector<4x64xbf16>, vector<368x64xf32> -> vector<368x64xf32>
    %41 = arith.addf %36, %40 : vector<368x64xf32>
    %c0_27 = arith.constant 0 : index
    %c0_28 = arith.constant 0 : index
    %42 = vector.load %arg4[%c0_27, %c0_28] : memref<368x1xf32, #tpu.memory_space<vmem>>, vector<368x1xf32>
    %43 = vector.broadcast %42 : vector<368x1xf32> to vector<368x64xf32>
    %44 = arith.mulf %41, %43 : vector<368x64xf32>
    %cst_29 = arith.constant dense<0.000000e+00> : vector<64xf32>
    %45 = vector.multi_reduction <add>, %44, %cst_29 [0] : vector<368x64xf32> to vector<64xf32>
    %46 = vector.shape_cast %45 : vector<64xf32> to vector<1x64xf32>
    %47 = vector.shape_cast %46 : vector<1x64xf32> to vector<1x1x64xf32>
    %c0_30 = arith.constant 0 : index
    %c0_31 = arith.constant 0 : index
    %c0_32 = arith.constant 0 : index
    %48 = vector.load %arg6[%c0_30, %c0_31, %c0_32] : memref<1x1x64xf32, #tpu.memory_space<vmem>>, vector<1x1x64xf32>
    tpu.vector_store %arg6[%c0_30, %c0_31, %c0_32], %47 {strides = array<i32>} : memref<1x1x64xf32, #tpu.memory_space<vmem>>, vector<1x1x64xf32>,
    %49 = arith.mulf %44, %41 : vector<368x64xf32>
    %cst_33 = arith.constant dense<0.000000e+00> : vector<64xf32>
    %50 = vector.multi_reduction <add>, %49, %cst_33 [0] : vector<368x64xf32> to vector<64xf32>
    %51 = vector.shape_cast %50 : vector<64xf32> to vector<1x64xf32>
    %52 = vector.shape_cast %51 : vector<1x64xf32> to vector<1x1x64xf32>
    %c0_34 = arith.constant 0 : index
    %c0_35 = arith.constant 0 : index
    %c0_36 = arith.constant 0 : index
    %53 = vector.load %arg7[%c0_34, %c0_35, %c0_36] : memref<1x1x64xf32, #tpu.memory_space<vmem>>, vector<1x1x64xf32>
    tpu.vector_store %arg7[%c0_34, %c0_35, %c0_36], %52 {strides = array<i32>} : memref<1x1x64xf32, #tpu.memory_space<vmem>>, vector<1x1x64xf32>,
    %54 = arith.truncf %41 : vector<368x64xf32> to vector<368x64xbf16>
    %c0_37 = arith.constant 0 : index
    %c0_38 = arith.constant 0 : index
    %55 = vector.load %arg5[%c0_37, %c0_38] : memref<368x64xbf16, #tpu.memory_space<vmem>>, vector<368x64xbf16>
    tpu.vector_store %arg5[%c0_37, %c0_38], %54 {strides = array<i32>} : memref<368x64xbf16, #tpu.memory_space<vmem>>, vector<368x64xbf16>,
    return
  }
  func.func @transform_0(%arg0: i32) -> (i32, i32) {
    %c0_i32 = arith.constant 0 : i32
    %c0_i32_0 = arith.constant 0 : i32
    return %arg0, %c0_i32 : i32, i32
  }
  func.func @transform_1(%arg0: i32) -> (i32, i32) {
    %c1_i32 = arith.constant 1 : i32
    %0 = arith.addi %arg0, %c1_i32 : i32
    %c0_i32 = arith.constant 0 : i32
    %c0_i32_0 = arith.constant 0 : i32
    return %0, %c0_i32 : i32, i32
  }
  func.func @transform_2(%arg0: i32) -> (i32, i32, i32) {
    %c0_i32 = arith.constant 0 : i32
    %c0_i32_0 = arith.constant 0 : i32
    %c0_i32_1 = arith.constant 0 : i32
    %c0_i32_2 = arith.constant 0 : i32
    return %c0_i32, %c0_i32_0, %c0_i32_1 : i32, i32, i32
  }
  func.func @transform_3(%arg0: i32) -> (i32, i32) {
    %c0_i32 = arith.constant 0 : i32
    %c0_i32_0 = arith.constant 0 : i32
    return %arg0, %c0_i32 : i32, i32
  }
  func.func @transform_4(%arg0: i32) -> (i32, i32) {
    %c0_i32 = arith.constant 0 : i32
    %c0_i32_0 = arith.constant 0 : i32
    return %arg0, %c0_i32 : i32, i32
  }
  func.func @transform_5(%arg0: i32) -> (i32, i32, i32) {
    %c0_i32 = arith.constant 0 : i32
    %c0_i32_0 = arith.constant 0 : i32
    %c0_i32_1 = arith.constant 0 : i32
    return %arg0, %c0_i32, %c0_i32_0 : i32, i32, i32
  }
  func.func @transform_6(%arg0: i32) -> (i32, i32, i32) {
    %c0_i32 = arith.constant 0 : i32
    %c0_i32_0 = arith.constant 0 : i32
    %c0_i32_1 = arith.constant 0 : i32
    return %arg0, %c0_i32, %c0_i32_0 : i32, i32, i32
  }
}

</mosaic_0001>

<bundles_post_ra>
// kernel: conv3d_transpose_block.1
= control target key start
LH: loop header
LB: loop body
LE: loop exit
PB: predicated region body
PF: predicated region fallthrough
CT: control target
= control target key end

     0   :  { %s3996_s21 = smov 0   ;;  %s5332_s0 = inlined_call_operand.vmem [shape: bf16[1840,4], index: 0, kind: input, shape index: {}, may-alias: {0,1}]   ;;  %s5333_s1 = inlined_call_operand.vmem [shape: bf16[1840,4], index: 1, kind: input, shape index: {}, may-alias: {0,1}]   ;;  %s5334_s2 = inlined_call_operand.vmem [shape: bf16[8,4,64], index: 2, kind: input, shape index: {}]   ;;  %s5335_s3 = inlined_call_operand.vmem [shape: f32[1472,1], index: 3, kind: input, shape index: {}]   ;;  %s5336_s4 = inlined_call_operand.vmem [shape: bf16[1472,64], index: 4, kind: output, shape index: {0}]   ;;  %s5337_s5 = inlined_call_operand.vmem [shape: f32[4,1,64], index: 5, kind: output, shape index: {1}]   ;;  %s5338_s6 = inlined_call_operand.vmem [shape: f32[4,1,64], index: 6, kind: output, shape index: {2}]  }
   0x1 LB: > { %s4002_s22 = sadd.s32 4294967295, %s3958_s21   ;;  %p3579_p0 = scmp.ge.s32.totalorder %s3958_s21, 1  ;;  %s3958_s21 = sphi %s3996_s21, %s17_s21  }
   0x2   : > { %p244_p1 = scmp.lt.s32.totalorder %s3958_s21, 5 }
   0x4   : > { %p245_p2 = pnand %p3579_p0, %p244_p1 }
   0x6   : > { %248 = sbr.rel (%p245_p2) target bundleno = 912 (0x390), region = 36 }
   0xb   : > { %v527_v0 = vld [vmem:[%s5334_s2] sm:$0x3]  ;;  %vm789_vm0 = vcmask 1041408   ;;  %v3771_v1 = vld [vmem:[%s5334_s2 + $0x6] sm:$0x3]  ;;  %s4013_s27 = smul.u32 46, %s4002_s22 }
   0xc   : > { %v964_v2 = vsel %vm789_vm0, %v527_v0, 0  ;;  %v1552_v3 = vsel %vm789_vm0, %v3771_v1, 0  ;;  %v3700_v4 = vld [vmem:[%s5334_s2 + $0x2] sm:$0x3]  ;;  %v3747_v6 = vld [vmem:[%s5334_s2 + $0x4] sm:$0x3] }
   0xd   : > { %973 = vmatpush.bf16.msra.mxu1 %v964_v2  ;;  %1561 = vmatpush.bf16.msra.mxu3 %v1552_v3  ;;  %p292_p3 = scmp.lt.s32.totalorder %s4013_s27, 229  ;;  %v791_v5 = vsel %vm789_vm0, %v3700_v4, 0  ;;  %v1260_v7 = vsel %vm789_vm0, %v3747_v6, 0  ;;  %v3843_v8 = vld [vmem:[%s5334_s2 + $0xc] sm:$0x3]  ;;  %vm719_vm1 = vcmask 31744  }
   0xe   : > { %800 = vmatpush.bf16.msra.mxu0 %v791_v5  ;;  %1269 = vmatpush.bf16.msra.mxu2 %v1260_v7  ;;  %v2272_v9 = vsel %vm789_vm0, %v3843_v8, 0  ;;  %v3795_v10 = vld [vmem:[%s5334_s2 + $0x8] sm:$0x3]  ;;  %v3867_v11 = vld [vmem:[%s5334_s2 + $0xe] sm:$0x3]  ;;  %vm1434_vm2 = vcmask 1042432  }
   0xf   : > { %s293_s10 = scalar_select %p292_p3, %s4013_s27, 229  ;;  %v1780_v12 = vsel %vm789_vm0, %v3795_v10, 0  ;;  %v2614_v13 = vsel %vm789_vm0, %v3867_v11, 0  ;;  %v3819_v14 = vld [vmem:[%s5334_s2 + $0xa] sm:$0x3]  ;;  %vm1954_vm5 = vcmask 1046528  }
  0x10   : > { %v2072_v15 = vsel %vm789_vm0, %v3819_v14, 0  ;;  %vm530_vm3 = vsmask.f32 7424  ;;  %vm1092_vm4 = vsmask.f32 3328  ;;  %s297_s23 = sadd.s32 1, %s4002_s22 }
  0x11   : > { %s3580_s17 = sshll.u32 %s293_s10, 2  ;;  %2623 = vmatpush.bf16.msrb.mxu3 %v2614_v13  ;;  %2081 = vmatpush.bf16.msrb.mxu1 %v2072_v15  ;;  %s298_s24 = smul.u32 46, %s297_s23  ;;  %vm2446_vm6 = vsmask.f32 2304  ;;  %vm3398_vm7 = vcmask 519168   ;;  %vm3108_vm8 = vcmask 523264  }
  0x12   : > { %2281 = vmatpush.bf16.msrb.mxu2 %v2272_v9  ;;  %1789 = vmatpush.bf16.msrb.mxu0 %v1780_v12  ;;  %s4046_s20 = scalar_lea.vmem %s5332_s0, %s3580_s17  ;;  %p306_p5 = scmp.lt.s32.totalorder %s4013_s27, 183  ;;  %vm3206_vm9 = vcmask 516096  }
  0x13   : > { %v3893_v16 = vld [vmem:[%s4046_s20] sm:$0xff]  ;;  %v3894_v17 = vld [vmem:[%s4046_s20 + $0x8] sm:$0xff]  ;;  %v3895_v34 = vld [vmem:[%s4046_s20 + $0x10] sm:$0xff]  ;;  %p299_p4 = scmp.lt.s32.totalorder %s298_s24, 229  ;;  %p317_p6 = scmp.lt.s32.totalorder %s4002_s22, 3 }
  0x14   : > { %3724 = vmatmul.msk.bf16.vlgmr.msra.gmra.mxu1 %vm719_vm1, %v3893_v16  ;;  %v1435_v18 = vrot.slane %v3893_v16, 5  ;;  %v1436_v19 = vrot.slane %v3894_v17, 5  ;;  %v532_v20 = vshrl.u32 %v3893_v16, 16  ;;  %v534_v21 = vshll.u32 %v3893_v16, 16  ;;  %v3896_v48 = vld [vmem:[%s4046_s20 + $0x18] sm:$0xff]  ;;  %v3897_v60 = vld [vmem:[%s4046_s20 + $0x20] sm:$0xff] }
  0x15   : > { %v539_v22 = vshll.u32 %v3894_v17, 16  ;;  %v543_v23 = vshrl.u32 %v3894_v17, 16  ;;  %v547_v37 = vshll.u32 %v3895_v34, 16  ;;  %v551_v38 = vshrl.u32 %v3895_v34, 16  ;;  %v3898_v8 = vld [vmem:[%s4046_s20 + $0x28] sm:$0xff]  ;;  %s5485_s24 = smov (!%p299_p4, %s298_s24), 229 }
  0x16   : > { %v1437_v24 = vsel %vm1434_vm2, %v1435_v18, %v1436_v19  ;;  %v536_v25 = vrot.slane %v534_v21, 1  ;;  %v1093_v26 = vrot.slane %v532_v20, 4  ;;  %v1094_v27 = vrot.slane %v534_v21, 5  ;;  %s3581_s25 = sshll.u32 %s5485_s24, 2  ;;  %s5487_s27 = smov (!%p306_p5, %s4013_s27), 183 }
  0x17   : > { %3772 = vmatmul.msk.bf16.vlgmr.msra.gmra.mxu3 %vm719_vm1, %v1437_v24  ;;  %v541_v28 = vrot.slane %v539_v22, 1  ;;  %v1096_v29 = vrot.slane %v543_v23, 4  ;;  %v1097_v30 = vrot.slane %v539_v22, 5  ;;  %v1438_v39 = vrot.slane %v3895_v34, 5  ;;  %s4521_s29 = scalar_lea.vmem %s5333_s1, %s3581_s25  ;;  %s3582_s30 = sshll.u32 %s5487_s27, 3 }
  0x18   : > { %v537_v31 = vor.u32 %v536_v25, %v532_v20  ;;  %v1095_v32 = vor.u32 %v1094_v27, %v1093_v26  ;;  %v1100_v40 = vrot.slane %v551_v38, 4  ;;  %v1101_v41 = vrot.slane %v547_v37, 5  ;;  %v4095_v20 = vld [vmem:[%s4046_s20 + $0x30] sm:$0xff]  ;;  %s4583_s9 = scalar_lea.vmem %s5335_s3, %s3582_s30  ;;  %s3583_s10 = sshll.u32 %s5487_s27, 2 }
  0x19   : > { %v1098_v33 = vor.u32 %v1097_v30, %v1096_v29  ;;  %v1439_v42 = vsel %vm1434_vm2, %v1436_v19, %v1438_v39  ;;  %v545_v43 = vor.u32 %v543_v23, %v541_v28  ;;  %v549_v44 = vrot.slane %v547_v37, 1  ;;  %s4748_s13 = scalar_lea.vmem %s5336_s4, %s3583_s10  ;;  %s5489_s22 = smov (!%p317_p6, %s4002_s22), 3 }
  0x1a   : > { %v542_v35 = vsel %vm530_vm3, %v537_v31, %v541_v28  ;;  %v1102_v45 = vor.u32 %v1101_v41, %v1100_v40  ;;  %v555_v49 = vshll.u32 %v3896_v48, 16  ;;  %v559_v50 = vshrl.u32 %v3896_v48, 16  ;;  %s319_s15 = scalar_lea.vmem %s5337_s5, %s5489_s22  ;;  %s322_s18 = scalar_lea.vmem %s5338_s6, %s5489_s22 }
  0x1b   : > { %3701 = vmatmul.msk.bf16.vlgmr.msra.gmra.mxu0 %vm719_vm1, %v542_v35  ;;  %v1099_v36 = vsel %vm1092_vm4, %v1095_v32, %v1098_v33  ;;  %v550_v46 = vsel %vm530_vm3, %v545_v43, %v549_v44  ;;  %v1440_v51 = vrot.slane %v3896_v48, 5  ;;  %v553_v55 = vor.u32 %v551_v38, %v549_v44  ;;  %v3900_v32 = vld [vmem:[%s4046_s20 + $0x38] sm:$0xff]  ;;  %v3901_v44 = vld [vmem:[%s4046_s20 + $0x40] sm:$0xff] }
  0x1c   : > { %3748 = vmatmul.msk.bf16.vlgmr.msra.gmra.mxu2 %vm719_vm1, %v1099_v36  ;;  %v1103_v47 = vsel %vm1092_vm4, %v1098_v33, %v1102_v45  ;;  %v1104_v52 = vrot.slane %v559_v50, 4  ;;  %v1105_v53 = vrot.slane %v555_v49, 5  ;;  %v557_v56 = vrot.slane %v555_v49, 1 }
  0x1d   : > { %v1441_v54 = vsel %vm1434_vm2, %v1438_v39, %v1440_v51  ;;  %v563_v61 = vshll.u32 %v3897_v60, 16  ;;  %v567_v62 = vshrl.u32 %v3897_v60, 16  ;;  %v1442_v63 = vrot.slane %v3897_v60, 5 }
  0x1e   : > { %v1106_v57 = vor.u32 %v1105_v53, %v1104_v52  ;;  %v558_v58 = vsel %vm530_vm3, %v553_v55, %v557_v56  ;;  %v561_v3 = vor.u32 %v559_v50, %v557_v56  ;;  %v4082_v9 = vshll.u32 %v3898_v8, 16  ;;  %v3902_v56 = vld [vmem:[%s4046_s20 + $0x48] sm:$0xff] }
  0x1f   : > { %v1108_v0 = vrot.slane %v567_v62, 4  ;;  %v1109_v1 = vrot.slane %v563_v61, 5  ;;  %v1443_v2 = vsel %vm1434_vm2, %v1440_v51, %v1442_v63  ;;  %v565_v4 = vrot.slane %v563_v61, 1 }
  0x20   : > { %v1107_v59 = vsel %vm1092_vm4, %v1102_v45, %v1106_v57  ;;  %v4084_v10 = vshrl.u32 %v3898_v8, 16  ;;  %v1444_v11 = vrot.slane %v3898_v8, 5  ;;  %v1113_v13 = vrot.slane %v4082_v9, 5 }
  0x21   : > { %v1110_v5 = vor.u32 %v1109_v1, %v1108_v0  ;;  %v566_v6 = vsel %vm530_vm3, %v561_v3, %v565_v4  ;;  %v569_v15 = vor.u32 %v567_v62, %v565_v4  ;;  %v573_v16 = vrot.slane %v4082_v9, 1 }
  0x22   : > { %v1112_v12 = vrot.slane %v4084_v10, 4  ;;  %v1445_v14 = vsel %vm1434_vm2, %v1442_v63, %v1444_v11  ;;  %v4100_v21 = vshll.u32 %v4095_v20, 16  ;;  %v4103_v22 = vshrl.u32 %v4095_v20, 16 }
  0x23   : > { %v1111_v7 = vsel %vm1092_vm4, %v1106_v57, %v1110_v5  ;;  %v574_v18 = vsel %vm530_vm3, %v569_v15, %v573_v16  ;;  %v1446_v23 = vrot.slane %v4095_v20, 5  ;;  %v577_v27 = vor.u32 %v4084_v10, %v573_v16 }
  0x24   : > { %3725 = vmatmul.msk.bf16.gmra.mxu1 %vm719_vm1, %v3894_v17  ;;  %v1114_v17 = vor.u32 %v1113_v13, %v1112_v12  ;;  %v1116_v24 = vrot.slane %v4103_v22, 4  ;;  %v1117_v25 = vrot.slane %v4100_v21, 5  ;;  %v581_v28 = vrot.slane %v4100_v21, 1 }
  0x25   : > { %v4110_v26 = vsel %vm1434_vm2, %v1444_v11, %v1446_v23  ;;  %v4124_v33 = vshll.u32 %v3900_v32, 16  ;;  %v1448_v35 = vrot.slane %v3900_v32, 5  ;;  %v4147_v45 = vshll.u32 %v3901_v44, 16 }
  0x26   : > { %v1115_v19 = vsel %vm1092_vm4, %v1110_v5, %v1114_v17  ;;  %v1118_v29 = vor.u32 %v1117_v25, %v1116_v24  ;;  %v4117_v30 = vsel %vm530_vm3, %v577_v27, %v581_v28  ;;  %v585_v39 = vor.u32 %v4103_v22, %v581_v28 }
  0x27   : > { %3773 = vmatmul.msk.bf16.gmra.mxu3 %vm719_vm1, %v1439_v42  ;;  %v1121_v37 = vrot.slane %v4124_v33, 5  ;;  %v4133_v38 = vsel %vm1434_vm2, %v1446_v23, %v1448_v35  ;;  %v589_v40 = vrot.slane %v4124_v33, 1  ;;  %v1125_v49 = vrot.slane %v4147_v45, 5 }
  0x28   : > { %v1119_v31 = vsel %vm1092_vm4, %v1114_v17, %v1118_v29  ;;  %v597_v52 = vrot.slane %v4147_v45, 1  ;;  %v4169_v57 = vshll.u32 %v3902_v56, 16 }
  0x29   : > { %v4140_v42 = vsel %vm530_vm3, %v585_v39, %v589_v40 }
  0x2a   : > { %v1129_v62 = vrot.slane %v4169_v57, 5  ;;  %v605_v1 = vrot.slane %v4169_v57, 1 }
  0x2b   : > { %3702 = vmatmul.msk.bf16.gmra.mxu0 %vm719_vm1, %v550_v46  ;;  %v4149_v46 = vshrl.u32 %v3901_v44, 16 }
  0x2c   : > { %3749 = vmatmul.msk.bf16.gmra.mxu2 %vm719_vm1, %v1103_v47  ;;  %v1450_v47 = vrot.slane %v3901_v44, 5 }
  0x2d   : > { %v601_v0 = vor.u32 %v4149_v46, %v597_v52 }
  0x2e   : > { %v4155_v50 = vsel %vm1434_vm2, %v1448_v35, %v1450_v47 }
  0x2f   : > { %v4184_v4 = vsel %vm530_vm3, %v601_v0, %v605_v1 }
  0x34   : > { %3726 = vmatmul.msk.bf16.gmra.mxu1 %vm719_vm1, %v3895_v34  ;;  %v4126_v34 = vshrl.u32 %v3900_v32, 16 }
  0x36   : > { %v1120_v36 = vrot.slane %v4126_v34, 4  ;;  %v593_v51 = vor.u32 %v4126_v34, %v589_v40 }
  0x37   : > { %3774 = vmatmul.msk.bf16.gmra.mxu3 %vm719_vm1, %v1441_v54 }
  0x38   : > { %v1122_v41 = vor.u32 %v1121_v37, %v1120_v36  ;;  %v4162_v54 = vsel %vm530_vm3, %v593_v51, %v597_v52 }
  0x3a   : > { %v1123_v43 = vsel %vm1092_vm4, %v1118_v29, %v1122_v41 }
  0x3b   : > { %3703 = vmatmul.msk.bf16.gmra.mxu0 %vm719_vm1, %v558_v58  ;;  %v4171_v58 = vshrl.u32 %v3902_v56, 16 }
  0x3c   : > { %3750 = vmatmul.msk.bf16.gmra.mxu2 %vm719_vm1, %v1107_v59  ;;  %v1452_v59 = vrot.slane %v3902_v56, 5 }
  0x3d   : > { %v1128_v61 = vrot.slane %v4171_v58, 4  ;;  %v609_v29 = vor.u32 %v4171_v58, %v605_v1 }
  0x3e   : > { %v4177_v63 = vsel %vm1434_vm2, %v1450_v47, %v1452_v59 }
  0x44   : > { %3727 = vmatmul.msk.bf16.gmra.mxu1 %vm719_vm1, %v3896_v48  ;;  %v1124_v48 = vrot.slane %v4149_v46, 4 }
  0x46   : > { %v1126_v53 = vor.u32 %v1125_v49, %v1124_v48 }
  0x47   : > { %3775 = vmatmul.msk.bf16.gmra.mxu3 %vm719_vm1, %v1443_v2  ;;  %v1130_v2 = vor.u32 %v1129_v62, %v1128_v61 }
  0x48   : > { %v1127_v55 = vsel %vm1092_vm4, %v1122_v41, %v1126_v53 }
  0x4b   : > { %3704 = vmatmul.msk.bf16.gmra.mxu0 %vm719_vm1, %v566_v6  ;;  %v1131_v6 = vsel %vm1092_vm4, %v1126_v53, %v1130_v2 }
  0x4c   : > { %3751 = vmatmul.msk.bf16.gmra.mxu2 %vm719_vm1, %v1111_v7 }
  0x54   : > { %3728 = vmatmul.msk.bf16.gmra.mxu1 %vm719_vm1, %v3897_v60 }
  0x57   : > { %3776 = vmatmul.msk.bf16.gmra.mxu3 %vm719_vm1, %v1445_v14 }
  0x5b   : > { %3705 = vmatmul.msk.bf16.gmra.mxu0 %vm719_vm1, %v574_v18 }
  0x5c   : > { %3752 = vmatmul.msk.bf16.gmra.mxu2 %vm719_vm1, %v1115_v19 }
  0x64   : > { %3729 = vmatmul.msk.bf16.gmra.mxu1 %vm719_vm1, %v3898_v8  ;;  %v3903_v8 = vld [vmem:[%s4046_s20 + $0x50] sm:$0xff] }
  0x65   : > { %v4191_v12 = vshll.u32 %v3903_v8, 16  ;;  %v4193_v13 = vshrl.u32 %v3903_v8, 16  ;;  %v1454_v17 = vrot.slane %v3903_v8, 5 }
  0x67   : > { %3777 = vmatmul.msk.bf16.gmra.mxu3 %vm719_vm1, %v4110_v26  ;;  %v1132_v23 = vrot.slane %v4193_v13, 4  ;;  %v1133_v24 = vrot.slane %v4191_v12, 5  ;;  %v4201_v28 = vsel %vm1434_vm2, %v1452_v59, %v1454_v17 }
  0x6b   : > { %3706 = vmatmul.msk.bf16.gmra.mxu0 %vm719_vm1, %v4117_v30 }
  0x6c   : > { %3753 = vmatmul.msk.bf16.gmra.mxu2 %vm719_vm1, %v1119_v31  ;;  %v613_v31 = vrot.slane %v4191_v12, 1 }
  0x6e   : > { %v4208_v39 = vsel %vm530_vm3, %v609_v29, %v613_v31 }
  0x74   : > { %3730 = vmatmul.msk.bf16.gmra.mxu1 %vm719_vm1, %v4095_v20 }
  0x77   : > { %3778 = vmatmul.msk.bf16.gmra.mxu3 %vm719_vm1, %v4133_v38 }
  0x7b   : > { %3707 = vmatmul.msk.bf16.gmra.mxu0 %vm719_vm1, %v4140_v42 }
  0x7c   : > { %3754 = vmatmul.msk.bf16.gmra.mxu2 %vm719_vm1, %v1123_v43 }
  0x84   : > { %3731 = vmatmul.msk.bf16.gmra.mxu1 %vm719_vm1, %v3900_v32  ;;  %v1134_v32 = vor.u32 %v1133_v24, %v1132_v23 }
  0x86   : > { %v1135_v41 = vsel %vm1092_vm4, %v1130_v2, %v1134_v32 }
  0x87   : > { %3779 = vmatmul.msk.bf16.gmra.mxu3 %vm719_vm1, %v4155_v50 }
  0x8b   : > { %3708 = vmatmul.msk.bf16.gmra.mxu0 %vm719_vm1, %v4162_v54 }
  0x8c   : > { %3755 = vmatmul.msk.bf16.gmra.mxu2 %vm719_vm1, %v1127_v55 }
  0x91   : > { %v975_v60 = vpop.f32.mrf.mxu1 }
  0x94   : > { %3732 = vmatmul.msk.bf16.gmra.mxu1 %vm719_vm1, %v3901_v44  ;;  %v3904_v44 = vld [vmem:[%s4046_s20 + $0x58] sm:$0xff] }
  0x95   : > { %v4217_v49 = vshll.u32 %v3904_v44, 16  ;;  %v4219_v51 = vshrl.u32 %v3904_v44, 16 }
  0x97   : > { %3780 = vmatmul.msk.bf16.gmra.mxu3 %vm719_vm1, %v4177_v63  ;;  %v1136_v61 = vrot.slane %v4219_v51, 4  ;;  %v1137_v62 = vrot.slane %v4217_v49, 5 }
  0x98   : > { %v802_v3 = vpop.f32.mrf.mxu0 }
  0x99   : > { %v976_v5 = vadd.f32 %v975_v60, %v802_v3  ;;  %v977_v7 = vpop.f32.mrf.mxu1  ;;  %v617_v3 = vor.u32 %v4193_v13, %v613_v31 }
  0x9a   : > { %v1563_v11 = vpop.f32.mrf.mxu3 }
  0x9b   : > { %3709 = vmatmul.msk.bf16.gmra.mxu0 %vm719_vm1, %v4184_v4 }
  0x9c   : > { %3756 = vmatmul.msk.bf16.gmra.mxu2 %vm719_vm1, %v1131_v6  ;;  %v1138_v6 = vor.u32 %v1137_v62, %v1136_v61 }
  0x9f   : > { %v1271_v14 = vpop.f32.mrf.mxu2 }
  0xa0   : > { %v1386_v15 = vadd.f32 %v1271_v14, %v976_v5  ;;  %v804_v16 = vpop.f32.mrf.mxu0  ;;  %v621_v5 = vrot.slane %v4217_v49, 1 }
  0xa1   : > { %v978_v18 = vadd.f32 %v977_v7, %v804_v16  ;;  %v980_v19 = vpop.f32.mrf.mxu1 }
  0xa2   : > { %v1565_v25 = vpop.f32.mrf.mxu3  ;;  %v4197_v27 = vadd.f32 %v1563_v11, %v1386_v15  ;;  %v4234_v15 = vsel %vm530_vm3, %v617_v3, %v621_v5 }
  0xa4   : > { %3733 = vmatmul.msk.bf16.gmra.mxu1 %vm719_vm1, %v3902_v56  ;;  %v1456_v56 = vrot.slane %v3904_v44, 5 }
  0xa6   : > { %v4227_v2 = vsel %vm1434_vm2, %v1454_v17, %v1456_v56  ;;  %v3905_v17 = vld [vmem:[%s4046_s20 + $0x60] sm:$0xff] }
  0xa7   : > { %v1273_v35 = vpop.f32.mrf.mxu2  ;;  %3781 = vmatmul.msk.bf16.gmra.mxu3 %vm719_vm1, %v4201_v28  ;;  %v4243_v24 = vshll.u32 %v3905_v17, 16 }
  0xa8   : > { %v1387_v36 = vadd.f32 %v1273_v35, %v978_v18  ;;  %v807_v37 = vpop.f32.mrf.mxu0 }
  0xa9   : > { %v981_v40 = vadd.f32 %v980_v19, %v807_v37  ;;  %v982_v43 = vpop.f32.mrf.mxu1 }
  0xaa   : > { %v1568_v47 = vpop.f32.mrf.mxu3  ;;  %v4212_v48 = vadd.f32 %v1565_v25, %v1387_v36  ;;  %v4245_v25 = vshrl.u32 %v3905_v17, 16  ;;  %v1458_v36 = vrot.slane %v3905_v17, 5 }
  0xab   : > { %3710 = vmatmul.msk.bf16.gmra.mxu0 %vm719_vm1, %v4208_v39 }
  0xac   : > { %5370 = vst [vmem:[#allocation2_spill] sm:$0xff] %v4212_v48  ;;  %3757 = vmatmul.msk.bf16.gmra.mxu2 %vm719_vm1, %v1135_v41  ;;  %v1141_v41 = vrot.slane %v4243_v24, 5 }
  0xaf   : > { %v1276_v52 = vpop.f32.mrf.mxu2 }
  0xb0   : > { %v1388_v53 = vadd.f32 %v1276_v52, %v981_v40  ;;  %v809_v55 = vpop.f32.mrf.mxu0  ;;  %v1140_v40 = vrot.slane %v4245_v25, 4  ;;  %v4253_v52 = vsel %vm1434_vm2, %v1456_v56, %v1458_v36  ;;  %v3906_v56 = vld [vmem:[%s4046_s20 + $0x68] sm:$0xff] }
  0xb1   : > { %v983_v59 = vadd.f32 %v982_v43, %v809_v55  ;;  %v985_v60 = vpop.f32.mrf.mxu1  ;;  %v629_v55 = vrot.slane %v4243_v24, 1 }
  0xb2   : > { %v1570_v0 = vpop.f32.mrf.mxu3  ;;  %v4223_v1 = vadd.f32 %v1568_v47, %v1388_v53  ;;  %v625_v53 = vor.u32 %v4219_v51, %v621_v5  ;;  %v4269_v5 = vshll.u32 %v3906_v56, 16 }
  0xb4   : > { %5371 = vst [vmem:[#allocation3_spill] sm:$0xff] %v4223_v1  ;;  %3734 = vmatmul.msk.bf16.gmra.mxu1 %vm719_vm1, %v3903_v8  ;;  %v1139_v8 = vsel %vm1092_vm4, %v1134_v32, %v1138_v6 }
  0xb7   : > { %v1278_v7 = vpop.f32.mrf.mxu2  ;;  %3782 = vmatmul.msk.bf16.gmra.mxu3 %vm719_vm1, %v4227_v2 }
  0xb8   : > { %v1389_v11 = vadd.f32 %v1278_v7, %v983_v59  ;;  %v812_v14 = vpop.f32.mrf.mxu0  ;;  %v1142_v59 = vor.u32 %v1141_v41, %v1140_v40 }
  0xb9   : > { %v986_v16 = vadd.f32 %v985_v60, %v812_v14  ;;  %v987_v18 = vpop.f32.mrf.mxu1 }
  0xba   : > { %v1573_v19 = vpop.f32.mrf.mxu3  ;;  %v4238_v23 = vadd.f32 %v1570_v0, %v1389_v11  ;;  %v4260_v0 = vsel %vm530_vm3, %v625_v53, %v629_v55  ;;  %v637_v53 = vrot.slane %v4269_v5, 1 }
  0xbb   : > { %3711 = vmatmul.msk.bf16.gmra.mxu0 %vm719_vm1, %v4234_v15 }
  0xbc   : > { %5372 = vst [vmem:[#allocation4_spill] sm:$0xff] %v4238_v23  ;;  %3758 = vmatmul.msk.bf16.gmra.mxu2 %vm719_vm1, %v1139_v8 }
  0xbf   : > { %v1281_v29 = vpop.f32.mrf.mxu2 }
  0xc0   : > { %v1390_v31 = vadd.f32 %v1281_v29, %v986_v16  ;;  %v814_v35 = vpop.f32.mrf.mxu0  ;;  %v4271_v16 = vshrl.u32 %v3906_v56, 16  ;;  %v1460_v29 = vrot.slane %v3906_v56, 5 }
  0xc1   : > { %v988_v37 = vadd.f32 %v987_v18, %v814_v35  ;;  %v990_v32 = vpop.f32.mrf.mxu1 }
  0xc2   : > { %v1575_v43 = vpop.f32.mrf.mxu3  ;;  %v4249_v47 = vadd.f32 %v1573_v19, %v1390_v31  ;;  %v1144_v35 = vrot.slane %v4271_v16, 4  ;;  %v4279_v41 = vsel %vm1434_vm2, %v1458_v36, %v1460_v29  ;;  %v3907_v36 = vld [vmem:[%s4046_s20 + $0x70] sm:$0xff] }
  0xc4   : > { %5373 = vst [vmem:[#allocation5_spill] sm:$0xff] %v4249_v47  ;;  %3735 = vmatmul.msk.bf16.gmra.mxu1 %vm719_vm1, %v3904_v44  ;;  %v1143_v44 = vsel %vm1092_vm4, %v1138_v6, %v1142_v59 }
  0xc7   : > { %v1283_v60 = vpop.f32.mrf.mxu2  ;;  %3783 = vmatmul.msk.bf16.gmra.mxu3 %vm719_vm1, %v4253_v52 }
  0xc8   : > { %v1391_v61 = vadd.f32 %v1283_v60, %v988_v37  ;;  %v817_v62 = vpop.f32.mrf.mxu0  ;;  %v1145_v37 = vrot.slane %v4269_v5, 5 }
  0xc9   : > { %v991_v3 = vadd.f32 %v990_v32, %v817_v62  ;;  %v992_v7 = vpop.f32.mrf.mxu1 }
  0xca   : > { %v1578_v11 = vpop.f32.mrf.mxu3  ;;  %v4264_v14 = vadd.f32 %v1575_v43, %v1391_v61  ;;  %v633_v43 = vor.u32 %v4245_v25, %v629_v55  ;;  %v1146_v60 = vor.u32 %v1145_v37, %v1144_v35  ;;  %v4295_v55 = vshll.u32 %v3907_v36, 16 }
  0xcb   : > { %3712 = vmatmul.msk.bf16.gmra.mxu0 %vm719_vm1, %v4260_v0 }
  0xcc   : > { %5374 = vst [vmem:[#allocation6_spill] sm:$0xff] %v4264_v14  ;;  %3759 = vmatmul.msk.bf16.gmra.mxu2 %vm719_vm1, %v1143_v44  ;;  %v4286_v44 = vsel %vm530_vm3, %v633_v43, %v637_v53 }
  0xcf   : > { %v1286_v8 = vpop.f32.mrf.mxu2 }
  0xd0   : > { %v1392_v18 = vadd.f32 %v1286_v8, %v991_v3  ;;  %v819_v19 = vpop.f32.mrf.mxu0 }
  0xd1   : > { %v993_v31 = vadd.f32 %v992_v7, %v819_v19  ;;  %v995_v6 = vpop.f32.mrf.mxu1  ;;  %v4297_v19 = vshrl.u32 %v3907_v36, 16 }
  0xd2   : > { %v1580_v32 = vpop.f32.mrf.mxu3  ;;  %v4275_v40 = vadd.f32 %v1578_v11, %v1392_v18 }
  0xd4   : > { %5375 = vst [vmem:[#allocation7_spill] sm:$0xff] %v4275_v40  ;;  %3736 = vmatmul.msk.bf16.gmra.mxu1 %vm719_vm1, %v3905_v17  ;;  %v1147_v17 = vsel %vm1092_vm4, %v1142_v59, %v1146_v60 }
  0xd7   : > { %v1288_v61 = vpop.f32.mrf.mxu2  ;;  %3784 = vmatmul.msk.bf16.gmra.mxu3 %vm719_vm1, %v4279_v41 }
  0xd8   : > { %v1393_v62 = vadd.f32 %v1288_v61, %v993_v31  ;;  %v822_v3 = vpop.f32.mrf.mxu0  ;;  %v1148_v61 = vrot.slane %v4297_v19, 4 }
  0xd9   : > { %v996_v7 = vadd.f32 %v995_v6, %v822_v3  ;;  %v997_v11 = vpop.f32.mrf.mxu1  ;;  %v1462_v6 = vrot.slane %v3907_v36, 5 }
  0xda   : > { %v1583_v8 = vpop.f32.mrf.mxu3  ;;  %v4290_v18 = vadd.f32 %v1580_v32, %v1393_v62  ;;  %v1149_v32 = vrot.slane %v4295_v55, 5 }
  0xdb   : > { %3713 = vmatmul.msk.bf16.gmra.mxu0 %vm719_vm1, %v4286_v44 }
  0xdc   : > { %5376 = vst [vmem:[#allocation8_spill] sm:$0xff] %v4290_v18  ;;  %3760 = vmatmul.msk.bf16.gmra.mxu2 %vm719_vm1, %v1147_v17  ;;  %v4305_v17 = vsel %vm1434_vm2, %v1460_v29, %v1462_v6  ;;  %v641_v18 = vor.u32 %v4271_v16, %v637_v53  ;;  %v3908_v29 = vld [vmem:[%s4046_s20 + $0x78] sm:$0xff] }
  0xdd   : > { %5378 = vst [vmem:[#allocation10_spill] sm:$0xff] %v4305_v17  ;;  %v4321_v53 = vshll.u32 %v3908_v29, 16 }
  0xdf   : > { %v1291_v31 = vpop.f32.mrf.mxu2  ;;  %5381 = vst [vmem:[#allocation13_spill] sm:$0xff] %v4321_v53 }
  0xe0   : > { %v1394_v35 = vadd.f32 %v1291_v31, %v996_v7  ;;  %v824_v37 = vpop.f32.mrf.mxu0  ;;  %v645_v7 = vrot.slane %v4295_v55, 1  ;;  %v1150_v31 = vor.u32 %v1149_v32, %v1148_v61 }
  0xe1   : > { %v998_v43 = vadd.f32 %v997_v11, %v824_v37  ;;  %v1000_v59 = vpop.f32.mrf.mxu1 }
  0xe2   : > { %v1585_v62 = vpop.f32.mrf.mxu3  ;;  %v4301_v3 = vadd.f32 %v1583_v8, %v1394_v35  ;;  %v4312_v14 = vsel %vm530_vm3, %v641_v18, %v645_v7  ;;  %v649_v23 = vor.u32 %v4297_v19, %v645_v7 }
  0xe3   : > { %5379 = vst [vmem:[#allocation11_spill] sm:$0xff] %v4312_v14 }
  0xe4   : > { %5377 = vst [vmem:[#allocation9_spill] sm:$0xff] %v4301_v3  ;;  %3737 = vmatmul.msk.bf16.gmra.mxu1 %vm719_vm1, %v3906_v56  ;;  %v1151_v56 = vsel %vm1092_vm4, %v1146_v60, %v1150_v31 }
  0xe7   : > { %v1293_v11 = vpop.f32.mrf.mxu2  ;;  %3785 = vmatmul.msk.bf16.gmra.mxu3 %vm719_vm1, %v4305_v17 }
  0xe8   : > { %v1395_v37 = vadd.f32 %v1293_v11, %v998_v43  ;;  %v827_v40 = vpop.f32.mrf.mxu0  ;;  %v4323_v43 = vshrl.u32 %v3908_v29, 16 }
  0xe9   : > { %v1001_v8 = vadd.f32 %v1000_v59, %v827_v40  ;;  %v1002_v35 = vpop.f32.mrf.mxu1  ;;  %v1464_v40 = vrot.slane %v3908_v29, 5 }
  0xea   : > { %v1588_v3 = vpop.f32.mrf.mxu3  ;;  %v4316_v47 = vadd.f32 %v1585_v62, %v1395_v37  ;;  %5382 = vst [vmem:[#allocation14_spill] sm:$0xff] %v4323_v43  ;;  %v1152_v11 = vrot.slane %v4323_v43, 4  ;;  %v1153_v62 = vrot.slane %v4321_v53, 5 }
  0xeb   : > { %3714 = vmatmul.msk.bf16.gmra.mxu0 %vm719_vm1, %v4312_v14 }
  0xec   : > { %5380 = vst [vmem:[#allocation12_spill] sm:$0xff] %v4316_v47  ;;  %3761 = vmatmul.msk.bf16.gmra.mxu2 %vm719_vm1, %v1151_v56  ;;  %v4331_v56 = vsel %vm1434_vm2, %v1462_v6, %v1464_v40  ;;  %v3909_v6 = vld [vmem:[%s4046_s20 + $0x80] sm:$0xff] }
  0xed   : > { %5384 = vst [vmem:[#allocation16_spill] sm:$0xff] %v4331_v56  ;;  %v4347_v7 = vshll.u32 %v3909_v6, 16 }
  0xef   : > { %v1296_v61 = vpop.f32.mrf.mxu2  ;;  %5387 = vst [vmem:[#allocation19_spill] sm:$0xff] %v4347_v7 }
  0xf0   : > { %v1396_v18 = vadd.f32 %v1296_v61, %v1001_v8  ;;  %v829_v32 = vpop.f32.mrf.mxu0  ;;  %v653_v8 = vrot.slane %v4321_v53, 1  ;;  %v1154_v61 = vor.u32 %v1153_v62, %v1152_v11 }
  0xf1   : > { %v1003_v59 = vadd.f32 %v1002_v35, %v829_v32  ;;  %v1005_v60 = vpop.f32.mrf.mxu1 }
  0xf2   : > { %v1590_v37 = vpop.f32.mrf.mxu3  ;;  %v4327_v47 = vadd.f32 %v1588_v3, %v1396_v18  ;;  %v4338_v48 = vsel %vm530_vm3, %v649_v23, %v653_v8 }
  0xf3   : > { %5385 = vst [vmem:[#allocation17_spill] sm:$0xff] %v4338_v48 }
  0xf4   : > { %5383 = vst [vmem:[#allocation15_spill] sm:$0xff] %v4327_v47  ;;  %3738 = vmatmul.msk.bf16.gmra.mxu1 %vm719_vm1, %v3907_v36  ;;  %v1155_v36 = vsel %vm1092_vm4, %v1150_v31, %v1154_v61 }
  0xf7   : > { %v1298_v35 = vpop.f32.mrf.mxu2  ;;  %3786 = vmatmul.msk.bf16.gmra.mxu3 %vm719_vm1, %v4331_v56  ;;  %v657_v56 = vor.u32 %v4323_v43, %v653_v8 }
  0xf8   : > { %v1397_v32 = vadd.f32 %v1298_v35, %v1003_v59  ;;  %v832_v1 = vpop.f32.mrf.mxu0  ;;  %v4349_v59 = vshrl.u32 %v3909_v6, 16 }
  0xf9   : > { %v1006_v3 = vadd.f32 %v1005_v60, %v832_v1  ;;  %v1007_v18 = vpop.f32.mrf.mxu1  ;;  %v1466_v1 = vrot.slane %v3909_v6, 5 }
  0xfa   : > { %v1593_v47 = vpop.f32.mrf.mxu3  ;;  %v4342_v17 = vadd.f32 %v1590_v37, %v1397_v32  ;;  %5388 = vst [vmem:[#allocation20_spill] sm:$0xff] %v4349_v59  ;;  %v1156_v35 = vrot.slane %v4349_v59, 4  ;;  %v1157_v37 = vrot.slane %v4347_v7, 5 }
  0xfb   : > { %3715 = vmatmul.msk.bf16.gmra.mxu0 %vm719_vm1, %v4338_v48 }
  0xfc   : > { %5386 = vst [vmem:[#allocation18_spill] sm:$0xff] %v4342_v17  ;;  %3762 = vmatmul.msk.bf16.gmra.mxu2 %vm719_vm1, %v1155_v36  ;;  %v4357_v36 = vsel %vm1434_vm2, %v1464_v40, %v1466_v1  ;;  %v3910_v40 = vld [vmem:[%s4046_s20 + $0x88] sm:$0xff] }
  0xfd   : > { %5390 = vst [vmem:[#allocation22_spill] sm:$0xff] %v4357_v36  ;;  %v4373_v8 = vshll.u32 %v3910_v40, 16 }
  0xff   : > { %v1301_v11 = vpop.f32.mrf.mxu2  ;;  %5393 = vst [vmem:[#allocation25_spill] sm:$0xff] %v4373_v8 }
 0x100   : > { %v1398_v23 = vadd.f32 %v1301_v11, %v1006_v3  ;;  %v834_v62 = vpop.f32.mrf.mxu0  ;;  %v661_v3 = vrot.slane %v4347_v7, 1  ;;  %v1158_v11 = vor.u32 %v1157_v37, %v1156_v35 }
 0x101   : > { %v1008_v60 = vadd.f32 %v1007_v18, %v834_v62  ;;  %v1010_v31 = vpop.f32.mrf.mxu1 }
 0x102   : > { %v1595_v32 = vpop.f32.mrf.mxu3  ;;  %v4353_v17 = vadd.f32 %v1593_v47, %v1398_v23  ;;  %v4364_v53 = vsel %vm530_vm3, %v657_v56, %v661_v3 }
 0x103   : > { %5391 = vst [vmem:[#allocation23_spill] sm:$0xff] %v4364_v53 }
 0x104   : > { %5389 = vst [vmem:[#allocation21_spill] sm:$0xff] %v4353_v17  ;;  %3739 = vmatmul.msk.bf16.gmra.mxu1 %vm719_vm1, %v3908_v29  ;;  %v1159_v29 = vsel %vm1092_vm4, %v1154_v61, %v1158_v11 }
 0x107   : > { %v1303_v18 = vpop.f32.mrf.mxu2  ;;  %3787 = vmatmul.msk.bf16.gmra.mxu3 %vm719_vm1, %v4357_v36  ;;  %v665_v36 = vor.u32 %v4349_v59, %v661_v3 }
 0x108   : > { %v1399_v62 = vadd.f32 %v1303_v18, %v1008_v60  ;;  %v837_v48 = vpop.f32.mrf.mxu0  ;;  %v4375_v60 = vshrl.u32 %v3910_v40, 16 }
 0x109   : > { %v1011_v47 = vadd.f32 %v1010_v31, %v837_v48  ;;  %v1012_v23 = vpop.f32.mrf.mxu1  ;;  %v1468_v48 = vrot.slane %v3910_v40, 5 }
 0x10a   : > { %v1598_v17 = vpop.f32.mrf.mxu3  ;;  %v4368_v14 = vadd.f32 %v1595_v32, %v1399_v62  ;;  %5394 = vst [vmem:[#allocation26_spill] sm:$0xff] %v4375_v60  ;;  %v1160_v18 = vrot.slane %v4375_v60, 4  ;;  %v1161_v32 = vrot.slane %v4373_v8, 5 }
 0x10b   : > { %3716 = vmatmul.msk.bf16.gmra.mxu0 %vm719_vm1, %v4364_v53 }
 0x10c   : > { %5392 = vst [vmem:[#allocation24_spill] sm:$0xff] %v4368_v14  ;;  %3763 = vmatmul.msk.bf16.gmra.mxu2 %vm719_vm1, %v1159_v29  ;;  %v4383_v29 = vsel %vm1434_vm2, %v1466_v1, %v1468_v48  ;;  %v3911_v1 = vld [vmem:[%s4046_s20 + $0x90] sm:$0xff] }
 0x10d   : > { %5396 = vst [vmem:[#allocation28_spill] sm:$0xff] %v4383_v29  ;;  %v4399_v3 = vshll.u32 %v3911_v1, 16 }
 0x10f   : > { %v1306_v35 = vpop.f32.mrf.mxu2  ;;  %5399 = vst [vmem:[#allocation31_spill] sm:$0xff] %v4399_v3 }
 0x110   : > { %v1400_v56 = vadd.f32 %v1306_v35, %v1011_v47  ;;  %v839_v37 = vpop.f32.mrf.mxu0  ;;  %v669_v47 = vrot.slane %v4373_v8, 1  ;;  %v1162_v35 = vor.u32 %v1161_v32, %v1160_v18 }
 0x111   : > { %v1013_v31 = vadd.f32 %v1012_v23, %v839_v37  ;;  %v1015_v61 = vpop.f32.mrf.mxu1 }
 0x112   : > { %v1600_v62 = vpop.f32.mrf.mxu3  ;;  %v4379_v14 = vadd.f32 %v1598_v17, %v1400_v56  ;;  %v4390_v7 = vsel %vm530_vm3, %v665_v36, %v669_v47 }
 0x113   : > { %5397 = vst [vmem:[#allocation29_spill] sm:$0xff] %v4390_v7 }
 0x114   : > { %5395 = vst [vmem:[#allocation27_spill] sm:$0xff] %v4379_v14  ;;  %3740 = vmatmul.msk.bf16.gmra.mxu1 %vm719_vm1, %v3909_v6  ;;  %v1163_v6 = vsel %vm1092_vm4, %v1158_v11, %v1162_v35 }
 0x117   : > { %v1308_v23 = vpop.f32.mrf.mxu2  ;;  %3788 = vmatmul.msk.bf16.gmra.mxu3 %vm719_vm1, %v4383_v29  ;;  %v673_v29 = vor.u32 %v4375_v60, %v669_v47 }
 0x118   : > { %v1401_v37 = vadd.f32 %v1308_v23, %v1013_v31  ;;  %v842_v53 = vpop.f32.mrf.mxu0  ;;  %v4401_v31 = vshrl.u32 %v3911_v1, 16 }
 0x119   : > { %v1016_v17 = vadd.f32 %v1015_v61, %v842_v53  ;;  %v1017_v56 = vpop.f32.mrf.mxu1  ;;  %v1470_v53 = vrot.slane %v3911_v1, 5 }
 0x11a   : > { %v1603_v14 = vpop.f32.mrf.mxu3  ;;  %v4394_v43 = vadd.f32 %v1600_v62, %v1401_v37  ;;  %5400 = vst [vmem:[#allocation32_spill] sm:$0xff] %v4401_v31  ;;  %v1164_v23 = vrot.slane %v4401_v31, 4  ;;  %v1165_v62 = vrot.slane %v4399_v3, 5 }
 0x11b   : > { %3717 = vmatmul.msk.bf16.gmra.mxu0 %vm719_vm1, %v4390_v7 }
 0x11c   : > { %5398 = vst [vmem:[#allocation30_spill] sm:$0xff] %v4394_v43  ;;  %3764 = vmatmul.msk.bf16.gmra.mxu2 %vm719_vm1, %v1163_v6  ;;  %v4409_v6 = vsel %vm1434_vm2, %v1468_v48, %v1470_v53  ;;  %v3912_v48 = vld [vmem:[%s4046_s20 + $0x98] sm:$0xff] }
 0x11d   : > { %5402 = vst [vmem:[#allocation34_spill] sm:$0xff] %v4409_v6  ;;  %v4425_v47 = vshll.u32 %v3912_v48, 16 }
 0x11f   : > { %v1311_v18 = vpop.f32.mrf.mxu2  ;;  %5405 = vst [vmem:[#allocation37_spill] sm:$0xff] %v4425_v47 }
 0x120   : > { %v1402_v36 = vadd.f32 %v1311_v18, %v1016_v17  ;;  %v844_v32 = vpop.f32.mrf.mxu0  ;;  %v677_v17 = vrot.slane %v4399_v3, 1  ;;  %v1166_v18 = vor.u32 %v1165_v62, %v1164_v23 }
 0x121   : > { %v1018_v61 = vadd.f32 %v1017_v56, %v844_v32  ;;  %v1020_v11 = vpop.f32.mrf.mxu1 }
 0x122   : > { %v1605_v37 = vpop.f32.mrf.mxu3  ;;  %v4405_v43 = vadd.f32 %v1603_v14, %v1402_v36  ;;  %v4416_v8 = vsel %vm530_vm3, %v673_v29, %v677_v17 }
 0x123   : > { %5403 = vst [vmem:[#allocation35_spill] sm:$0xff] %v4416_v8 }
 0x124   : > { %5401 = vst [vmem:[#allocation33_spill] sm:$0xff] %v4405_v43  ;;  %3741 = vmatmul.msk.bf16.gmra.mxu1 %vm719_vm1, %v3910_v40  ;;  %v1167_v40 = vsel %vm1092_vm4, %v1162_v35, %v1166_v18 }
 0x127   : > { %v1313_v56 = vpop.f32.mrf.mxu2  ;;  %3789 = vmatmul.msk.bf16.gmra.mxu3 %vm719_vm1, %v4409_v6  ;;  %v681_v6 = vor.u32 %v4401_v31, %v677_v17 }
 0x128   : > { %v1403_v32 = vadd.f32 %v1313_v56, %v1018_v61  ;;  %v847_v7 = vpop.f32.mrf.mxu0  ;;  %v4427_v61 = vshrl.u32 %v3912_v48, 16 }
 0x129   : > { %v1021_v14 = vadd.f32 %v1020_v11, %v847_v7  ;;  %v1022_v36 = vpop.f32.mrf.mxu1  ;;  %v1472_v7 = vrot.slane %v3912_v48, 5 }
 0x12a   : > { %v1608_v43 = vpop.f32.mrf.mxu3  ;;  %v4420_v59 = vadd.f32 %v1605_v37, %v1403_v32  ;;  %v1168_v56 = vrot.slane %v4427_v61, 4  ;;  %v1169_v37 = vrot.slane %v4425_v47, 5 }
 0x12b   : > { %3718 = vmatmul.msk.bf16.gmra.mxu0 %vm719_vm1, %v4416_v8 }
 0x12c   : > { %5404 = vst [vmem:[#allocation36_spill] sm:$0xff] %v4420_v59  ;;  %3765 = vmatmul.msk.bf16.gmra.mxu2 %vm719_vm1, %v1167_v40  ;;  %v4435_v40 = vsel %vm1434_vm2, %v1470_v53, %v1472_v7  ;;  %v3913_v53 = vld [vmem:[%s4046_s20 + $0xa0] sm:$0xff] }
 0x12d   : > { %5407 = vst [vmem:[#allocation39_spill] sm:$0xff] %v4435_v40  ;;  %v4451_v17 = vshll.u32 %v3913_v53, 16 }
 0x12f   : > { %v1316_v23 = vpop.f32.mrf.mxu2  ;;  %5410 = vst [vmem:[#allocation42_spill] sm:$0xff] %v4451_v17 }
 0x130   : > { %v1404_v29 = vadd.f32 %v1316_v23, %v1021_v14  ;;  %v849_v62 = vpop.f32.mrf.mxu0  ;;  %v685_v14 = vrot.slane %v4425_v47, 1  ;;  %v1170_v23 = vor.u32 %v1169_v37, %v1168_v56 }
 0x131   : > { %v1023_v11 = vadd.f32 %v1022_v36, %v849_v62  ;;  %v1025_v35 = vpop.f32.mrf.mxu1 }
 0x132   : > { %v1610_v32 = vpop.f32.mrf.mxu3  ;;  %v4431_v59 = vadd.f32 %v1608_v43, %v1404_v29  ;;  %v4442_v3 = vsel %vm530_vm3, %v681_v6, %v685_v14 }
 0x133   : > { %5408 = vst [vmem:[#allocation40_spill] sm:$0xff] %v4442_v3 }
 0x134   : > { %5406 = vst [vmem:[#allocation38_spill] sm:$0xff] %v4431_v59  ;;  %3742 = vmatmul.msk.bf16.gmra.mxu1 %vm719_vm1, %v3911_v1  ;;  %v1171_v1 = vsel %vm1092_vm4, %v1166_v18, %v1170_v23 }
 0x137   : > { %v1318_v36 = vpop.f32.mrf.mxu2  ;;  %3790 = vmatmul.msk.bf16.gmra.mxu3 %vm719_vm1, %v4435_v40  ;;  %v689_v40 = vor.u32 %v4427_v61, %v685_v14 }
 0x138   : > { %v1405_v62 = vadd.f32 %v1318_v36, %v1023_v11  ;;  %v852_v8 = vpop.f32.mrf.mxu0  ;;  %v4453_v11 = vshrl.u32 %v3913_v53, 16 }
 0x139   : > { %v1026_v43 = vadd.f32 %v1025_v35, %v852_v8  ;;  %v1027_v29 = vpop.f32.mrf.mxu1  ;;  %v1474_v8 = vrot.slane %v3913_v53, 5 }
 0x13a   : > { %v1613_v59 = vpop.f32.mrf.mxu3  ;;  %v4446_v60 = vadd.f32 %v1610_v32, %v1405_v62  ;;  %v1172_v36 = vrot.slane %v4453_v11, 4  ;;  %v1173_v32 = vrot.slane %v4451_v17, 5 }
 0x13b   : > { %3719 = vmatmul.msk.bf16.gmra.mxu0 %vm719_vm1, %v4442_v3 }
 0x13c   : > { %5409 = vst [vmem:[#allocation41_spill] sm:$0xff] %v4446_v60  ;;  %3766 = vmatmul.msk.bf16.gmra.mxu2 %vm719_vm1, %v1171_v1  ;;  %v4461_v1 = vsel %vm1434_vm2, %v1472_v7, %v1474_v8  ;;  %v3914_v7 = vld [vmem:[%s4046_s20 + $0xa8] sm:$0xff] }
 0x13d   : > { %5412 = vst [vmem:[#allocation44_spill] sm:$0xff] %v4461_v1  ;;  %v4477_v14 = vshll.u32 %v3914_v7, 16 }
 0x13f   : > { %v1321_v56 = vpop.f32.mrf.mxu2 }
 0x140   : > { %v1406_v6 = vadd.f32 %v1321_v56, %v1026_v43  ;;  %v854_v37 = vpop.f32.mrf.mxu0  ;;  %v693_v43 = vrot.slane %v4451_v17, 1  ;;  %v1174_v56 = vor.u32 %v1173_v32, %v1172_v36 }
 0x141   : > { %v1028_v35 = vadd.f32 %v1027_v29, %v854_v37  ;;  %v1030_v18 = vpop.f32.mrf.mxu1 }
 0x142   : > { %v1615_v62 = vpop.f32.mrf.mxu3  ;;  %v4457_v60 = vadd.f32 %v1613_v59, %v1406_v6  ;;  %v4468_v47 = vsel %vm530_vm3, %v689_v40, %v693_v43 }
 0x143   : > { %5413 = vst [vmem:[#allocation45_spill] sm:$0xff] %v4468_v47 }
 0x144   : > { %5411 = vst [vmem:[#allocation43_spill] sm:$0xff] %v4457_v60  ;;  %3743 = vmatmul.msk.bf16.gmra.mxu1 %vm719_vm1, %v3912_v48  ;;  %v1175_v48 = vsel %vm1092_vm4, %v1170_v23, %v1174_v56 }
 0x147   : > { %v1323_v29 = vpop.f32.mrf.mxu2  ;;  %3791 = vmatmul.msk.bf16.gmra.mxu3 %vm719_vm1, %v4461_v1  ;;  %v697_v1 = vor.u32 %v4453_v11, %v693_v43 }
 0x148   : > { %v1407_v37 = vadd.f32 %v1323_v29, %v1028_v35  ;;  %v857_v3 = vpop.f32.mrf.mxu0  ;;  %v4479_v35 = vshrl.u32 %v3914_v7, 16 }
 0x149   : > { %v1031_v59 = vadd.f32 %v1030_v18, %v857_v3  ;;  %v1032_v6 = vpop.f32.mrf.mxu1  ;;  %v1476_v18 = vrot.slane %v3914_v7, 5 }
 0x14a   : > { %v1618_v60 = vpop.f32.mrf.mxu3  ;;  %v4472_v31 = vadd.f32 %v1615_v62, %v1407_v37  ;;  %v1176_v29 = vrot.slane %v4479_v35, 4  ;;  %v1177_v62 = vrot.slane %v4477_v14, 5 }
 0x14b   : > { %3720 = vmatmul.msk.bf16.gmra.mxu0 %vm719_vm1, %v4468_v47  ;;  %v3915_v47 = vld [vmem:[%s4046_s20 + $0xb0] sm:$0xff] }
 0x14c   : > { %5414 = vst [vmem:[#allocation46_spill] sm:$0xff] %v4472_v31  ;;  %3767 = vmatmul.msk.bf16.gmra.mxu2 %vm719_vm1, %v1175_v48  ;;  %v4487_v48 = vsel %vm1434_vm2, %v1474_v8, %v1476_v18 }
 0x14d   : > { %5416 = vst [vmem:[#allocation48_spill] sm:$0xff] %v4487_v48 }
 0x14f   : > { %v1326_v40 = vpop.f32.mrf.mxu2 }
 0x150   : > { %v1408_v36 = vadd.f32 %v1326_v40, %v1031_v59  ;;  %v859_v3 = vpop.f32.mrf.mxu0  ;;  %v701_v59 = vrot.slane %v4477_v14, 1 }
 0x151   : > { %v1033_v23 = vadd.f32 %v1032_v6, %v859_v3  ;;  %v1035_v32 = vpop.f32.mrf.mxu1  ;;  %v1178_v6 = vor.u32 %v1177_v62, %v1176_v29  ;;  %v4504_v29 = vshll.u32 %v3915_v47, 16 }
 0x152   : > { %v1620_v37 = vpop.f32.mrf.mxu3  ;;  %v4483_v31 = vadd.f32 %v1618_v60, %v1408_v36  ;;  %v4495_v36 = vsel %vm530_vm3, %v697_v1, %v701_v59 }
 0x153   : > { %5417 = vst [vmem:[#allocation49_spill] sm:$0xff] %v4495_v36  ;;  %v1179_v8 = vsel %vm1092_vm4, %v1174_v56, %v1178_v6  ;;  %v1478_v56 = vrot.slane %v3915_v47, 5 }
 0x154   : > { %5415 = vst [vmem:[#allocation47_spill] sm:$0xff] %v4483_v31  ;;  %3744 = vmatmul.msk.bf16.gmra.mxu1 %vm719_vm1, %v3913_v53 }
 0x155   : > { %5419 = vst [vmem:[#allocation51_spill] sm:$0xff] %v4504_v29 }
 0x157   : > { %v1328_v40 = vpop.f32.mrf.mxu2  ;;  %3792 = vmatmul.msk.bf16.gmra.mxu3 %vm719_vm1, %v4487_v48 }
 0x158   : > { %v1409_v3 = vadd.f32 %v1328_v40, %v1033_v23  ;;  %v862_v60 = vpop.f32.mrf.mxu0  ;;  %v4506_v23 = vshrl.u32 %v3915_v47, 16 }
 0x159   : > { %v1036_v53 = vadd.f32 %v1035_v32, %v862_v60  ;;  %v1037_v31 = vpop.f32.mrf.mxu1 }
 0x15a   : > { %v1623_v43 = vpop.f32.mrf.mxu3  ;;  %v4499_v17 = vadd.f32 %v1620_v37, %v1409_v3  ;;  %v1180_v37 = vrot.slane %v4506_v23, 4  ;;  %v1181_v3 = vrot.slane %v4504_v29, 5 }
 0x15b   : > { %3721 = vmatmul.msk.bf16.gmra.mxu0 %vm719_vm1, %v4495_v36  ;;  %v705_v36 = vor.u32 %v4479_v35, %v701_v59 }
 0x15c   : > { %5418 = vst [vmem:[#allocation50_spill] sm:$0xff] %v4499_v17  ;;  %3768 = vmatmul.msk.bf16.gmra.mxu2 %vm719_vm1, %v1179_v8  ;;  %v4514_v8 = vsel %vm1434_vm2, %v1476_v18, %v1478_v56 }
 0x15d   : > { %5421 = vst [vmem:[#allocation53_spill] sm:$0xff] %v4514_v8 }
 0x15f   : > { %v1331_v1 = vpop.f32.mrf.mxu2 }
 0x160   : > { %v1410_v32 = vadd.f32 %v1331_v1, %v1036_v53  ;;  %v864_v62 = vpop.f32.mrf.mxu0  ;;  %v709_v53 = vrot.slane %v4504_v29, 1  ;;  %v1182_v1 = vor.u32 %v1181_v3, %v1180_v37  ;;  %v4530_v37 = vld [vmem:[%s4521_s29] sm:$0xff] }
 0x161   : > { %v1038_v40 = vadd.f32 %v1037_v31, %v864_v62  ;;  %v1040_v60 = vpop.f32.mrf.mxu1 }
 0x162   : > { %v1625_v17 = vpop.f32.mrf.mxu3  ;;  %v4510_v48 = vadd.f32 %v1623_v43, %v1410_v32  ;;  %v4526_v18 = vsel %vm530_vm3, %v705_v36, %v709_v53  ;;  %v1183_v59 = vsel %vm1092_vm4, %v1178_v6, %v1182_v1  ;;  %v4541_v36 = vshrl.u32 %v4530_v37, 16 }
 0x163   : > { %5422 = vst [vmem:[#allocation54_spill] sm:$0xff] %v4526_v18 }
 0x164   : > { %5420 = vst [vmem:[#allocation52_spill] sm:$0xff] %v4510_v48  ;;  %3745 = vmatmul.msk.bf16.gmra.mxu1 %vm719_vm1, %v3914_v7 }
 0x167   : > { %v1333_v31 = vpop.f32.mrf.mxu2  ;;  %3793 = vmatmul.msk.bf16.gmra.mxu3 %vm719_vm1, %v4514_v8 }
 0x168   : > { %v1411_v43 = vadd.f32 %v1333_v31, %v1038_v40  ;;  %v867_v7 = vpop.f32.mrf.mxu0  ;;  %v4538_v40 = vshll.u32 %v4530_v37, 16 }
 0x169   : > { %v1041_v32 = vadd.f32 %v1040_v60, %v867_v7  ;;  %v1042_v62 = vpop.f32.mrf.mxu1  ;;  %v5368_v7 = vrot.slane %v4530_v37, 5 }
 0x16a   : > { %v1628_v3 = vpop.f32.mrf.mxu3  ;;  %v4532_v48 = vadd.f32 %v1625_v17, %v1411_v43  ;;  %v1186_v43 = vrot.slane %v4541_v36, 4 }
 0x16b   : > { %3722 = vmatmul.msk.bf16.gmra.mxu0 %vm719_vm1, %v4526_v18  ;;  %v4553_v29 = vsel %vm1434_vm2, %v1478_v56, %v5368_v7 }
 0x16c   : > { %5423 = vst [vmem:[#allocation55_spill] sm:$0xff] %v4532_v48  ;;  %3769 = vmatmul.msk.bf16.gmra.mxu2 %vm719_vm1, %v1183_v59  ;;  %v1187_v48 = vrot.slane %v4538_v40, 5 }
 0x16f   : > { %v1336_v60 = vpop.f32.mrf.mxu2 }
 0x170   : > { %v1412_v6 = vadd.f32 %v1336_v60, %v1041_v32  ;;  %v869_v31 = vpop.f32.mrf.mxu0  ;;  %v713_v32 = vor.u32 %v4506_v23, %v709_v53  ;;  %v1188_v60 = vor.u32 %v1187_v48, %v1186_v43 }
 0x171   : > { %v1043_v8 = vadd.f32 %v1042_v62, %v869_v31  ;;  %v1045_v17 = vpop.f32.mrf.mxu1  ;;  %v5369_v62 = vrot.slane %v4538_v40, 1 }
 0x172   : > { %v1630_v18 = vpop.f32.mrf.mxu3  ;;  %v4547_v59 = vadd.f32 %v1628_v3, %v1412_v6  ;;  %v1189_v53 = vsel %vm1092_vm4, %v1182_v1, %v1188_v60  ;;  %v1956_v60 = vrot.slane %v4095_v20, 1 }
 0x173   : > { %v4565_v56 = vsel %vm530_vm3, %v713_v32, %v5369_v62  ;;  %v2450_v32 = vrot.slane %v4103_v22, 5  ;;  %v3960_v62 = vmov 0   ;;  %v2786_v22 = vld [vmem:[%s4583_s9] sm:$0xff] }
 0x174   : > { %5424 = vst [vmem:[#allocation56_spill] sm:$0xff] %v4547_v59  ;;  %3746 = vmatmul.msk.bf16.gmra.mxu1 %vm719_vm1, %v3915_v47  ;;  %3931 = vset.pattern.permute.xlu0 %v3960_v62 }
 0x175   : > { %3932 = vset.pattern.permute.xlu1 %v3960_v62  ;;  %2834 = vperm.xlu0 %3931, %v2786_v22  }
 0x176   : > { %3933 = vset.pattern.permute.xlu2 %v3960_v62 }
 0x177   : > { %v1338_v31 = vpop.f32.mrf.mxu2  ;;  %3794 = vmatmul.msk.bf16.gmra.mxu3 %vm719_vm1, %v4553_v29 }
 0x178   : > { %v1413_v3 = vadd.f32 %v1338_v31, %v1043_v8  ;;  %v872_v47 = vpop.f32.mrf.mxu0  ;;  %v2447_v8 = vrot.slane %v4084_v10, 5  ;;  %v2448_v31 = vrot.slane %v4082_v9, 6 }
 0x179   : > { %v1046_v6 = vadd.f32 %v1045_v17, %v872_v47  ;;  %v1047_v7 = vpop.f32.mrf.mxu1  ;;  %v2451_v17 = vrot.slane %v4100_v21, 6  ;;  %v3934_v47 = vld [vmem:[%s4046_s20 + $0x28] sm:$0xff] }
 0x17a   : > { %v1633_v48 = vpop.f32.mrf.mxu3  ;;  %v4569_v43 = vadd.f32 %v1630_v18, %v1413_v3  ;;  %v1955_v1 = vrot.slane %v3934_v47, 1 }
 0x17b   : > { %3723 = vmatmul.msk.bf16.gmra.mxu0 %vm719_vm1, %v4565_v56  ;;  %v2452_v9 = vor.u32 %v2451_v17, %v2450_v32 }
 0x17c   : > { %5425 = vst [vmem:[#allocation57_spill] sm:$0xff] %v4569_v43  ;;  %3770 = vmatmul.msk.bf16.gmra.mxu2 %vm719_vm1, %v1189_v53  ;;  %v2449_v53 = vor.u32 %v2448_v31, %v2447_v8  ;;  %v1957_v20 = vsel %vm1954_vm5, %v1955_v1, %v1956_v60 }
 0x17f   : > { %v1341_v18 = vpop.f32.mrf.mxu2 }
 0x180   : > { %v1414_v3 = vadd.f32 %v1341_v18, %v1046_v6  ;;  %v874_v10 = vpop.f32.mrf.mxu0  ;;  %v2453_v6 = vsel %vm2446_vm6, %v2449_v53, %v2452_v9 }
 0x181   : > { %v1048_v21 = vadd.f32 %v1047_v7, %v874_v10  ;;  %v1050_v47 = vpop.f32.mrf.mxu1  ;;  %v2787_v7 = vld [vmem:[%s4583_s9 + $0x8] sm:$0xff]  ;;  %v3935_v10 = vld [vmem:[%s4046_s20 + $0x38] sm:$0xff] }
 0x182   : > { %v1635_v43 = vpop.f32.mrf.mxu3  ;;  %v4587_v59 = vadd.f32 %v1633_v48, %v1414_v3  ;;  %2839 = vperm.xlu0 %3931, %v2787_v7   ;;  %v2454_v48 = vrot.slane %v4126_v34, 5  ;;  %v2455_v3 = vrot.slane %v4124_v33, 6  ;;  %v1958_v53 = vrot.slane %v3935_v10, 1  ;;  %v3936_v10 = vld [vmem:[%s4046_s20 + $0x40] sm:$0xff] }
 0x184   : > { %3820 = vmatmul.msk.bf16.vlgmr.msrb.gmra.mxu1 %vm719_vm1, %v1957_v20  ;;  %v2456_v20 = vor.u32 %v2455_v3, %v2454_v48 }
 0x187   : > { %v1343_v8 = vpop.f32.mrf.mxu2  ;;  %3868 = vmatmul.msk.bf16.vlgmr.msrb.gmra.mxu3 %vm719_vm1, %v2453_v6  ;;  %v2788_v6 = vld [vmem:[%s4583_s9 + $0x10] sm:$0xff] }
 0x188   : > { %v1415_v31 = vadd.f32 %v1343_v8, %v1048_v21  ;;  %v877_v32 = vpop.f32.mrf.mxu0  ;;  %2844 = vperm.xlu1 %3932, %v2788_v6  }
 0x189   : > { %v1051_v17 = vadd.f32 %v1050_v47, %v877_v32  ;;  %v1052_v1 = vpop.f32.mrf.mxu1 }
 0x18a   : > { %v1638_v18 = vpop.f32.mrf.mxu3  ;;  %v4593_v62 = vadd.f32 %v1635_v43, %v1415_v31  ;;  %v1959_v31 = vsel %vm1954_vm5, %v1956_v60, %v1958_v53 }
 0x18b   : > { %3796 = vmatmul.msk.bf16.vlgmr.msrb.gmra.mxu0 %vm719_vm1, %v4117_v30 }
 0x18c   : > { %3844 = vmatmul.msk.bf16.vlgmr.msrb.gmra.mxu2 %vm719_vm1, %v4110_v26  ;;  %v2457_v26 = vsel %vm2446_vm6, %v2452_v9, %v2456_v20  ;;  %v2458_v9 = vrot.slane %v4149_v46, 5 }
 0x18f   : > { %v1346_v22 = vpop.f32.mrf.mxu2 }
 0x190   : > { %v1416_v21 = vadd.f32 %v1346_v22, %v1051_v17  ;;  %v879_v47 = vpop.f32.mrf.mxu0  ;;  %v2789_v17 = vld [vmem:[%s4583_s9 + $0x18] sm:$0xff]  ;;  %v1960_v22 = vrot.slane %v3936_v10, 1 }
 0x191   : > { %v1053_v43 = vadd.f32 %v1052_v1, %v879_v47  ;;  %v1055_v8 = vpop.f32.mrf.mxu1  ;;  %2849 = vperm.xlu1 %3932, %v2789_v17  }
 0x192   : > { %v1640_v30 = vpop.f32.mrf.mxu3  ;;  %v4604_v32 = vadd.f32 %v1638_v18, %v1416_v21  ;;  %v2459_v18 = vrot.slane %v4147_v45, 6 }
 0x194   : > { %3821 = vmatmul.msk.bf16.gmra.mxu1 %vm719_vm1, %v1959_v31 }
 0x197   : > { %v1348_v33 = vpop.f32.mrf.mxu2  ;;  %3869 = vmatmul.msk.bf16.gmra.mxu3 %vm719_vm1, %v2457_v26 }
 0x198   : > { %v1417_v34 = vadd.f32 %v1348_v33, %v1053_v43  ;;  %v882_v7 = vpop.f32.mrf.mxu0  ;;  %v2460_v43 = vor.u32 %v2459_v18, %v2458_v9 }
 0x199   : > { %v1056_v48 = vadd.f32 %v1055_v8, %v882_v7  ;;  %v1057_v1 = vpop.f32.mrf.mxu1 }
 0x19a   : > { %v1643_v3 = vpop.f32.mrf.mxu3  ;;  %v4610_v60 = vadd.f32 %v1640_v30, %v1417_v34  ;;  %v1961_v30 = vsel %vm1954_vm5, %v1958_v53, %v1960_v22  ;;  %v2462_v53 = vrot.slane %v4171_v58, 5 }
 0x19b   : > { %3797 = vmatmul.msk.bf16.gmra.mxu0 %vm719_vm1, %v4140_v42 }
 0x19c   : > { %3845 = vmatmul.msk.bf16.gmra.mxu2 %vm719_vm1, %v4133_v38  ;;  %v2461_v38 = vsel %vm2446_vm6, %v2456_v20, %v2460_v43  ;;  %v2463_v20 = vrot.slane %v4169_v57, 6 }
 0x19f   : > { %v1351_v21 = vpop.f32.mrf.mxu2 }
 0x1a0   : > { %v1418_v47 = vadd.f32 %v1351_v21, %v1056_v48  ;;  %v884_v6 = vpop.f32.mrf.mxu0  ;;  %v2464_v21 = vor.u32 %v2463_v20, %v2462_v53 }
 0x1a1   : > { %v1058_v8 = vadd.f32 %v1057_v1, %v884_v6  ;;  %v1060_v31 = vpop.f32.mrf.mxu1  ;;  %v3937_v1 = vld [vmem:[%s4046_s20 + $0x48] sm:$0xff] }
 0x1a2   : > { %v1645_v26 = vpop.f32.mrf.mxu3  ;;  %v4620_v42 = vadd.f32 %v1643_v3, %v1418_v47  ;;  %v1962_v3 = vrot.slane %v3937_v1, 1  ;;  %v2792_v47 = vld [vmem:[%s4583_s9 + $0x30] sm:$0xff]  ;;  %v2465_v57 = vsel %vm2446_vm6, %v2460_v43, %v2464_v21  ;;  %v2466_v43 = vrot.slane %v4193_v13, 5 }
 0x1a3   : > { %2864 = vperm.xlu0 %3931, %v2792_v47  }
 0x1a4   : > { %3822 = vmatmul.msk.bf16.gmra.mxu1 %vm719_vm1, %v1961_v30 }
 0x1a7   : > { %v1353_v46 = vpop.f32.mrf.mxu2  ;;  %3870 = vmatmul.msk.bf16.gmra.mxu3 %vm719_vm1, %v2461_v38  ;;  %v2790_v38 = vld [vmem:[%s4583_s9 + $0x20] sm:$0xff] }
 0x1a8   : > { %v1419_v45 = vadd.f32 %v1353_v46, %v1058_v8  ;;  %v887_v33 = vpop.f32.mrf.mxu0  ;;  %v2793_v46 = vld [vmem:[%s4583_s9 + $0x38] sm:$0xff]  ;;  %2854 = vperm.xlu2 %3933, %v2790_v38   ;;  %v2471_v38 = vrot.slane %v4217_v49, 6 }
 0x1a9   : > { %v1061_v34 = vadd.f32 %v1060_v31, %v887_v33  ;;  %v1062_v7 = vpop.f32.mrf.mxu1  ;;  %2869 = vperm.xlu1 %3932, %v2793_v46   ;;  %v3939_v46 = vld [vmem:[%s4046_s20 + $0x58] sm:$0xff] }
 0x1aa   : > { %v1648_v17 = vpop.f32.mrf.mxu3  ;;  %v4625_v48 = vadd.f32 %v1645_v26, %v1419_v45 }
 0x1ab   : > { %3798 = vmatmul.msk.bf16.gmra.mxu0 %vm719_vm1, %v4162_v54  ;;  %v1963_v54 = vsel %vm1954_vm5, %v1960_v22, %v1962_v3 }
 0x1ac   : > { %3846 = vmatmul.msk.bf16.gmra.mxu2 %vm719_vm1, %v4155_v50 }
 0x1af   : > { %v1356_v9 = vpop.f32.mrf.mxu2 }
 0x1b0   : > { %v1420_v18 = vadd.f32 %v1356_v9, %v1061_v34  ;;  %v889_v10 = vpop.f32.mrf.mxu0 }
 0x1b1   : > { %v1063_v6 = vadd.f32 %v1062_v7, %v889_v10  ;;  %v1065_v8 = vpop.f32.mrf.mxu1  ;;  %v2467_v7 = vrot.slane %v4191_v12, 6  ;;  %v2791_v10 = vld [vmem:[%s4583_s9 + $0x28] sm:$0xff] }
 0x1b2   : > { %v1650_v31 = vpop.f32.mrf.mxu3  ;;  %v4636_v50 = vadd.f32 %v1648_v17, %v1420_v18  ;;  %v3938_v17 = vld [vmem:[%s4046_s20 + $0x50] sm:$0xff]  ;;  %2859 = vperm.xlu2 %3933, %v2791_v10  }
 0x1b3   : > { %v1964_v53 = vrot.slane %v3938_v17, 1  ;;  %v2468_v18 = vor.u32 %v2467_v7, %v2466_v43  ;;  %v2796_v17 = vld [vmem:[%s4583_s9 + $0x50] sm:$0xff] }
 0x1b4   : > { %3823 = vmatmul.msk.bf16.gmra.mxu1 %vm719_vm1, %v1963_v54  ;;  %2884 = vperm.xlu1 %3932, %v2796_v17   ;;  %v2799_v17 = vld [vmem:[%s4583_s9 + $0x68] sm:$0xff] }
 0x1b7   : > { %v1358_v58 = vpop.f32.mrf.mxu2  ;;  %3871 = vmatmul.msk.bf16.gmra.mxu3 %vm719_vm1, %v2465_v57  ;;  %v2795_v57 = vld [vmem:[%s4583_s9 + $0x48] sm:$0xff] }
 0x1b8   : > { %v1421_v30 = vadd.f32 %v1358_v58, %v1063_v6  ;;  %v892_v26 = vpop.f32.mrf.mxu0  ;;  %2879 = vperm.xlu0 %3931, %v2795_v57  }
 0x1b9   : > { %v1066_v45 = vadd.f32 %v1065_v8, %v892_v26  ;;  %v1067_v33 = vpop.f32.mrf.mxu1  ;;  %v1965_v8 = vsel %vm1954_vm5, %v1962_v3, %v1964_v53 }
 0x1ba   : > { %v1653_v22 = vpop.f32.mrf.mxu3  ;;  %v4643_v34 = vadd.f32 %v1650_v31, %v1421_v30 }
 0x1bb   : > { %3799 = vmatmul.msk.bf16.gmra.mxu0 %vm719_vm1, %v4184_v4 }
 0x1bc   : > { %3847 = vmatmul.msk.bf16.gmra.mxu2 %vm719_vm1, %v4177_v63  ;;  %v2469_v63 = vsel %vm2446_vm6, %v2464_v21, %v2468_v18  ;;  %v2470_v21 = vrot.slane %v4219_v51, 5  ;;  %2899 = vperm.xlu1 %3932, %v2799_v17   ;;  %v2802_v17 = vld [vmem:[%s4583_s9 + $0x80] sm:$0xff] }
 0x1be   : > { %v2472_v7 = vor.u32 %v2471_v38, %v2470_v21  ;;  %v2798_v21 = vld [vmem:[%s4583_s9 + $0x60] sm:$0xff] }
 0x1bf   : > { %v1361_v20 = vpop.f32.mrf.mxu2 }
 0x1c0   : > { %v1422_v1 = vadd.f32 %v1361_v20, %v1066_v45  ;;  %v894_v9 = vpop.f32.mrf.mxu0  ;;  %v1966_v45 = vrot.slane %v3939_v46, 1  ;;  %2894 = vperm.xlu0 %3931, %v2798_v21  }
 0x1c1   : > { %v1068_v47 = vadd.f32 %v1067_v33, %v894_v9  ;;  %v1070_v6 = vpop.f32.mrf.mxu1 }
 0x1c2   : > { %v1655_v4 = vpop.f32.mrf.mxu3  ;;  %v4654_v54 = vadd.f32 %v1653_v22, %v1422_v1  ;;  %v1967_v9 = vsel %vm1954_vm5, %v1964_v53, %v1966_v45 }
 0x1c4   : > { %3824 = vmatmul.msk.bf16.gmra.mxu1 %vm719_vm1, %v1965_v8  ;;  %2914 = vperm.xlu1 %3932, %v2802_v17  }
 0x1c7   : > { %v1363_v12 = vpop.f32.mrf.mxu2  ;;  %3872 = vmatmul.msk.bf16.gmra.mxu3 %vm719_vm1, %v2469_v63 }
 0x1c8   : > { %v1423_v13 = vadd.f32 %v1363_v12, %v1068_v47  ;;  %v897_v31 = vpop.f32.mrf.mxu0  ;;  %v2475_v12 = vrot.slane %v4243_v24, 6 }
 0x1c9   : > { %v1071_v58 = vadd.f32 %v1070_v6, %v897_v31  ;;  %v1072_v30 = vpop.f32.mrf.mxu1  ;;  %v2794_v6 = vld [vmem:[%s4583_s9 + $0x40] sm:$0xff] }
 0x1ca   : > { %v1658_v3 = vpop.f32.mrf.mxu3  ;;  %v4660_v26 = vadd.f32 %v1655_v4, %v1423_v13  ;;  %2874 = vperm.xlu2 %3933, %v2794_v6   ;;  %v3940_v13 = vld [vmem:[%s4046_s20 + $0x60] sm:$0xff] }
 0x1cb   : > { %3800 = vmatmul.msk.bf16.gmra.mxu0 %vm719_vm1, %v4208_v39  ;;  %v1968_v31 = vrot.slane %v3940_v13, 1 }
 0x1cc   : > { %3848 = vmatmul.msk.bf16.gmra.mxu2 %vm719_vm1, %v4201_v28  ;;  %v2473_v28 = vsel %vm2446_vm6, %v2468_v18, %v2472_v7  ;;  %v2474_v18 = vrot.slane %v4245_v25, 5 }
 0x1cf   : > { %v1366_v33 = vpop.f32.mrf.mxu2 }
 0x1d0   : > { %v1424_v22 = vadd.f32 %v1366_v33, %v1071_v58  ;;  %v899_v43 = vpop.f32.mrf.mxu0  ;;  %v1969_v33 = vsel %vm1954_vm5, %v1966_v45, %v1968_v31 }
 0x1d1   : > { %v1073_v20 = vadd.f32 %v1072_v30, %v899_v43  ;;  %v1075_v1 = vpop.f32.mrf.mxu1 }
 0x1d2   : > { %v1660_v39 = vpop.f32.mrf.mxu3  ;;  %v4671_v10 = vadd.f32 %v1658_v3, %v1424_v22  ;;  %v2476_v3 = vor.u32 %v2475_v12, %v2474_v18 }
 0x1d4   : > { %3825 = vmatmul.msk.bf16.gmra.mxu1 %vm719_vm1, %v1967_v9 }
 0x1d7   : > { %v1368_v49 = vpop.f32.mrf.mxu2  ;;  %3873 = vmatmul.msk.bf16.gmra.mxu3 %vm719_vm1, %v2473_v28  ;;  %v3941_v28 = vld [vmem:[%s4046_s20 + $0x68] sm:$0xff] }
 0x1d8   : > { %v1425_v51 = vadd.f32 %v1368_v49, %v1073_v20  ;;  %v902_v47 = vpop.f32.mrf.mxu0  ;;  %v1970_v49 = vrot.slane %v3941_v28, 1  ;;  %v2800_v28 = vld [vmem:[%s4583_s9 + $0x70] sm:$0xff] }
 0x1d9   : > { %v1076_v8 = vadd.f32 %v1075_v1, %v902_v47  ;;  %v1077_v4 = vpop.f32.mrf.mxu1 }
 0x1da   : > { %v1663_v53 = vpop.f32.mrf.mxu3  ;;  %v4677_v63 = vadd.f32 %v1660_v39, %v1425_v51  ;;  %v2479_v39 = vrot.slane %v4269_v5, 6  ;;  %v1971_v12 = vsel %vm1954_vm5, %v1968_v31, %v1970_v49 }
 0x1db   : > { %3801 = vmatmul.msk.bf16.gmra.mxu0 %vm719_vm1, %v4234_v15 }
 0x1dc   : > { %3849 = vmatmul.msk.bf16.gmra.mxu2 %vm719_vm1, %v4227_v2  ;;  %v2477_v2 = vsel %vm2446_vm6, %v2472_v7, %v2476_v3  ;;  %v2478_v7 = vrot.slane %v4271_v16, 5 }
 0x1df   : > { %v1371_v57 = vpop.f32.mrf.mxu2 }
 0x1e0   : > { %v1426_v58 = vadd.f32 %v1371_v57, %v1076_v8  ;;  %v904_v30 = vpop.f32.mrf.mxu0  ;;  %v2480_v8 = vor.u32 %v2479_v39, %v2478_v7 }
 0x1e1   : > { %v1078_v38 = vadd.f32 %v1077_v4, %v904_v30  ;;  %v1080_v46 = vpop.f32.mrf.mxu1  ;;  %v2797_v4 = vld [vmem:[%s4583_s9 + $0x58] sm:$0xff] }
 0x1e2   : > { %v1665_v15 = vpop.f32.mrf.mxu3  ;;  %v4688_v22 = vadd.f32 %v1663_v53, %v1426_v58  ;;  %2889 = vperm.xlu2 %3933, %v2797_v4   ;;  %v2801_v58 = vld [vmem:[%s4583_s9 + $0x78] sm:$0xff]  ;;  %v5426_v4 = vld [vmem:[#allocation11_spill] sm:$0xff] }
 0x1e3   : > { %2909 = vperm.xlu0 %3931, %v2801_v58  }
 0x1e4   : > { %3826 = vmatmul.msk.bf16.gmra.mxu1 %vm719_vm1, %v1969_v33  ;;  %v3942_v33 = vld [vmem:[%s4046_s20 + $0x70] sm:$0xff] }
 0x1e7   : > { %v1373_v24 = vpop.f32.mrf.mxu2  ;;  %3874 = vmatmul.msk.bf16.gmra.mxu3 %vm719_vm1, %v2477_v2 }
 0x1e8   : > { %v1427_v25 = vadd.f32 %v1373_v24, %v1078_v38  ;;  %v907_v43 = vpop.f32.mrf.mxu0 }
 0x1e9   : > { %v1081_v20 = vadd.f32 %v1080_v46, %v907_v43  ;;  %v1082_v1 = vpop.f32.mrf.mxu1  ;;  %v2483_v46 = vrot.slane %v4295_v55, 6 }
 0x1ea   : > { %v1668_v45 = vpop.f32.mrf.mxu3  ;;  %v4694_v9 = vadd.f32 %v1665_v15, %v1427_v25  ;;  %v1972_v15 = vrot.slane %v3942_v33, 1  ;;  %2904 = vperm.xlu2 %3933, %v2800_v28  }
 0x1eb   : > { %3802 = vmatmul.msk.bf16.gmra.mxu0 %vm719_vm1, %v4260_v0 }
 0x1ec   : > { %3850 = vmatmul.msk.bf16.gmra.mxu2 %vm719_vm1, %v4253_v52  ;;  %v2481_v52 = vsel %vm2446_vm6, %v2476_v3, %v2480_v8  ;;  %v2482_v3 = vrot.slane %v4297_v19, 5 }
 0x1ee   : > { %v2484_v43 = vor.u32 %v2483_v46, %v2482_v3 }
 0x1ef   : > { %v1376_v51 = vpop.f32.mrf.mxu2 }
 0x1f0   : > { %v1428_v47 = vadd.f32 %v1376_v51, %v1081_v20  ;;  %v909_v6 = vpop.f32.mrf.mxu0 }
 0x1f1   : > { %v1083_v53 = vadd.f32 %v1082_v1, %v909_v6  ;;  %v1085_v18 = vpop.f32.mrf.mxu1 }
 0x1f2   : > { %v1670_v0 = vpop.f32.mrf.mxu3  ;;  %v4705_v13 = vadd.f32 %v1668_v45, %v1428_v47  ;;  %v1973_v45 = vsel %vm1954_vm5, %v1970_v49, %v1972_v15 }
 0x1f4   : > { %3827 = vmatmul.msk.bf16.gmra.mxu1 %vm719_vm1, %v1971_v12  ;;  %v5429_v12 = vld [vmem:[#allocation13_spill] sm:$0xff] }
 0x1f7   : > { %v1378_v5 = vpop.f32.mrf.mxu2  ;;  %3875 = vmatmul.msk.bf16.gmra.mxu3 %vm719_vm1, %v2481_v52  ;;  %v4738_v52 = vld [vmem:[%s4046_s20 + $0x78] sm:$0xff] }
 0x1f8   : > { %v1429_v16 = vadd.f32 %v1378_v5, %v1083_v53  ;;  %v912_v57 = vpop.f32.mrf.mxu0  ;;  %v5427_v53 = vld [vmem:[#allocation10_spill] sm:$0xff]  ;;  %v1974_v5 = vrot.slane %v4738_v52, 1  ;;  %v5435_v52 = vld [vmem:[#allocation19_spill] sm:$0xff] }
 0x1f9   : > { %v1086_v30 = vadd.f32 %v1085_v18, %v912_v57  ;;  %v1087_v21 = vpop.f32.mrf.mxu1  ;;  %v2835_v57 = vpop.permute.xlu0 %2834 }
 0x1fa   : > { %v1673_v31 = vpop.f32.mrf.mxu3  ;;  %v4711_v38 = vadd.f32 %v1670_v0, %v1429_v16  ;;  %v2487_v0 = vrot.slane %v5429_v12, 6  ;;  %v1975_v46 = vsel %vm1954_vm5, %v1972_v15, %v1974_v5 }
 0x1fb   : > { %3803 = vmatmul.msk.bf16.gmra.mxu0 %vm719_vm1, %v4286_v44 }
 0x1fc   : > { %3851 = vmatmul.msk.bf16.gmra.mxu2 %vm719_vm1, %v4279_v41  ;;  %v2485_v41 = vsel %vm2446_vm6, %v2480_v8, %v2484_v43  ;;  %v5428_v8 = vld [vmem:[#allocation14_spill] sm:$0xff] }
 0x1fd   : > { %v2486_v18 = vrot.slane %v5428_v8, 5 }
 0x1ff   : > { %v1381_v2 = vpop.f32.mrf.mxu2 }
 0x200   : > { %v1430_v24 = vadd.f32 %v1381_v2, %v1086_v30  ;;  %v914_v25 = vpop.f32.mrf.mxu0  ;;  %v5430_v2 = vld [vmem:[#allocation2_spill] sm:$0xff] }
 0x201   : > { %v1088_v20 = vadd.f32 %v1087_v21, %v914_v25  ;;  %v2083_v1 = vpop.f32.mrf.mxu1  ;;  %v2488_v21 = vor.u32 %v2487_v0, %v2486_v18  ;;  %v5434_v0 = vld [vmem:[#allocation16_spill] sm:$0xff] }
 0x202   : > { %v1675_v44 = vpop.f32.mrf.mxu3  ;;  %v4722_v7 = vadd.f32 %v1673_v31, %v1430_v24  ;;  %v2804_v31 = vld [vmem:[%s4583_s9 + $0x90] sm:$0xff] }
 0x203   : > { %2924 = vperm.xlu0 %3931, %v2804_v31  }
 0x204   : > { %3828 = vmatmul.msk.bf16.gmra.mxu1 %vm719_vm1, %v1973_v45 }
 0x207   : > { %v1383_v55 = vpop.f32.mrf.mxu2  ;;  %3876 = vmatmul.msk.bf16.gmra.mxu3 %vm719_vm1, %v2485_v41 }
 0x208   : > { %v1431_v19 = vadd.f32 %v1383_v55, %v1088_v20  ;;  %v1791_v39 = vpop.f32.mrf.mxu0  ;;  %v2489_v20 = vsel %vm2446_vm6, %v2484_v43, %v2488_v21  ;;  %v2805_v55 = vld [vmem:[%s4583_s9 + $0x98] sm:$0xff] }
 0x209   : > { %v2085_v51 = vpop.f32.mrf.mxu1  ;;  %v1906_v49 = vadd.f32 %v1791_v39, %v4197_v27  ;;  %2929 = vperm.xlu1 %3932, %v2805_v55   ;;  %v5432_v43 = vld [vmem:[#allocation17_spill] sm:$0xff] }
 0x20a   : > { %v2625_v47 = vpop.f32.mrf.mxu3  ;;  %v4729_v6 = vadd.f32 %v1675_v44, %v1431_v19  ;;  %v2840_v19 = vpop.permute.xlu0 %2839 }
 0x20b   : > { %3804 = vmatmul.msk.bf16.gmra.mxu0 %vm719_vm1, %v5426_v4  ;;  %v2198_v16 = vadd.f32 %v2083_v1, %v1906_v49  ;;  %v5431_v49 = vld [vmem:[#allocation3_spill] sm:$0xff] }
 0x20c   : > { %3852 = vmatmul.msk.bf16.gmra.mxu2 %vm719_vm1, %v5427_v53 }
 0x20f   : > { %v2283_v27 = vpop.f32.mrf.mxu2 }
 0x210   : > { %v2398_v58 = vadd.f32 %v2283_v27, %v2198_v16  ;;  %v1793_v30 = vpop.f32.mrf.mxu0  ;;  %v2491_v16 = vrot.slane %v5435_v52, 6  ;;  %v4764_v27 = vld [vmem:[%s4046_s20 + $0x80] sm:$0xff] }
 0x211   : > { %v2088_v3 = vpop.f32.mrf.mxu1  ;;  %v1907_v24 = vadd.f32 %v1793_v30, %v5430_v2 }
 0x212   : > { %v2740_v33 = vadd.f32 %v2625_v47, %v2398_v58  ;;  %v2627_v25 = vpop.f32.mrf.mxu3 }
 0x213   : > { %v2199_v15 = vadd.f32 %v2085_v51, %v1907_v24  ;;  %v5433_v51 = vld [vmem:[#allocation20_spill] sm:$0xff]  ;;  %v2845_v24 = vpop.permute.xlu1 %2844 }
 0x214   : > { %v3352_v17 = vpack.c.bf16 %v2740_v33, %v2740_v33  ;;  %3829 = vmatmul.msk.bf16.gmra.mxu1 %vm719_vm1, %v1975_v46  ;;  %v3062_v45 = vmul.f32 %v2835_v57, %v2740_v33  ;;  %v2490_v53 = vrot.slane %v5433_v51, 5  ;;  %v1976_v57 = vrot.slane %v4764_v27, 1 }
 0x216   : > { %3399 = vst.msk [vmem:[%s4748_s13] sm:$0xf] %vm3398_vm7, %v3352_v17  ;;  %v3208_v8 = vmul.f32 %v3062_v45, %v2740_v33  ;;  %v3109_v58 = vsel %vm3108_vm8, %v3062_v45, 0.0  ;;  %v1977_v55 = vsel %vm1954_vm5, %v1974_v5, %v1976_v57 }
 0x217   : > { %v2285_v1 = vpop.f32.mrf.mxu2  ;;  %3877 = vmatmul.msk.bf16.gmra.mxu3 %vm719_vm1, %v2489_v20 }
 0x218   : > { %v2399_v44 = vadd.f32 %v2285_v1, %v2199_v15  ;;  %v1796_v41 = vpop.f32.mrf.mxu0  ;;  %v2492_v1 = vor.u32 %v2491_v16, %v2490_v53  ;;  %v2807_v16 = vld [vmem:[%s4583_s9 + $0xa8] sm:$0xff] }
 0x219   : > { %v2090_v39 = vpop.f32.mrf.mxu1  ;;  %v1908_v47 = vadd.f32 %v1796_v41, %v5431_v49  ;;  %2939 = vperm.xlu0 %3931, %v2807_v16  }
 0x21a   : > { %v2741_v28 = vadd.f32 %v2627_v25, %v2399_v44  ;;  %v2630_v4 = vpop.f32.mrf.mxu3  ;;  %v3254_v25 = vsel %vm3108_vm8, %v3208_v8, 0.0  ;;  %v2803_v44 = vld [vmem:[%s4583_s9 + $0x88] sm:$0xff]  ;;  %v2493_v51 = vsel %vm2446_vm6, %v2488_v21, %v2492_v1 }
 0x21b   : > { %3805 = vmatmul.msk.bf16.gmra.mxu0 %vm719_vm1, %v5432_v43  ;;  %v2200_v46 = vadd.f32 %v2088_v3, %v1908_v47  ;;  %2919 = vperm.xlu2 %3933, %v2803_v44   ;;  %v5441_v44 = vld [vmem:[#allocation25_spill] sm:$0xff] }
 0x21c   : > { %v3353_v18 = vpack.c.bf16 %v2741_v28, %v2741_v28  ;;  %v3063_v12 = vmul.f32 %v2840_v19, %v2741_v28  ;;  %3853 = vmatmul.msk.bf16.gmra.mxu2 %vm719_vm1, %v5434_v0  ;;  %v5436_v19 = vld [vmem:[#allocation4_spill] sm:$0xff] }
 0x21e   : > { %3400 = vst.msk [vmem:[%s4748_s13 + $0x4] sm:$0xf] %vm3398_vm7, %v3353_v18  ;;  %v3110_v30 = vsel %vm3108_vm8, %v3063_v12, 0.0  ;;  %v3209_v31 = vmul.f32 %v3063_v12, %v2741_v28 }
 0x21f   : > { %v3111_v33 = vadd.f32 %v3110_v30, %v3109_v58  ;;  %v2288_v2 = vpop.f32.mrf.mxu2  ;;  %v2850_v30 = vpop.permute.xlu1 %2849 }
 0x220   : > { %v3255_v17 = vsel %vm3108_vm8, %v3209_v31, 0.0  ;;  %v2400_v20 = vadd.f32 %v2288_v2, %v2200_v46  ;;  %v1798_v15 = vpop.f32.mrf.mxu0  ;;  %v5437_v46 = vld [vmem:[#allocation5_spill] sm:$0xff] }
 0x221   : > { %v3256_v41 = vadd.f32 %v3255_v17, %v3254_v25  ;;  %v2093_v45 = vpop.f32.mrf.mxu1  ;;  %v1909_v28 = vadd.f32 %v1798_v15, %v5436_v19  ;;  %v5439_v17 = vld [vmem:[#allocation22_spill] sm:$0xff] }
 0x222   : > { %v2742_v3 = vadd.f32 %v2630_v4, %v2400_v20  ;;  %v2632_v49 = vpop.f32.mrf.mxu3  ;;  %v5440_v20 = vld [vmem:[#allocation26_spill] sm:$0xff] }
 0x223   : > { %v2201_v18 = vadd.f32 %v2090_v39, %v1909_v28  ;;  %v5438_v39 = vld [vmem:[#allocation23_spill] sm:$0xff]  ;;  %v2494_v15 = vrot.slane %v5440_v20, 5 }
 0x224   : > { %v3354_v47 = vpack.c.bf16 %v2742_v3, %v2742_v3  ;;  %v3064_v43 = vmul.f32 %v2845_v24, %v2742_v3  ;;  %3830 = vmatmul.msk.bf16.gmra.mxu1 %vm719_vm1, %v1977_v55  ;;  %v4794_v55 = vld [vmem:[%s4046_s20 + $0x88] sm:$0xff] }
 0x226   : > { %3401 = vst.msk [vmem:[%s4748_s13 + $0x8] sm:$0xf] %vm3398_vm7, %v3354_v47  ;;  %v3112_v53 = vsel %vm3108_vm8, %v3064_v43, 0.0  ;;  %v3210_v8 = vmul.f32 %v3064_v43, %v2742_v3  ;;  %v1978_v3 = vrot.slane %v4794_v55, 1 }
 0x227   : > { %v3113_v12 = vadd.f32 %v3112_v53, %v3111_v33  ;;  %v2290_v5 = vpop.f32.mrf.mxu2  ;;  %3878 = vmatmul.msk.bf16.gmra.mxu3 %vm719_vm1, %v2493_v51  ;;  %v2855_v51 = vpop.permute.xlu2 %2854 }
 0x228   : > { %v3257_v4 = vsel %vm3108_vm8, %v3210_v8, 0.0  ;;  %v2401_v0 = vadd.f32 %v2290_v5, %v2201_v18  ;;  %v1801_v52 = vpop.f32.mrf.mxu0  ;;  %v1979_v16 = vsel %vm1954_vm5, %v1976_v57, %v1978_v3 }
 0x229   : > { %v3258_v58 = vadd.f32 %v3257_v4, %v3256_v41  ;;  %v2095_v21 = vpop.f32.mrf.mxu1  ;;  %v1910_v2 = vadd.f32 %v1801_v52, %v5437_v46  ;;  %v2495_v41 = vrot.slane %v5441_v44, 6  ;;  %v2808_v4 = vld [vmem:[%s4583_s9 + $0xb0] sm:$0xff]  ;;  %v2810_v44 = vld [vmem:[%s4583_s9 + $0xc0] sm:$0xff] }
 0x22a   : > { %v2743_v31 = vadd.f32 %v2632_v49, %v2401_v0  ;;  %v2635_v24 = vpop.f32.mrf.mxu3  ;;  %2944 = vperm.xlu1 %3932, %v2808_v4   ;;  %2954 = vperm.xlu0 %3931, %v2810_v44   ;;  %v5448_v44 = vld [vmem:[#allocation8_spill] sm:$0xff] }
 0x22b   : > { %3806 = vmatmul.msk.bf16.gmra.mxu0 %vm719_vm1, %v5438_v39  ;;  %v2202_v49 = vadd.f32 %v2093_v45, %v1910_v2  ;;  %v4801_v5 = vor.u32 %v2495_v41, %v2494_v15  ;;  %v2806_v15 = vld [vmem:[%s4583_s9 + $0xa0] sm:$0xff] }
 0x22c   : > { %v3355_v33 = vpack.c.bf16 %v2743_v31, %v2743_v31  ;;  %v3065_v25 = vmul.f32 %v2850_v30, %v2743_v31  ;;  %3854 = vmatmul.msk.bf16.gmra.mxu2 %vm719_vm1, %v5439_v17  ;;  %2934 = vperm.xlu2 %3933, %v2806_v15  }
 0x22e   : > { %3402 = vst.msk [vmem:[%s4748_s13 + $0xc] sm:$0xf] %vm3398_vm7, %v3355_v33  ;;  %v3114_v19 = vsel %vm3108_vm8, %v3065_v25, 0.0  ;;  %v3211_v28 = vmul.f32 %v3065_v25, %v2743_v31 }
 0x22f   : > { %v3115_v47 = vadd.f32 %v3114_v19, %v3113_v12  ;;  %v2293_v43 = vpop.f32.mrf.mxu2  ;;  %v5442_v12 = vld [vmem:[#allocation6_spill] sm:$0xff] }
 0x230   : > { %v3259_v53 = vsel %vm3108_vm8, %v3211_v28, 0.0  ;;  %v2402_v8 = vadd.f32 %v2293_v43, %v2202_v49  ;;  %v1803_v18 = vpop.f32.mrf.mxu0  ;;  %v5443_v49 = vld [vmem:[#allocation7_spill] sm:$0xff]  ;;  %v5444_v43 = vld [vmem:[#allocation29_spill] sm:$0xff] }
 0x231   : > { %v3260_v0 = vadd.f32 %v3259_v53, %v3258_v58  ;;  %v2098_v52 = vpop.f32.mrf.mxu1  ;;  %v1911_v30 = vadd.f32 %v1803_v18, %v5442_v12  ;;  %v2497_v58 = vsel %vm2446_vm6, %v2492_v1, %v4801_v5  ;;  %v2860_v1 = vpop.permute.xlu2 %2859  ;;  %v5446_v18 = vld [vmem:[#allocation32_spill] sm:$0xff] }
 0x232   : > { %v2744_v45 = vadd.f32 %v2635_v24, %v2402_v8  ;;  %v2637_v31 = vpop.f32.mrf.mxu3  ;;  %v5445_v8 = vld [vmem:[#allocation28_spill] sm:$0xff]  ;;  %v2498_v4 = vrot.slane %v5446_v18, 5 }
 0x233   : > { %v2203_v57 = vadd.f32 %v2095_v21, %v1911_v30 }
 0x234   : > { %v3356_v46 = vpack.c.bf16 %v2744_v45, %v2744_v45  ;;  %v3066_v2 = vmul.f32 %v2855_v51, %v2744_v45  ;;  %3831 = vmatmul.msk.bf16.gmra.mxu1 %vm719_vm1, %v1979_v16 }
 0x236   : > { %3403 = vst.msk [vmem:[%s4748_s13 + $0x10] sm:$0xf] %vm3398_vm7, %v3356_v46  ;;  %v3116_v27 = vsel %vm3108_vm8, %v3066_v2, 0.0  ;;  %v3212_v39 = vmul.f32 %v3066_v2, %v2744_v45  ;;  %v4828_v45 = vld [vmem:[%s4046_s20 + $0x90] sm:$0xff] }
 0x237   : > { %v3117_v33 = vadd.f32 %v3116_v27, %v3115_v47  ;;  %v2295_v24 = vpop.f32.mrf.mxu2  ;;  %3879 = vmatmul.msk.bf16.gmra.mxu3 %vm719_vm1, %v2497_v58  ;;  %v1980_v12 = vrot.slane %v4828_v45, 1 }
 0x238   : > { %v3261_v25 = vsel %vm3108_vm8, %v3212_v39, 0.0  ;;  %v2403_v17 = vadd.f32 %v2295_v24, %v2203_v57  ;;  %v1806_v20 = vpop.f32.mrf.mxu0 }
 0x239   : > { %v3262_v41 = vadd.f32 %v3261_v25, %v3260_v0  ;;  %v2100_v19 = vpop.f32.mrf.mxu1  ;;  %v1912_v21 = vadd.f32 %v1806_v20, %v5443_v49  ;;  %v5447_v0 = vld [vmem:[#allocation31_spill] sm:$0xff]  ;;  %v2813_v25 = vld [vmem:[%s4583_s9 + $0xd8] sm:$0xff]  ;;  %v2865_v20 = vpop.permute.xlu0 %2864 }
 0x23a   : > { %v2745_v28 = vadd.f32 %v2637_v31, %v2403_v17  ;;  %v2640_v47 = vpop.f32.mrf.mxu3  ;;  %v2499_v16 = vrot.slane %v5447_v0, 6  ;;  %2969 = vperm.xlu0 %3931, %v2813_v25   ;;  %v2816_v0 = vld [vmem:[%s4583_s9 + $0xf0] sm:$0xff]  ;;  %v2502_v25 = vrot.slane %v4427_v61, 5 }
 0x23b   : > { %3807 = vmatmul.msk.bf16.gmra.mxu0 %vm719_vm1, %v5444_v43  ;;  %v2204_v46 = vadd.f32 %v2098_v52, %v1912_v21  ;;  %v1981_v52 = vsel %vm1954_vm5, %v1978_v3, %v1980_v12  ;;  %v2811_v43 = vld [vmem:[%s4583_s9 + $0xc8] sm:$0xff] }
 0x23c   : > { %v3357_v51 = vpack.c.bf16 %v2745_v28, %v2745_v28  ;;  %v3067_v53 = vmul.f32 %v2860_v1, %v2745_v28  ;;  %3855 = vmatmul.msk.bf16.gmra.mxu2 %vm719_vm1, %v5445_v8  ;;  %v4835_v24 = vor.u32 %v2499_v16, %v2498_v4  ;;  %2959 = vperm.xlu1 %3932, %v2811_v43   ;;  %v2870_v16 = vpop.permute.xlu1 %2869 }
 0x23e   : > { %3404 = vst.msk [vmem:[%s4748_s13 + $0x14] sm:$0xf] %vm3398_vm7, %v3357_v51  ;;  %v3118_v30 = vsel %vm3108_vm8, %v3067_v53, 0.0  ;;  %v3213_v31 = vmul.f32 %v3067_v53, %v2745_v28 }
 0x23f   : > { %v3119_v2 = vadd.f32 %v3118_v30, %v3117_v33  ;;  %v2298_v58 = vpop.f32.mrf.mxu2 }
 0x240   : > { %v3263_v27 = vsel %vm3108_vm8, %v3213_v31, 0.0  ;;  %v2404_v39 = vadd.f32 %v2298_v58, %v2204_v46  ;;  %v1808_v57 = vpop.f32.mrf.mxu0  ;;  %v5449_v46 = vld [vmem:[#allocation9_spill] sm:$0xff] }
 0x241   : > { %v3264_v17 = vadd.f32 %v3263_v27, %v3262_v41  ;;  %v2103_v15 = vpop.f32.mrf.mxu1  ;;  %v1913_v1 = vadd.f32 %v1808_v57, %v5448_v44  ;;  %v2501_v41 = vsel %vm2446_vm6, %v4801_v5, %v4835_v24  ;;  %v5451_v57 = vld [vmem:[#allocation34_spill] sm:$0xff] }
 0x242   : > { %v2746_v33 = vadd.f32 %v2640_v47, %v2404_v39  ;;  %v2642_v28 = vpop.f32.mrf.mxu3  ;;  %2984 = vperm.xlu0 %3931, %v2816_v0   ;;  %v5453_v0 = vld [vmem:[#allocation12_spill] sm:$0xff] }
 0x243   : > { %v2205_v47 = vadd.f32 %v2100_v19, %v1913_v1 }
 0x244   : > { %v3358_v49 = vpack.c.bf16 %v2746_v33, %v2746_v33  ;;  %v3068_v21 = vmul.f32 %v2865_v20, %v2746_v33  ;;  %3832 = vmatmul.msk.bf16.gmra.mxu1 %vm719_vm1, %v1981_v52  ;;  %v5452_v20 = vld [vmem:[#allocation37_spill] sm:$0xff]  ;;  %v2814_v52 = vld [vmem:[%s4583_s9 + $0xe0] sm:$0xff] }
 0x245   : > { %2974 = vperm.xlu1 %3932, %v2814_v52   ;;  %v2880_v52 = vpop.permute.xlu0 %2879 }
 0x246   : > { %3405 = vst.msk [vmem:[%s4748_s13 + $0x18] sm:$0xf] %vm3398_vm7, %v3358_v49  ;;  %v3120_v55 = vsel %vm3108_vm8, %v3068_v21, 0.0  ;;  %v3214_v3 = vmul.f32 %v3068_v21, %v2746_v33  ;;  %v4864_v33 = vld [vmem:[%s4046_s20 + $0x98] sm:$0xff] }
 0x247   : > { %v3121_v51 = vadd.f32 %v3120_v55, %v3119_v2  ;;  %v2300_v53 = vpop.f32.mrf.mxu2  ;;  %3880 = vmatmul.msk.bf16.gmra.mxu3 %vm719_vm1, %v2501_v41  ;;  %v5450_v2 = vld [vmem:[#allocation35_spill] sm:$0xff]  ;;  %v1982_v44 = vrot.slane %v4864_v33, 1 }
 0x248   : > { %v3265_v8 = vsel %vm3108_vm8, %v3214_v3, 0.0  ;;  %v2405_v18 = vadd.f32 %v2300_v53, %v2205_v47  ;;  %v1811_v4 = vpop.f32.mrf.mxu0  ;;  %v2809_v47 = vld [vmem:[%s4583_s9 + $0xb8] sm:$0xff]  ;;  %v2819_v53 = vld [vmem:[%s4583_s9 + $0x108] sm:$0xff] }
 0x249   : > { %v3266_v5 = vadd.f32 %v3265_v8, %v3264_v17  ;;  %v2105_v30 = vpop.f32.mrf.mxu1  ;;  %v1914_v58 = vadd.f32 %v1811_v4, %v5449_v46  ;;  %v2503_v17 = vrot.slane %v5452_v20, 6  ;;  %2949 = vperm.xlu2 %3933, %v2809_v47   ;;  %v2506_v47 = vrot.slane %v4453_v11, 5 }
 0x24a   : > { %v2747_v31 = vadd.f32 %v2642_v28, %v2405_v18  ;;  %v2645_v19 = vpop.f32.mrf.mxu3  ;;  %v2875_v18 = vpop.permute.xlu2 %2874  ;;  %2999 = vperm.xlu0 %3931, %v2819_v53   ;;  %v5457_v53 = vld [vmem:[#allocation42_spill] sm:$0xff] }
 0x24b   : > { %3808 = vmatmul.msk.bf16.gmra.mxu0 %vm719_vm1, %v5450_v2  ;;  %v2206_v49 = vadd.f32 %v2103_v15, %v1914_v58  ;;  %v4871_v3 = vor.u32 %v2503_v17, %v2502_v25  ;;  %v1983_v15 = vsel %vm1954_vm5, %v1980_v12, %v1982_v44  ;;  %v2817_v2 = vld [vmem:[%s4583_s9 + $0xf8] sm:$0xff]  ;;  %v2822_v17 = vld [vmem:[%s4583_s9 + $0x120] sm:$0xff] }
 0x24c   : > { %v3359_v27 = vpack.c.bf16 %v2747_v31, %v2747_v31  ;;  %v3069_v39 = vmul.f32 %v2870_v16, %v2747_v31  ;;  %3856 = vmatmul.msk.bf16.gmra.mxu2 %vm719_vm1, %v5451_v57 }
 0x24d   : > { %2989 = vperm.xlu1 %3932, %v2817_v2  }
 0x24e   : > { %3406 = vst.msk [vmem:[%s4748_s13 + $0x1c] sm:$0xf] %vm3398_vm7, %v3359_v27  ;;  %v3122_v1 = vsel %vm3108_vm8, %v3069_v39, 0.0  ;;  %v3215_v28 = vmul.f32 %v3069_v39, %v2747_v31 }
 0x24f   : > { %v3123_v21 = vadd.f32 %v3122_v1, %v3121_v51  ;;  %v2303_v41 = vpop.f32.mrf.mxu2 }
 0x250   : > { %v3267_v61 = vsel %vm3108_vm8, %v3215_v28, 0.0  ;;  %v2406_v43 = vadd.f32 %v2303_v41, %v2206_v49  ;;  %v1813_v55 = vpop.f32.mrf.mxu0  ;;  %v5454_v49 = vld [vmem:[#allocation15_spill] sm:$0xff] }
 0x251   : > { %v3268_v8 = vadd.f32 %v3267_v61, %v3266_v5  ;;  %v2108_v4 = vpop.f32.mrf.mxu1  ;;  %v1915_v16 = vadd.f32 %v1813_v55, %v5453_v0  ;;  %v2505_v5 = vsel %vm2446_vm6, %v4835_v24, %v4871_v3  ;;  %v5456_v55 = vld [vmem:[#allocation39_spill] sm:$0xff] }
 0x252   : > { %v2748_v51 = vadd.f32 %v2645_v19, %v2406_v43  ;;  %v2647_v31 = vpop.f32.mrf.mxu3  ;;  %3014 = vperm.xlu0 %3931, %v2822_v17  }
 0x253   : > { %v2207_v19 = vadd.f32 %v2105_v30, %v1915_v16 }
 0x254   : > { %v3360_v46 = vpack.c.bf16 %v2748_v51, %v2748_v51  ;;  %v3070_v58 = vmul.f32 %v2875_v18, %v2748_v51  ;;  %3833 = vmatmul.msk.bf16.gmra.mxu1 %vm719_vm1, %v1983_v15  ;;  %v2820_v18 = vld [vmem:[%s4583_s9 + $0x110] sm:$0xff]  ;;  %v4901_v15 = vld [vmem:[%s4046_s20 + $0xa0] sm:$0xff] }
 0x255   : > { %3004 = vperm.xlu1 %3932, %v2820_v18   ;;  %v2890_v18 = vpop.permute.xlu2 %2889 }
 0x256   : > { %3407 = vst.msk [vmem:[%s4748_s13 + $0x20] sm:$0xf] %vm3398_vm7, %v3360_v46  ;;  %v3124_v45 = vsel %vm3108_vm8, %v3070_v58, 0.0  ;;  %v3216_v12 = vmul.f32 %v3070_v58, %v2748_v51  ;;  %v1984_v51 = vrot.slane %v4901_v15, 1  ;;  %v2812_v46 = vld [vmem:[%s4583_s9 + $0xd0] sm:$0xff] }
 0x257   : > { %v3125_v27 = vadd.f32 %v3124_v45, %v3123_v21  ;;  %v2305_v39 = vpop.f32.mrf.mxu2  ;;  %3881 = vmatmul.msk.bf16.gmra.mxu3 %vm719_vm1, %v2505_v5  ;;  %v5455_v21 = vld [vmem:[#allocation40_spill] sm:$0xff]  ;;  %2964 = vperm.xlu2 %3933, %v2812_v46  }
 0x258   : > { %v3269_v57 = vsel %vm3108_vm8, %v3216_v12, 0.0  ;;  %v2407_v25 = vadd.f32 %v2305_v39, %v2207_v19  ;;  %v1816_v20 = vpop.f32.mrf.mxu0  ;;  %v2825_v19 = vld [vmem:[%s4583_s9 + $0x138] sm:$0xff] }
 0x259   : > { %v3270_v24 = vadd.f32 %v3269_v57, %v3268_v8  ;;  %v2110_v1 = vpop.f32.mrf.mxu1  ;;  %v1916_v41 = vadd.f32 %v1816_v20, %v5454_v49  ;;  %v2507_v8 = vrot.slane %v5457_v53, 6  ;;  %v2885_v57 = vpop.permute.xlu1 %2884  ;;  %v5458_v20 = vld [vmem:[#allocation18_spill] sm:$0xff] }
 0x25a   : > { %v2749_v28 = vadd.f32 %v2647_v31, %v2407_v25  ;;  %v2650_v30 = vpop.f32.mrf.mxu3  ;;  %3029 = vperm.xlu0 %3931, %v2825_v19   ;;  %v2511_v19 = vrot.slane %v4477_v14, 6 }
 0x25b   : > { %3809 = vmatmul.msk.bf16.gmra.mxu0 %vm719_vm1, %v5455_v21  ;;  %v2208_v31 = vadd.f32 %v2108_v4, %v1916_v41  ;;  %v4909_v12 = vor.u32 %v2507_v8, %v2506_v47  ;;  %v1985_v4 = vsel %vm1954_vm5, %v1982_v44, %v1984_v51  ;;  %v2823_v41 = vld [vmem:[%s4583_s9 + $0x128] sm:$0xff] }
 0x25c   : > { %v3361_v61 = vpack.c.bf16 %v2749_v28, %v2749_v28  ;;  %v3071_v43 = vmul.f32 %v2880_v52, %v2749_v28  ;;  %3857 = vmatmul.msk.bf16.gmra.mxu2 %vm719_vm1, %v5456_v55  ;;  %v2815_v21 = vld [vmem:[%s4583_s9 + $0xe8] sm:$0xff] }
 0x25d   : > { %3019 = vperm.xlu1 %3932, %v2823_v41  }
 0x25e   : > { %3408 = vst.msk [vmem:[%s4748_s13 + $0x24] sm:$0xf] %vm3398_vm7, %v3361_v61  ;;  %v3126_v0 = vsel %vm3108_vm8, %v3071_v43, 0.0  ;;  %v3217_v16 = vmul.f32 %v3071_v43, %v2749_v28 }
 0x25f   : > { %v3127_v58 = vadd.f32 %v3126_v0, %v3125_v27  ;;  %v2308_v5 = vpop.f32.mrf.mxu2  ;;  %2979 = vperm.xlu2 %3933, %v2815_v21  }
 0x260   : > { %v3271_v11 = vsel %vm3108_vm8, %v3217_v16, 0.0  ;;  %v2408_v2 = vadd.f32 %v2308_v5, %v2208_v31  ;;  %v1818_v45 = vpop.f32.mrf.mxu0 }
 0x261   : > { %v3272_v39 = vadd.f32 %v3271_v11, %v3270_v24  ;;  %v2113_v25 = vpop.f32.mrf.mxu1  ;;  %v1917_v17 = vadd.f32 %v1818_v45, %v5458_v20  ;;  %v2509_v24 = vsel %vm2446_vm6, %v4871_v3, %v4909_v12  ;;  %v2828_v3 = vld [vmem:[%s4583_s9 + $0x150] sm:$0xff]  ;;  %v2510_v45 = vrot.slane %v4479_v35, 5 }
 0x262   : > { %v2750_v27 = vadd.f32 %v2650_v30, %v2408_v2  ;;  %v2652_v52 = vpop.f32.mrf.mxu3  ;;  %3044 = vperm.xlu0 %3931, %v2828_v3   ;;  %v5461_v2 = vld [vmem:[#allocation44_spill] sm:$0xff] }
 0x263   : > { %v2209_v30 = vadd.f32 %v2110_v1, %v1917_v17  ;;  %v5459_v1 = vld [vmem:[#allocation21_spill] sm:$0xff]  ;;  %v4947_v41 = vor.u32 %v2511_v19, %v2510_v45 }
 0x264   : > { %v3362_v28 = vpack.c.bf16 %v2750_v27, %v2750_v27  ;;  %v3072_v49 = vmul.f32 %v2885_v57, %v2750_v27  ;;  %3834 = vmatmul.msk.bf16.gmra.mxu1 %vm719_vm1, %v1985_v4  ;;  %v4939_v57 = vld [vmem:[%s4046_s20 + $0xa8] sm:$0xff] }
 0x265   : > { %v1986_v4 = vrot.slane %v4939_v57, 1  ;;  %v2827_v57 = vld [vmem:[%s4583_s9 + $0x148] sm:$0xff] }
 0x266   : > { %3409 = vst.msk [vmem:[%s4748_s13 + $0x28] sm:$0xf] %vm3398_vm7, %v3362_v28  ;;  %v3128_v33 = vsel %vm3108_vm8, %v3072_v49, 0.0  ;;  %v3218_v44 = vmul.f32 %v3072_v49, %v2750_v27 }
 0x267   : > { %v3129_v61 = vadd.f32 %v3128_v33, %v3127_v58  ;;  %v2310_v43 = vpop.f32.mrf.mxu2  ;;  %3882 = vmatmul.msk.bf16.gmra.mxu3 %vm719_vm1, %v2509_v24  ;;  %v5460_v58 = vld [vmem:[#allocation45_spill] sm:$0xff]  ;;  %v2831_v33 = vld [vmem:[%s4583_s9 + $0x168] sm:$0xff] }
 0x268   : > { %v3273_v55 = vsel %vm3108_vm8, %v3218_v44, 0.0  ;;  %v2409_v47 = vadd.f32 %v2310_v43, %v2209_v30  ;;  %v1821_v53 = vpop.f32.mrf.mxu0  ;;  %v2895_v30 = vpop.permute.xlu0 %2894  ;;  %v5462_v43 = vld [vmem:[#allocation24_spill] sm:$0xff] }
 0x269   : > { %v3274_v8 = vadd.f32 %v3273_v55, %v3272_v39  ;;  %v2115_v0 = vpop.f32.mrf.mxu1  ;;  %v1918_v31 = vadd.f32 %v1821_v53, %v5459_v1  ;;  %v2826_v39 = vld [vmem:[%s4583_s9 + $0x140] sm:$0xff]  ;;  %v2821_v1 = vld [vmem:[%s4583_s9 + $0x118] sm:$0xff] }
 0x26a   : > { %v2751_v16 = vadd.f32 %v2652_v52, %v2409_v47  ;;  %v2655_v46 = vpop.f32.mrf.mxu3  ;;  %3034 = vperm.xlu1 %3932, %v2826_v39   ;;  %v2818_v52 = vld [vmem:[%s4583_s9 + $0x100] sm:$0xff]  ;;  %3059 = vperm.xlu0 %3931, %v2831_v33   ;;  %v5463_v39 = vld [vmem:[#allocation27_spill] sm:$0xff] }
 0x26b   : > { %3810 = vmatmul.msk.bf16.gmra.mxu0 %vm719_vm1, %v5460_v58  ;;  %v2210_v17 = vadd.f32 %v2113_v25, %v1918_v31  ;;  %2994 = vperm.xlu2 %3933, %v2818_v52   ;;  %v1987_v25 = vsel %vm1954_vm5, %v1984_v51, %v1986_v4 }
 0x26c   : > { %v3363_v5 = vpack.c.bf16 %v2751_v16, %v2751_v16  ;;  %v3073_v11 = vmul.f32 %v2890_v18, %v2751_v16  ;;  %3858 = vmatmul.msk.bf16.gmra.mxu2 %vm719_vm1, %v5461_v2  ;;  %v2829_v18 = vld [vmem:[%s4583_s9 + $0x158] sm:$0xff]  ;;  %v2900_v2 = vpop.permute.xlu1 %2899 }
 0x26e   : > { %3410 = vst.msk [vmem:[%s4748_s13 + $0x2c] sm:$0xf] %vm3398_vm7, %v3363_v5  ;;  %v3130_v27 = vsel %vm3108_vm8, %v3073_v11, 0.0  ;;  %v3219_v20 = vmul.f32 %v3073_v11, %v2751_v16 }
 0x26f   : > { %v3131_v28 = vadd.f32 %v3130_v27, %v3129_v61  ;;  %v2313_v49 = vpop.f32.mrf.mxu2 }
 0x270   : > { %v3275_v35 = vsel %vm3108_vm8, %v3219_v20, 0.0  ;;  %v2410_v14 = vadd.f32 %v2313_v49, %v2210_v17  ;;  %v1823_v24 = vpop.f32.mrf.mxu0  ;;  %v5464_v20 = vld [vmem:[#allocation49_spill] sm:$0xff]  ;;  %v2514_v49 = vrot.slane %v4506_v23, 5 }
 0x271   : > { %v3276_v44 = vadd.f32 %v3275_v35, %v3274_v8  ;;  %v2118_v21 = vpop.f32.mrf.mxu1  ;;  %v1919_v55 = vadd.f32 %v1823_v24, %v5462_v43  ;;  %v2513_v8 = vsel %vm2446_vm6, %v4909_v12, %v4947_v41  ;;  %v5466_v35 = vld [vmem:[#allocation51_spill] sm:$0xff]  ;;  %v4975_v24 = vld [vmem:[%s4046_s20 + $0xb0] sm:$0xff] }
 0x272   : > { %v2752_v61 = vadd.f32 %v2655_v46, %v2410_v14  ;;  %v2657_v47 = vpop.f32.mrf.mxu3  ;;  %3049 = vperm.xlu1 %3932, %v2829_v18   ;;  %v2515_v14 = vrot.slane %v5466_v35, 6  ;;  %v1988_v33 = vrot.slane %v4975_v24, 1  ;;  %v2905_v18 = vpop.permute.xlu2 %2904  ;;  %v5469_v35 = vld [vmem:[#allocation54_spill] sm:$0xff] }
 0x273   : > { %v2211_v16 = vadd.f32 %v2115_v0, %v1919_v55  ;;  %3009 = vperm.xlu2 %3933, %v2821_v1  }
 0x274   : > { %v3364_v53 = vpack.c.bf16 %v2752_v61, %v2752_v61  ;;  %v3074_v3 = vmul.f32 %v2895_v30, %v2752_v61  ;;  %3835 = vmatmul.msk.bf16.gmra.mxu1 %vm719_vm1, %v1987_v25 }
 0x276   : > { %3411 = vst.msk [vmem:[%s4748_s13 + $0x30] sm:$0xf] %vm3398_vm7, %v3364_v53  ;;  %v3132_v15 = vsel %vm3108_vm8, %v3074_v3, 0.0  ;;  %v3220_v51 = vmul.f32 %v3074_v3, %v2752_v61  ;;  %v2824_v61 = vld [vmem:[%s4583_s9 + $0x130] sm:$0xff]  ;;  %v2516_v3 = vor.u32 %v2515_v14, %v2514_v49 }
 0x277   : > { %v3133_v31 = vadd.f32 %v3132_v15, %v3131_v28  ;;  %v2315_v46 = vpop.f32.mrf.mxu2  ;;  %3883 = vmatmul.msk.bf16.gmra.mxu3 %vm719_vm1, %v2513_v8  ;;  %v5465_v28 = vld [vmem:[#allocation48_spill] sm:$0xff] }
 0x278   : > { %v3277_v58 = vsel %vm3108_vm8, %v3220_v51, 0.0  ;;  %v2411_v5 = vadd.f32 %v2315_v46, %v2211_v16  ;;  %v1826_v12 = vpop.f32.mrf.mxu0  ;;  %v5467_v16 = vld [vmem:[#allocation30_spill] sm:$0xff] }
 0x279   : > { %v3278_v11 = vadd.f32 %v3277_v58, %v3276_v44  ;;  %v2120_v45 = vpop.f32.mrf.mxu1  ;;  %v1920_v27 = vadd.f32 %v1826_v12, %v5463_v39 }
 0x27a   : > { %v2753_v19 = vadd.f32 %v2657_v47, %v2411_v5  ;;  %v2660_v0 = vpop.f32.mrf.mxu3  ;;  %v2517_v5 = vsel %vm2446_vm6, %v4947_v41, %v2516_v3  ;;  %v2910_v41 = vpop.permute.xlu0 %2909 }
 0x27b   : > { %3811 = vmatmul.msk.bf16.gmra.mxu0 %vm719_vm1, %v5464_v20  ;;  %v2212_v25 = vadd.f32 %v2118_v21, %v1920_v27  ;;  %3024 = vperm.xlu2 %3933, %v2824_v61   ;;  %v1989_v21 = vsel %vm1954_vm5, %v1986_v4, %v1988_v33  ;;  %v2519_v61 = vrot.slane %v4538_v40, 6 }
 0x27c   : > { %v3365_v17 = vpack.c.bf16 %v2753_v19, %v2753_v19  ;;  %v3075_v52 = vmul.f32 %v2900_v2, %v2753_v19  ;;  %3859 = vmatmul.msk.bf16.gmra.mxu2 %vm719_vm1, %v5465_v28  ;;  %v5468_v28 = vld [vmem:[#allocation33_spill] sm:$0xff] }
 0x27e   : > { %3412 = vst.msk [vmem:[%s4748_s13 + $0x34] sm:$0xf] %vm3398_vm7, %v3365_v17  ;;  %v3134_v44 = vsel %vm3108_vm8, %v3075_v52, 0.0  ;;  %v3221_v30 = vmul.f32 %v3075_v52, %v2753_v19 }
 0x27f   : > { %v3135_v43 = vadd.f32 %v3134_v44, %v3133_v31  ;;  %v2318_v55 = vpop.f32.mrf.mxu2 }
 0x280   : > { %v3279_v47 = vsel %vm3108_vm8, %v3221_v30, 0.0  ;;  %v2412_v23 = vadd.f32 %v2318_v55, %v2212_v25  ;;  %v1828_v53 = vpop.f32.mrf.mxu0  ;;  %v5470_v30 = vld [vmem:[#allocation53_spill] sm:$0xff]  ;;  %v2518_v25 = vrot.slane %v4541_v36, 5 }
 0x281   : > { %v3280_v8 = vadd.f32 %v3279_v47, %v3278_v11  ;;  %v2123_v15 = vpop.f32.mrf.mxu1  ;;  %v1921_v1 = vadd.f32 %v1828_v53, %v5467_v16 }
 0x282   : > { %v2754_v51 = vadd.f32 %v2660_v0, %v2412_v23  ;;  %v2662_v31 = vpop.f32.mrf.mxu3 }
 0x283   : > { %v2213_v2 = vadd.f32 %v2120_v45, %v1921_v1  ;;  %3039 = vperm.xlu2 %3933, %v2827_v57  }
 0x284   : > { %v3366_v46 = vpack.c.bf16 %v2754_v51, %v2754_v51  ;;  %v3076_v58 = vmul.f32 %v2905_v18, %v2754_v51  ;;  %3836 = vmatmul.msk.bf16.gmra.mxu1 %vm719_vm1, %v1989_v21 }
 0x286   : > { %3413 = vst.msk [vmem:[%s4748_s13 + $0x38] sm:$0xf] %vm3398_vm7, %v3366_v46  ;;  %v3136_v12 = vsel %vm3108_vm8, %v3076_v58, 0.0  ;;  %v3222_v11 = vmul.f32 %v3076_v58, %v2754_v51  ;;  %v2915_v58 = vpop.permute.xlu1 %2914 }
 0x287   : > { %v3137_v19 = vadd.f32 %v3136_v12, %v3135_v43  ;;  %v2320_v4 = vpop.f32.mrf.mxu2  ;;  %3884 = vmatmul.msk.bf16.gmra.mxu3 %vm719_vm1, %v2517_v5  ;;  %v5006_v43 = vld [vmem:[%s4521_s29] sm:$0xff] }
 0x288   : > { %v3281_v39 = vsel %vm3108_vm8, %v3222_v11, 0.0  ;;  %v2413_v27 = vadd.f32 %v2320_v4, %v2213_v2  ;;  %v1831_v0 = vpop.f32.mrf.mxu0  ;;  %v1990_v55 = vrot.slane %v5006_v43, 1  ;;  %v5471_v11 = vld [vmem:[#allocation36_spill] sm:$0xff] }
 0x289   : > { %v3282_v20 = vadd.f32 %v3281_v39, %v3280_v8  ;;  %v2125_v17 = vpop.f32.mrf.mxu1  ;;  %v1922_v49 = vadd.f32 %v1831_v0, %v5468_v28  ;;  %v2830_v8 = vld [vmem:[%s4583_s9 + $0x160] sm:$0xff] }
 0x28a   : > { %v2755_v52 = vadd.f32 %v2662_v31, %v2413_v27  ;;  %v2665_v45 = vpop.f32.mrf.mxu3  ;;  %v2520_v31 = vor.u32 %v2519_v61, %v2518_v25  ;;  %v5472_v25 = vld [vmem:[#allocation38_spill] sm:$0xff] }
 0x28b   : > { %3812 = vmatmul.msk.bf16.gmra.mxu0 %vm719_vm1, %v5469_v35  ;;  %v2214_v53 = vadd.f32 %v2123_v15, %v1922_v49  ;;  %3054 = vperm.xlu2 %3933, %v2830_v8   ;;  %v1991_v15 = vsel %vm1954_vm5, %v1988_v33, %v1990_v55 }
 0x28c   : > { %v3367_v14 = vpack.c.bf16 %v2755_v52, %v2755_v52  ;;  %v3077_v44 = vmul.f32 %v2910_v41, %v2755_v52  ;;  %3860 = vmatmul.msk.bf16.gmra.mxu2 %vm719_vm1, %v5470_v30  ;;  %v2521_v27 = vsel %vm2446_vm6, %v2516_v3, %v2520_v31 }
 0x28e   : > { %3414 = vst.msk [vmem:[%s4748_s13 + $0x3c] sm:$0xf] %vm3398_vm7, %v3367_v14  ;;  %v3138_v47 = vsel %vm3108_vm8, %v3077_v44, 0.0  ;;  %v3223_v23 = vmul.f32 %v3077_v44, %v2755_v52  ;;  %v2920_v14 = vpop.permute.xlu2 %2919 }
 0x28f   : > { %v3139_v18 = vadd.f32 %v3138_v47, %v3137_v19  ;;  %v2323_v21 = vpop.f32.mrf.mxu2  ;;  %v5021_v19 = vld [vmem:[%s4521_s29 + $0x8] sm:$0xff] }
 0x290   : > { %v3283_v51 = vsel %vm3108_vm8, %v3223_v23, 0.0  ;;  %v2414_v16 = vadd.f32 %v2323_v21, %v2214_v53  ;;  %v1833_v1 = vpop.f32.mrf.mxu0  ;;  %v1728_v52 = vshll.u32 %v5021_v19, 16  ;;  %v1732_v28 = vshrl.u32 %v5021_v19, 16 }
 0x291   : > { %v3284_v46 = vadd.f32 %v3283_v51, %v3282_v20  ;;  %v2128_v5 = vpop.f32.mrf.mxu1  ;;  %v1923_v2 = vadd.f32 %v1833_v1, %v5471_v11 }
 0x292   : > { %v2756_v12 = vadd.f32 %v2665_v45, %v2414_v16  ;;  %v2667_v57 = vpop.f32.mrf.mxu3  ;;  %v2522_v47 = vrot.slane %v1732_v28, 5  ;;  %v2523_v23 = vrot.slane %v1728_v52, 6  ;;  %v1730_v43 = vrot.slane %v1728_v52, 1 }
 0x293   : > { %v2215_v24 = vadd.f32 %v2125_v17, %v1923_v2 }
 0x294   : > { %v3368_v4 = vpack.c.bf16 %v2756_v12, %v2756_v12  ;;  %v3078_v39 = vmul.f32 %v2915_v58, %v2756_v12  ;;  %3837 = vmatmul.msk.bf16.gmra.mxu1 %vm719_vm1, %v1991_v15 }
 0x296   : > { %3415 = vst.msk [vmem:[%s4748_s13 + $0x40] sm:$0xf] %vm3398_vm7, %v3368_v4  ;;  %v3140_v0 = vsel %vm3108_vm8, %v3078_v39, 0.0  ;;  %v3224_v20 = vmul.f32 %v3078_v39, %v2756_v12 }
 0x297   : > { %v3141_v41 = vadd.f32 %v3140_v0, %v3139_v18  ;;  %v2325_v33 = vpop.f32.mrf.mxu2  ;;  %3885 = vmatmul.msk.bf16.gmra.mxu3 %vm719_vm1, %v2521_v27  ;;  %v1992_v18 = vrot.slane %v5021_v19, 1 }
 0x298   : > { %v3285_v49 = vsel %vm3108_vm8, %v3224_v20, 0.0  ;;  %v2415_v45 = vadd.f32 %v2325_v33, %v2215_v24  ;;  %v1836_v35 = vpop.f32.mrf.mxu0  ;;  %v5055_v20 = vld [vmem:[%s4521_s29 + $0x10] sm:$0xff]  ;;  %v5474_v33 = vrot.slane %v4538_v40, 1 }
 0x299   : > { %v3286_v3 = vadd.f32 %v3285_v49, %v3284_v46  ;;  %v2130_v44 = vpop.f32.mrf.mxu1  ;;  %v1924_v61 = vadd.f32 %v1836_v35, %v5472_v25  ;;  %v5043_v46 = vor.u32 %v2523_v23, %v2522_v47  ;;  %v1740_v25 = vshrl.u32 %v5055_v20, 16  ;;  %v2930_v47 = vpop.permute.xlu1 %2929 }
 0x29a   : > { %v2757_v30 = vadd.f32 %v2667_v57, %v2415_v45  ;;  %v2670_v17 = vpop.f32.mrf.mxu3  ;;  %v1993_v57 = vsel %vm1954_vm5, %v1990_v55, %v1992_v18  ;;  %v1726_v49 = vor.u32 %v4541_v36, %v5474_v33  ;;  %v2246_v55 = vrot.slane %v5021_v19, 5 }
 0x29b   : > { %3813 = vmatmul.msk.bf16.gmra.mxu0 %vm719_vm1, %v4565_v56  ;;  %v2216_v16 = vadd.f32 %v2128_v5, %v1924_v61  ;;  %v5473_v5 = vld [vmem:[#allocation41_spill] sm:$0xff]  ;;  %v2525_v0 = vsel %vm2446_vm6, %v2520_v31, %v5043_v46 }
 0x29c   : > { %v3369_v53 = vpack.c.bf16 %v2757_v30, %v2757_v30  ;;  %v3079_v8 = vmul.f32 %v2920_v14, %v2757_v30  ;;  %3861 = vmatmul.msk.bf16.gmra.mxu2 %vm719_vm1, %v4553_v29  ;;  %v2925_v29 = vpop.permute.xlu0 %2924  ;;  %v1731_v61 = vsel %vm530_vm3, %v1726_v49, %v1730_v43 }
 0x29e   : > { %3416 = vst.msk [vmem:[%s4748_s13 + $0x44] sm:$0xf] %vm3398_vm7, %v3369_v53  ;;  %v3142_v21 = vsel %vm3108_vm8, %v3079_v8, 0.0  ;;  %v3225_v51 = vmul.f32 %v3079_v8, %v2757_v30  ;;  %v1736_v30 = vshll.u32 %v5055_v20, 16 }
 0x29f   : > { %v3143_v1 = vadd.f32 %v3142_v21, %v3141_v41  ;;  %v2328_v56 = vpop.f32.mrf.mxu2  ;;  %v5476_v21 = vld [vmem:[#allocation43_spill] sm:$0xff] }
 0x2a0   : > { %v3287_v58 = vsel %vm3108_vm8, %v3225_v51, 0.0  ;;  %v2416_v15 = vadd.f32 %v2328_v56, %v2216_v16  ;;  %v1838_v12 = vpop.f32.mrf.mxu0  ;;  %v2527_v56 = vrot.slane %v1736_v30, 6 }
 0x2a1   : > { %v3288_v11 = vadd.f32 %v3287_v58, %v3286_v3  ;;  %v2133_v2 = vpop.f32.mrf.mxu1  ;;  %v1925_v39 = vadd.f32 %v1838_v12, %v5473_v5  ;;  %v1994_v12 = vrot.slane %v5055_v20, 1 }
 0x2a2   : > { %v2758_v4 = vadd.f32 %v2670_v17, %v2416_v15  ;;  %v2672_v27 = vpop.f32.mrf.mxu3 }
 0x2a3   : > { %v2217_v3 = vadd.f32 %v2130_v44, %v1925_v39  ;;  %v5475_v44 = vrot.slane %v4530_v37, 5  ;;  %v1995_v49 = vsel %vm1954_vm5, %v1992_v18, %v1994_v12  ;;  %v2248_v18 = vrot.slane %v5055_v20, 5 }
 0x2a4   : > { %v3370_v24 = vpack.c.bf16 %v2758_v4, %v2758_v4  ;;  %v3080_v41 = vmul.f32 %v2925_v29, %v2758_v4  ;;  %3838 = vmatmul.msk.bf16.gmra.mxu1 %vm719_vm1, %v1993_v57 }
 0x2a5   : > { %v2247_v23 = vsel %vm1434_vm2, %v5475_v44, %v2246_v55 }
 0x2a6   : > { %3417 = vst.msk [vmem:[%s4748_s13 + $0x48] sm:$0xf] %vm3398_vm7, %v3370_v24  ;;  %v3144_v45 = vsel %vm3108_vm8, %v3080_v41, 0.0  ;;  %v3226_v35 = vmul.f32 %v3080_v41, %v2758_v4  ;;  %v2935_v41 = vpop.permute.xlu2 %2934 }
 0x2a7   : > { %v3145_v31 = vadd.f32 %v3144_v45, %v3143_v1  ;;  %v2330_v14 = vpop.f32.mrf.mxu2  ;;  %3886 = vmatmul.msk.bf16.gmra.mxu3 %vm719_vm1, %v2525_v0  ;;  %v2526_v1 = vrot.slane %v1740_v25, 5 }
 0x2a8   : > { %v3289_v40 = vsel %vm3108_vm8, %v3226_v35, 0.0  ;;  %v2417_v36 = vadd.f32 %v2330_v14, %v2217_v3  ;;  %v1841_v52 = vpop.f32.mrf.mxu0  ;;  %v5097_v14 = vld [vmem:[%s4521_s29 + $0x18] sm:$0xff] }
 0x2a9   : > { %v3290_v17 = vadd.f32 %v3289_v40, %v3288_v11  ;;  %v2135_v53 = vpop.f32.mrf.mxu1  ;;  %v1926_v51 = vadd.f32 %v1841_v52, %v5476_v21  ;;  %v5084_v5 = vor.u32 %v2527_v56, %v2526_v1  ;;  %v1734_v52 = vor.u32 %v1732_v28, %v1730_v43  ;;  %v2940_v1 = vpop.permute.xlu0 %2939 }
 0x2aa   : > { %v2759_v8 = vadd.f32 %v2672_v27, %v2417_v36  ;;  %v2675_v16 = vpop.f32.mrf.mxu3  ;;  %v1748_v21 = vshrl.u32 %v5097_v14, 16 }
 0x2ab   : > { %3814 = vmatmul.msk.bf16.gmra.mxu0 %vm719_vm1, %v1731_v61  ;;  %v2218_v29 = vadd.f32 %v2133_v2, %v1926_v51  ;;  %v5477_v2 = vld [vmem:[#allocation46_spill] sm:$0xff]  ;;  %v1738_v61 = vrot.slane %v1736_v30, 1 }
 0x2ac   : > { %v3371_v58 = vpack.c.bf16 %v2759_v8, %v2759_v8  ;;  %v3081_v15 = vmul.f32 %v2930_v47, %v2759_v8  ;;  %3862 = vmatmul.msk.bf16.gmra.mxu2 %vm719_vm1, %v2247_v23 }
 0x2ad   : > { %v1739_v30 = vsel %vm530_vm3, %v1734_v52, %v1738_v61 }
 0x2ae   : > { %3418 = vst.msk [vmem:[%s4748_s13 + $0x4c] sm:$0xf] %vm3398_vm7, %v3371_v58  ;;  %v3146_v37 = vsel %vm3108_vm8, %v3081_v15, 0.0  ;;  %v3227_v11 = vmul.f32 %v3081_v15, %v2759_v8  ;;  %v1744_v8 = vshll.u32 %v5097_v14, 16  ;;  %v5478_v15 = vld [vmem:[#allocation47_spill] sm:$0xff] }
 0x2af   : > { %v3147_v57 = vadd.f32 %v3146_v37, %v3145_v31  ;;  %v2333_v4 = vpop.f32.mrf.mxu2  ;;  %v2529_v31 = vsel %vm2446_vm6, %v5043_v46, %v5084_v5 }
 0x2b0   : > { %v3291_v39 = vsel %vm3108_vm8, %v3227_v11, 0.0  ;;  %v2418_v27 = vadd.f32 %v2333_v4, %v2218_v29  ;;  %v1843_v0 = vpop.f32.mrf.mxu0  ;;  %v2530_v29 = vrot.slane %v1748_v21, 5 }
 0x2b1   : > { %v3292_v24 = vadd.f32 %v3291_v39, %v3290_v17  ;;  %v2138_v33 = vpop.f32.mrf.mxu1  ;;  %v1927_v35 = vadd.f32 %v1843_v0, %v5477_v2 }
 0x2b2   : > { %v2760_v45 = vadd.f32 %v2675_v16, %v2418_v27  ;;  %v2677_v3 = vpop.f32.mrf.mxu3  ;;  %v1996_v27 = vrot.slane %v5097_v14, 1 }
 0x2b3   : > { %v2219_v44 = vadd.f32 %v2135_v53, %v1927_v35  ;;  %v2249_v53 = vsel %vm1434_vm2, %v2246_v55, %v2248_v18 }
 0x2b4   : > { %v3372_v40 = vpack.c.bf16 %v2760_v45, %v2760_v45  ;;  %v3082_v36 = vmul.f32 %v2935_v41, %v2760_v45  ;;  %3839 = vmatmul.msk.bf16.gmra.mxu1 %vm719_vm1, %v1995_v49 }
 0x2b6   : > { %3419 = vst.msk [vmem:[%s4748_s13 + $0x50] sm:$0xf] %vm3398_vm7, %v3372_v40  ;;  %v3148_v17 = vsel %vm3108_vm8, %v3082_v36, 0.0  ;;  %v3228_v47 = vmul.f32 %v3082_v36, %v2760_v45  ;;  %v1997_v36 = vsel %vm1954_vm5, %v1994_v12, %v1996_v27  ;;  %v2250_v12 = vrot.slane %v5097_v14, 5 }
 0x2b7   : > { %v3149_v23 = vadd.f32 %v3148_v17, %v3147_v57  ;;  %v2335_v46 = vpop.f32.mrf.mxu2  ;;  %3887 = vmatmul.msk.bf16.gmra.mxu3 %vm719_vm1, %v2529_v31  ;;  %v2531_v57 = vrot.slane %v1744_v8, 6  ;;  %v2945_v31 = vpop.permute.xlu1 %2944 }
 0x2b8   : > { %v3293_v51 = vsel %vm3108_vm8, %v3228_v47, 0.0  ;;  %v2419_v28 = vadd.f32 %v2335_v46, %v2219_v44  ;;  %v1846_v43 = vpop.f32.mrf.mxu0 }
 0x2b9   : > { %v3294_v16 = vadd.f32 %v3293_v51, %v3292_v24  ;;  %v2140_v56 = vpop.f32.mrf.mxu1  ;;  %v1928_v37 = vadd.f32 %v1846_v43, %v5478_v15  ;;  %v5125_v49 = vor.u32 %v2531_v57, %v2530_v29  ;;  %v1746_v43 = vrot.slane %v1744_v8, 1  ;;  %v2950_v29 = vpop.permute.xlu2 %2949 }
 0x2ba   : > { %v2761_v58 = vadd.f32 %v2677_v3, %v2419_v28  ;;  %v2680_v11 = vpop.f32.mrf.mxu3  ;;  %v1742_v28 = vor.u32 %v1740_v25, %v1738_v61 }
 0x2bb   : > { %3815 = vmatmul.msk.bf16.gmra.mxu0 %vm719_vm1, %v1739_v30  ;;  %v2220_v0 = vadd.f32 %v2138_v33, %v1928_v37  ;;  %v5479_v33 = vld [vmem:[#allocation50_spill] sm:$0xff]  ;;  %v2533_v44 = vsel %vm2446_vm6, %v5084_v5, %v5125_v49 }
 0x2bc   : > { %v3373_v4 = vpack.c.bf16 %v2761_v58, %v2761_v58  ;;  %v3083_v39 = vmul.f32 %v2940_v1, %v2761_v58  ;;  %3863 = vmatmul.msk.bf16.gmra.mxu2 %vm719_vm1, %v2249_v53  ;;  %v1747_v8 = vsel %vm530_vm3, %v1742_v28, %v1746_v43  ;;  %v5481_v28 = vld [vmem:[#allocation55_spill] sm:$0xff] }
 0x2be   : > { %3420 = vst.msk [vmem:[%s4748_s13 + $0x54] sm:$0xf] %vm3398_vm7, %v3373_v4  ;;  %v3150_v19 = vsel %vm3108_vm8, %v3083_v39, 0.0  ;;  %v3229_v55 = vmul.f32 %v3083_v39, %v2761_v58  ;;  %v5480_v39 = vld [vmem:[#allocation52_spill] sm:$0xff] }
 0x2bf   : > { %v3151_v24 = vadd.f32 %v3150_v19, %v3149_v23  ;;  %v2338_v41 = vpop.f32.mrf.mxu2  ;;  %v5138_v23 = vld [vmem:[%s4521_s29 + $0x20] sm:$0xff] }
 0x2c0   : > { %v3295_v45 = vsel %vm3108_vm8, %v3229_v55, 0.0  ;;  %v2420_v2 = vadd.f32 %v2338_v41, %v2220_v0  ;;  %v1848_v35 = vpop.f32.mrf.mxu0  ;;  %v1752_v58 = vshll.u32 %v5138_v23, 16  ;;  %v1756_v15 = vshrl.u32 %v5138_v23, 16 }
 0x2c1   : > { %v3296_v3 = vadd.f32 %v3295_v45, %v3294_v16  ;;  %v2143_v40 = vpop.f32.mrf.mxu1  ;;  %v1929_v17 = vadd.f32 %v1848_v35, %v5479_v33 }
 0x2c2   : > { %v2762_v52 = vadd.f32 %v2680_v11, %v2420_v2  ;;  %v2682_v47 = vpop.f32.mrf.mxu3  ;;  %v2534_v0 = vrot.slane %v1756_v15, 5  ;;  %v1998_v2 = vrot.slane %v5138_v23, 1 }
 0x2c3   : > { %v2221_v1 = vadd.f32 %v2140_v56, %v1929_v17  ;;  %v2251_v56 = vsel %vm1434_vm2, %v2248_v18, %v2250_v12 }
 0x2c4   : > { %v3374_v46 = vpack.c.bf16 %v2762_v52, %v2762_v52  ;;  %v3084_v51 = vmul.f32 %v2945_v31, %v2762_v52  ;;  %3840 = vmatmul.msk.bf16.gmra.mxu1 %vm719_vm1, %v1997_v36 }
 0x2c6   : > { %3421 = vst.msk [vmem:[%s4748_s13 + $0x58] sm:$0xf] %vm3398_vm7, %v3374_v46  ;;  %v3152_v30 = vsel %vm3108_vm8, %v3084_v51, 0.0  ;;  %v3230_v16 = vmul.f32 %v3084_v51, %v2762_v52  ;;  %v1999_v46 = vsel %vm1954_vm5, %v1996_v27, %v1998_v2  ;;  %v2252_v27 = vrot.slane %v5138_v23, 5 }
 0x2c7   : > { %v3153_v53 = vadd.f32 %v3152_v30, %v3151_v24  ;;  %v2340_v5 = vpop.f32.mrf.mxu2  ;;  %3888 = vmatmul.msk.bf16.gmra.mxu3 %vm719_vm1, %v2533_v44  ;;  %v2535_v24 = vrot.slane %v1752_v58, 6 }
 0x2c8   : > { %v3297_v37 = vsel %vm3108_vm8, %v3230_v16, 0.0  ;;  %v2421_v25 = vadd.f32 %v2340_v5, %v2221_v1  ;;  %v1851_v61 = vpop.f32.mrf.mxu0  ;;  %v2955_v16 = vpop.permute.xlu0 %2954 }
 0x2c9   : > { %v3298_v11 = vadd.f32 %v3297_v37, %v3296_v3  ;;  %v2145_v57 = vpop.f32.mrf.mxu1  ;;  %v1930_v19 = vadd.f32 %v1851_v61, %v5480_v39  ;;  %v5166_v36 = vor.u32 %v2535_v24, %v2534_v0  ;;  %v1754_v61 = vrot.slane %v1752_v58, 1 }
 0x2ca   : > { %v2763_v4 = vadd.f32 %v2682_v47, %v2421_v25  ;;  %v2685_v55 = vpop.f32.mrf.mxu3  ;;  %v1750_v25 = vor.u32 %v1748_v21, %v1746_v43 }
 0x2cb   : > { %3816 = vmatmul.msk.bf16.gmra.mxu0 %vm719_vm1, %v1747_v8  ;;  %v2222_v35 = vadd.f32 %v2143_v40, %v1930_v19  ;;  %v2537_v1 = vsel %vm2446_vm6, %v5125_v49, %v5166_v36 }
 0x2cc   : > { %v3375_v41 = vpack.c.bf16 %v2763_v4, %v2763_v4  ;;  %v3085_v45 = vmul.f32 %v2950_v29, %v2763_v4  ;;  %3864 = vmatmul.msk.bf16.gmra.mxu2 %vm719_vm1, %v2251_v56  ;;  %v1755_v58 = vsel %vm530_vm3, %v1750_v25, %v1754_v61  ;;  %v5483_v25 = vld [vmem:[#allocation57_spill] sm:$0xff] }
 0x2ce   : > { %3422 = vst.msk [vmem:[%s4748_s13 + $0x5c] sm:$0xf] %vm3398_vm7, %v3375_v41  ;;  %v3154_v20 = vsel %vm3108_vm8, %v3085_v45, 0.0  ;;  %v3231_v18 = vmul.f32 %v3085_v45, %v2763_v4  ;;  %v5482_v41 = vld [vmem:[#allocation56_spill] sm:$0xff] }
 0x2cf   : > { %v3155_v3 = vadd.f32 %v3154_v20, %v3153_v53  ;;  %v2343_v31 = vpop.f32.mrf.mxu2  ;;  %v5179_v53 = vld [vmem:[%s4521_s29 + $0x28] sm:$0xff] }
 0x2d0   : > { %v3299_v52 = vsel %vm3108_vm8, %v3231_v18, 0.0  ;;  %v2422_v33 = vadd.f32 %v2343_v31, %v2222_v35  ;;  %v1853_v17 = vpop.f32.mrf.mxu0  ;;  %v1760_v4 = vshll.u32 %v5179_v53, 16  ;;  %v2538_v39 = vshrl.u32 %v5179_v53, 16  ;;  %v2960_v18 = vpop.permute.xlu1 %2959 }
 0x2d1   : > { %v3300_v47 = vadd.f32 %v3299_v52, %v3298_v11  ;;  %v2148_v44 = vpop.f32.mrf.mxu1  ;;  %v1931_v40 = vadd.f32 %v1853_v17, %v5481_v28 }
 0x2d2   : > { %v2764_v51 = vadd.f32 %v2685_v55, %v2422_v33  ;;  %v2687_v30 = vpop.f32.mrf.mxu3  ;;  %v2540_v35 = vrot.slane %v2538_v39, 5  ;;  %v2000_v33 = vrot.slane %v5179_v53, 1  ;;  %v1758_v39 = vor.u32 %v1756_v15, %v1754_v61 }
 0x2d3   : > { %v2223_v29 = vadd.f32 %v2145_v57, %v1931_v40  ;;  %v2253_v57 = vsel %vm1434_vm2, %v2250_v12, %v2252_v27 }
 0x2d4   : > { %v3086_v5 = vmul.f32 %v2955_v16, %v2764_v51  ;;  %v3376_v37 = vpack.c.bf16 %v2764_v51, %v2764_v51  ;;  %3841 = vmatmul.msk.bf16.gmra.mxu1 %vm719_vm1, %v1999_v46 }
 0x2d6   : > { %v3156_v8 = vsel %vm3108_vm8, %v3086_v5, 0.0  ;;  %v3232_v11 = vmul.f32 %v3086_v5, %v2764_v51  ;;  %3423 = vst.msk [vmem:[%s4748_s13 + $0x60] sm:$0xf] %vm3398_vm7, %v3376_v37  ;;  %v2001_v5 = vsel %vm1954_vm5, %v1998_v2, %v2000_v33 }
 0x2d7   : > { %v3157_v56 = vadd.f32 %v3156_v8, %v3155_v3  ;;  %v2345_v49 = vpop.f32.mrf.mxu2  ;;  %3889 = vmatmul.msk.bf16.gmra.mxu3 %vm719_vm1, %v2537_v1  ;;  %v2541_v3 = vrot.slane %v1760_v4, 6 }
 0x2d8   : > { %v3301_v19 = vsel %vm3108_vm8, %v3232_v11, 0.0  ;;  %v2423_v21 = vadd.f32 %v2345_v49, %v2223_v29  ;;  %v1856_v43 = vpop.f32.mrf.mxu0  ;;  %v2965_v29 = vpop.permute.xlu2 %2964 }
 0x2d9   : > { %v3302_v55 = vadd.f32 %v3301_v19, %v3300_v47  ;;  %v2150_v0 = vpop.f32.mrf.mxu1  ;;  %v1932_v45 = vadd.f32 %v1856_v43, %v5482_v41  ;;  %v2542_v51 = vor.u32 %v2541_v3, %v2540_v35  ;;  %v1762_v19 = vrot.slane %v1760_v4, 1 }
 0x2da   : > { %v2765_v24 = vadd.f32 %v2687_v30, %v2423_v21  ;;  %v2690_v20 = vpop.f32.mrf.mxu3  ;;  %v2254_v21 = vrot.slane %v5179_v53, 5 }
 0x2db   : > { %3817 = vmatmul.msk.bf16.gmra.mxu0 %vm719_vm1, %v1755_v58  ;;  %v2224_v12 = vadd.f32 %v2148_v44, %v1932_v45  ;;  %v2543_v44 = vsel %vm2446_vm6, %v5166_v36, %v2542_v51  ;;  %v1763_v15 = vsel %vm530_vm3, %v1758_v39, %v1762_v19 }
 0x2dc   : > { %v3087_v31 = vmul.f32 %v2960_v18, %v2765_v24  ;;  %v3377_v52 = vpack.c.bf16 %v2765_v24, %v2765_v24  ;;  %3865 = vmatmul.msk.bf16.gmra.mxu2 %vm719_vm1, %v2253_v57  ;;  %v2255_v53 = vsel %vm1434_vm2, %v2252_v27, %v2254_v21  ;;  %v2970_v18 = vpop.permute.xlu0 %2969 }
 0x2de   : > { %v3158_v14 = vsel %vm3108_vm8, %v3087_v31, 0.0  ;;  %v3233_v17 = vmul.f32 %v3087_v31, %v2765_v24  ;;  %3424 = vst.msk [vmem:[%s4748_s13 + $0x64] sm:$0xf] %vm3398_vm7, %v3377_v52 }
 0x2df   : > { %v3159_v47 = vadd.f32 %v3158_v14, %v3157_v56  ;;  %v2348_v46 = vpop.f32.mrf.mxu2 }
 0x2e0   : > { %v3303_v28 = vsel %vm3108_vm8, %v3233_v17, 0.0  ;;  %v2424_v40 = vadd.f32 %v2348_v46, %v2224_v12  ;;  %v1858_v30 = vpop.f32.mrf.mxu0  ;;  %v2980_v21 = vpop.permute.xlu2 %2979 }
 0x2e1   : > { %v3304_v16 = vadd.f32 %v3303_v28, %v3302_v55  ;;  %v2153_v1 = vpop.f32.mrf.mxu1  ;;  %v1933_v8 = vadd.f32 %v1858_v30, %v5483_v25 }
 0x2e2   : > { %v2766_v37 = vadd.f32 %v2690_v20, %v2424_v40  ;;  %v2692_v11 = vpop.f32.mrf.mxu3  ;;  %v2975_v40 = vpop.permute.xlu1 %2974 }
 0x2e3   : > { %v2225_v58 = vadd.f32 %v2150_v0, %v1933_v8 }
 0x2e4   : > { %v3088_v56 = vmul.f32 %v2965_v29, %v2766_v37  ;;  %v3378_v49 = vpack.c.bf16 %v2766_v37, %v2766_v37  ;;  %3842 = vmatmul.msk.bf16.gmra.mxu1 %vm719_vm1, %v2001_v5 }
 0x2e6   : > { %v3160_v2 = vsel %vm3108_vm8, %v3088_v56, 0.0  ;;  %v3234_v43 = vmul.f32 %v3088_v56, %v2766_v37  ;;  %3425 = vst.msk [vmem:[%s4748_s13 + $0x68] sm:$0xf] %vm3398_vm7, %v3378_v49 }
 0x2e7   : > { %v3161_v55 = vadd.f32 %v3160_v2, %v3159_v47  ;;  %v2350_v57 = vpop.f32.mrf.mxu2  ;;  %3890 = vmatmul.msk.bf16.gmra.mxu3 %vm719_vm1, %v2543_v44 }
 0x2e8   : > { %v3305_v36 = vsel %vm3108_vm8, %v3234_v43, 0.0  ;;  %v2425_v24 = vadd.f32 %v2350_v57, %v2225_v58  ;;  %v1861_v41 = vpop.f32.mrf.mxu0 }
 0x2e9   : > { %v3306_v61 = vadd.f32 %v3305_v36, %v3304_v16  ;;  %v2155_v4 = vpop.f32.mrf.mxu1  ;;  %v1934_v0 = vadd.f32 %v1861_v41, %v4587_v59 }
 0x2ea   : > { %v2767_v45 = vadd.f32 %v2692_v11, %v2425_v24  ;;  %v2695_v20 = vpop.f32.mrf.mxu3 }
 0x2eb   : > { %3818 = vmatmul.msk.bf16.gmra.mxu0 %vm719_vm1, %v1763_v15  ;;  %v2226_v23 = vadd.f32 %v2153_v1, %v1934_v0 }
 0x2ec   : > { %v3089_v35 = vmul.f32 %v2970_v18, %v2767_v45  ;;  %v3379_v3 = vpack.c.bf16 %v2767_v45, %v2767_v45  ;;  %3866 = vmatmul.msk.bf16.gmra.mxu2 %vm719_vm1, %v2255_v53 }
 0x2ee   : > { %v3162_v31 = vsel %vm3108_vm8, %v3089_v35, 0.0  ;;  %v3235_v52 = vmul.f32 %v3089_v35, %v2767_v45  ;;  %3426 = vst.msk [vmem:[%s4748_s13 + $0x6c] sm:$0xf] %vm3398_vm7, %v3379_v3 }
 0x2ef   : > { %v3163_v27 = vadd.f32 %v3162_v31, %v3161_v55  ;;  %v2353_v33 = vpop.f32.mrf.mxu2 }
 0x2f0   : > { %v3307_v14 = vsel %vm3108_vm8, %v3235_v52, 0.0  ;;  %v2426_v59 = vadd.f32 %v2353_v33, %v2226_v23  ;;  %v1863_v17 = vpop.f32.mrf.mxu0 }
 0x2f1   : > { %v3308_v12 = vadd.f32 %v3307_v14, %v3306_v61  ;;  %v2158_v47 = vpop.f32.mrf.mxu1  ;;  %v1935_v51 = vadd.f32 %v1863_v17, %v4593_v62 }
 0x2f2   : > { %v2768_v46 = vadd.f32 %v2695_v20, %v2426_v59  ;;  %v2697_v28 = vpop.f32.mrf.mxu3  ;;  %v2985_v20 = vpop.permute.xlu0 %2984 }
 0x2f3   : > { %v2227_v1 = vadd.f32 %v2155_v4, %v1935_v51  ;;  %v2990_v51 = vpop.permute.xlu1 %2989 }
 0x2f4   : > { %v3090_v30 = vmul.f32 %v2975_v40, %v2768_v46  ;;  %v3380_v16 = vpack.c.bf16 %v2768_v46, %v2768_v46 }
 0x2f6   : > { %v3164_v5 = vsel %vm3108_vm8, %v3090_v30, 0.0  ;;  %v3236_v37 = vmul.f32 %v3090_v30, %v2768_v46  ;;  %3427 = vst.msk [vmem:[%s4748_s13 + $0x70] sm:$0xf] %vm3398_vm7, %v3380_v16 }
 0x2f7   : > { %v3165_v25 = vadd.f32 %v3164_v5, %v3163_v27  ;;  %v2355_v8 = vpop.f32.mrf.mxu2 }
 0x2f8   : > { %v3309_v11 = vsel %vm3108_vm8, %v3236_v37, 0.0  ;;  %v2427_v29 = vadd.f32 %v2355_v8, %v2227_v1  ;;  %v1866_v44 = vpop.f32.mrf.mxu0 }
 0x2f9   : > { %v3310_v56 = vadd.f32 %v3309_v11, %v3308_v12  ;;  %v2160_v49 = vpop.f32.mrf.mxu1  ;;  %v1936_v39 = vadd.f32 %v1866_v44, %v4604_v32 }
 0x2fa   : > { %v2769_v62 = vadd.f32 %v2697_v28, %v2427_v29  ;;  %v2700_v19 = vpop.f32.mrf.mxu3 }
 0x2fb   : > { %v2228_v57 = vadd.f32 %v2158_v47, %v1936_v39 }
 0x2fc   : > { %v3091_v2 = vmul.f32 %v2980_v21, %v2769_v62  ;;  %v3381_v43 = vpack.c.bf16 %v2769_v62, %v2769_v62 }
 0x2fe   : > { %v3166_v58 = vsel %vm3108_vm8, %v3091_v2, 0.0  ;;  %v3237_v55 = vmul.f32 %v3091_v2, %v2769_v62  ;;  %3428 = vst.msk [vmem:[%s4748_s13 + $0x74] sm:$0xf] %vm3398_vm7, %v3381_v43  ;;  %v2995_v62 = vpop.permute.xlu2 %2994 }
 0x2ff   : > { %v3167_v36 = vadd.f32 %v3166_v58, %v3165_v25  ;;  %v2358_v24 = vpop.f32.mrf.mxu2 }
 0x300   : > { %v3311_v41 = vsel %vm3108_vm8, %v3237_v55, 0.0  ;;  %v2428_v15 = vadd.f32 %v2358_v24, %v2228_v57  ;;  %v1868_v61 = vpop.f32.mrf.mxu0 }
 0x301   : > { %v3312_v53 = vadd.f32 %v3311_v41, %v3310_v56  ;;  %v2163_v4 = vpop.f32.mrf.mxu1  ;;  %v1937_v45 = vadd.f32 %v1868_v61, %v4610_v60 }
 0x302   : > { %v2770_v32 = vadd.f32 %v2700_v19, %v2428_v15  ;;  %v2702_v0 = vpop.f32.mrf.mxu3 }
 0x303   : > { %v2229_v52 = vadd.f32 %v2160_v49, %v1937_v45 }
 0x304   : > { %v3092_v18 = vmul.f32 %v2985_v20, %v2770_v32  ;;  %v3382_v35 = vpack.c.bf16 %v2770_v32, %v2770_v32 }
 0x306   : > { %v3168_v3 = vsel %vm3108_vm8, %v3092_v18, 0.0  ;;  %v3238_v31 = vmul.f32 %v3092_v18, %v2770_v32  ;;  %3429 = vst.msk [vmem:[%s4748_s13 + $0x78] sm:$0xf] %vm3398_vm7, %v3382_v35 }
 0x307   : > { %v3169_v23 = vadd.f32 %v3168_v3, %v3167_v36  ;;  %v2360_v27 = vpop.f32.mrf.mxu2 }
 0x308   : > { %v3313_v33 = vsel %vm3108_vm8, %v3238_v31, 0.0  ;;  %v2429_v14 = vadd.f32 %v2360_v27, %v2229_v52  ;;  %v1871_v59 = vpop.f32.mrf.mxu0 }
 0x309   : > { %v3314_v17 = vadd.f32 %v3313_v33, %v3312_v53  ;;  %v2165_v12 = vpop.f32.mrf.mxu1  ;;  %v1938_v47 = vadd.f32 %v1871_v59, %v4620_v42 }
 0x30a   : > { %v2771_v60 = vadd.f32 %v2702_v0, %v2429_v14  ;;  %v2705_v46 = vpop.f32.mrf.mxu3 }
 0x30b   : > { %v2230_v5 = vadd.f32 %v2163_v4, %v1938_v47  ;;  %v3000_v4 = vpop.permute.xlu0 %2999 }
 0x30c   : > { %v3093_v28 = vmul.f32 %v2990_v51, %v2771_v60  ;;  %v3383_v40 = vpack.c.bf16 %v2771_v60, %v2771_v60 }
 0x30e   : > { %v3170_v30 = vsel %vm3108_vm8, %v3093_v28, 0.0  ;;  %v3239_v16 = vmul.f32 %v3093_v28, %v2771_v60  ;;  %3430 = vst.msk [vmem:[%s4748_s13 + $0x7c] sm:$0xf] %vm3398_vm7, %v3383_v40 }
 0x30f   : > { %v3171_v37 = vadd.f32 %v3170_v30, %v3169_v23  ;;  %v2363_v1 = vpop.f32.mrf.mxu2 }
 0x310   : > { %v3315_v25 = vsel %vm3108_vm8, %v3239_v16, 0.0  ;;  %v2430_v8 = vadd.f32 %v2363_v1, %v2230_v5  ;;  %v1873_v11 = vpop.f32.mrf.mxu0 }
 0x311   : > { %v3316_v29 = vadd.f32 %v3315_v25, %v3314_v17  ;;  %v2168_v44 = vpop.f32.mrf.mxu1  ;;  %v1939_v56 = vadd.f32 %v1873_v11, %v4625_v48  ;;  %v3005_v17 = vpop.permute.xlu1 %3004 }
 0x312   : > { %v2772_v42 = vadd.f32 %v2705_v46, %v2430_v8  ;;  %v2707_v49 = vpop.f32.mrf.mxu3  ;;  %v3010_v11 = vpop.permute.xlu2 %3009 }
 0x313   : > { %v2231_v43 = vadd.f32 %v2165_v12, %v1939_v56 }
 0x314   : > { %v3094_v39 = vmul.f32 %v2995_v62, %v2772_v42  ;;  %v3384_v19 = vpack.c.bf16 %v2772_v42, %v2772_v42 }
 0x316   : > { %v3172_v21 = vsel %vm3108_vm8, %v3094_v39, 0.0  ;;  %v3240_v2 = vmul.f32 %v3094_v39, %v2772_v42  ;;  %3431 = vst.msk [vmem:[%s4748_s13 + $0x80] sm:$0xf] %vm3398_vm7, %v3384_v19 }
 0x317   : > { %v3173_v58 = vadd.f32 %v3172_v21, %v3171_v37  ;;  %v2365_v55 = vpop.f32.mrf.mxu2 }
 0x318   : > { %v3317_v57 = vsel %vm3108_vm8, %v3240_v2, 0.0  ;;  %v2431_v36 = vadd.f32 %v2365_v55, %v2231_v43  ;;  %v1876_v24 = vpop.f32.mrf.mxu0 }
 0x319   : > { %v3318_v41 = vadd.f32 %v3317_v57, %v3316_v29  ;;  %v2170_v15 = vpop.f32.mrf.mxu1  ;;  %v1940_v61 = vadd.f32 %v1876_v24, %v4636_v50 }
 0x31a   : > { %v2773_v48 = vadd.f32 %v2707_v49, %v2431_v36  ;;  %v2710_v53 = vpop.f32.mrf.mxu3  ;;  %v3015_v36 = vpop.permute.xlu0 %3014 }
 0x31b   : > { %v2232_v18 = vadd.f32 %v2168_v44, %v1940_v61 }
 0x31c   : > { %v3095_v32 = vmul.f32 %v3000_v4, %v2773_v48  ;;  %v3385_v45 = vpack.c.bf16 %v2773_v48, %v2773_v48 }
 0x31e   : > { %v3174_v0 = vsel %vm3108_vm8, %v3095_v32, 0.0  ;;  %v3241_v20 = vmul.f32 %v3095_v32, %v2773_v48  ;;  %3432 = vst.msk [vmem:[%s4748_s13 + $0x84] sm:$0xf] %vm3398_vm7, %v3385_v45 }
 0x31f   : > { %v3175_v35 = vadd.f32 %v3174_v0, %v3173_v58  ;;  %v2368_v3 = vpop.f32.mrf.mxu2 }
 0x320   : > { %v3319_v31 = vsel %vm3108_vm8, %v3241_v20, 0.0  ;;  %v2432_v52 = vadd.f32 %v2368_v3, %v2232_v18  ;;  %v1878_v23 = vpop.f32.mrf.mxu0 }
 0x321   : > { %v3320_v27 = vadd.f32 %v3319_v31, %v3318_v41  ;;  %v2173_v33 = vpop.f32.mrf.mxu1  ;;  %v1941_v14 = vadd.f32 %v1878_v23, %v4643_v34  ;;  %v3020_v31 = vpop.permute.xlu1 %3019 }
 0x322   : > { %v2774_v50 = vadd.f32 %v2710_v53, %v2432_v52  ;;  %v2712_v59 = vpop.f32.mrf.mxu3 }
 0x323   : > { %v2233_v51 = vadd.f32 %v2170_v15, %v1941_v14 }
 0x324   : > { %v3096_v12 = vmul.f32 %v3005_v17, %v2774_v50  ;;  %v3386_v60 = vpack.c.bf16 %v2774_v50, %v2774_v50 }
 0x326   : > { %v3176_v47 = vsel %vm3108_vm8, %v3096_v12, 0.0  ;;  %v3242_v46 = vmul.f32 %v3096_v12, %v2774_v50  ;;  %3433 = vst.msk [vmem:[%s4748_s13 + $0x88] sm:$0xf] %vm3398_vm7, %v3386_v60 }
 0x327   : > { %v3177_v28 = vadd.f32 %v3176_v47, %v3175_v35  ;;  %v2370_v40 = vpop.f32.mrf.mxu2 }
 0x328   : > { %v3321_v30 = vsel %vm3108_vm8, %v3242_v46, 0.0  ;;  %v2433_v16 = vadd.f32 %v2370_v40, %v2233_v51  ;;  %v1881_v5 = vpop.f32.mrf.mxu0 }
 0x329   : > { %v3322_v37 = vadd.f32 %v3321_v30, %v3320_v27  ;;  %v2175_v1 = vpop.f32.mrf.mxu1  ;;  %v1942_v25 = vadd.f32 %v1881_v5, %v4654_v54 }
 0x32a   : > { %v2775_v34 = vadd.f32 %v2712_v59, %v2433_v16  ;;  %v2715_v8 = vpop.f32.mrf.mxu3 }
 0x32b   : > { %v2234_v49 = vadd.f32 %v2173_v33, %v1942_v25 }
 0x32c   : > { %v3097_v29 = vmul.f32 %v3010_v11, %v2775_v34  ;;  %v3387_v44 = vpack.c.bf16 %v2775_v34, %v2775_v34 }
 0x32e   : > { %v3178_v42 = vsel %vm3108_vm8, %v3097_v29, 0.0  ;;  %v3243_v56 = vmul.f32 %v3097_v29, %v2775_v34  ;;  %3434 = vst.msk [vmem:[%s4748_s13 + $0x8c] sm:$0xf] %vm3398_vm7, %v3387_v44 }
 0x32f   : > { %v3179_v62 = vadd.f32 %v3178_v42, %v3177_v28  ;;  %v2373_v39 = vpop.f32.mrf.mxu2  ;;  %v3025_v28 = vpop.permute.xlu2 %3024 }
 0x330   : > { %v3323_v19 = vsel %vm3108_vm8, %v3243_v56, 0.0  ;;  %v2434_v21 = vadd.f32 %v2373_v39, %v2234_v49  ;;  %v1883_v2 = vpop.f32.mrf.mxu0  ;;  %v3030_v49 = vpop.permute.xlu0 %3029 }
 0x331   : > { %v3324_v43 = vadd.f32 %v3323_v19, %v3322_v37  ;;  %v2178_v58 = vpop.f32.mrf.mxu1  ;;  %v1943_v55 = vadd.f32 %v1883_v2, %v4660_v26 }
 0x332   : > { %v2776_v54 = vadd.f32 %v2715_v8, %v2434_v21  ;;  %v2717_v57 = vpop.f32.mrf.mxu3 }
 0x333   : > { %v2235_v61 = vadd.f32 %v2175_v1, %v1943_v55 }
 0x334   : > { %v3098_v24 = vmul.f32 %v3015_v36, %v2776_v54  ;;  %v3388_v41 = vpack.c.bf16 %v2776_v54, %v2776_v54 }
 0x336   : > { %v3180_v15 = vsel %vm3108_vm8, %v3098_v24, 0.0  ;;  %v3244_v48 = vmul.f32 %v3098_v24, %v2776_v54  ;;  %3435 = vst.msk [vmem:[%s4748_s13 + $0x90] sm:$0xf] %vm3398_vm7, %v3388_v41 }
 0x337   : > { %v3181_v53 = vadd.f32 %v3180_v15, %v3179_v62  ;;  %v2375_v4 = vpop.f32.mrf.mxu2 }
 0x338   : > { %v3325_v32 = vsel %vm3108_vm8, %v3244_v48, 0.0  ;;  %v2435_v45 = vadd.f32 %v2375_v4, %v2235_v61  ;;  %v1886_v0 = vpop.f32.mrf.mxu0  ;;  %v3035_v48 = vpop.permute.xlu1 %3034 }
 0x339   : > { %v3326_v20 = vadd.f32 %v3325_v32, %v3324_v43  ;;  %v2180_v18 = vpop.f32.mrf.mxu1  ;;  %v1944_v35 = vadd.f32 %v1886_v0, %v4671_v10 }
 0x33a   : > { %v2777_v26 = vadd.f32 %v2717_v57, %v2435_v45  ;;  %v2720_v3 = vpop.f32.mrf.mxu3 }
 0x33b   : > { %v2236_v50 = vadd.f32 %v2178_v58, %v1944_v35 }
 0x33c   : > { %v3099_v52 = vmul.f32 %v3020_v31, %v2777_v26  ;;  %v3389_v23 = vpack.c.bf16 %v2777_v26, %v2777_v26 }
 0x33e   : > { %v3182_v27 = vsel %vm3108_vm8, %v3099_v52, 0.0  ;;  %v3245_v33 = vmul.f32 %v3099_v52, %v2777_v26  ;;  %3436 = vst.msk [vmem:[%s4748_s13 + $0x94] sm:$0xf] %vm3398_vm7, %v3389_v23  ;;  %v3040_v23 = vpop.permute.xlu2 %3039 }
 0x33f   : > { %v3183_v14 = vadd.f32 %v3182_v27, %v3181_v53  ;;  %v2378_v59 = vpop.f32.mrf.mxu2 }
 0x340   : > { %v3327_v17 = vsel %vm3108_vm8, %v3245_v33, 0.0  ;;  %v2436_v12 = vadd.f32 %v2378_v59, %v2236_v50  ;;  %v1888_v60 = vpop.f32.mrf.mxu0 }
 0x341   : > { %v3328_v47 = vadd.f32 %v3327_v17, %v3326_v20  ;;  %v1945_v10 = vadd.f32 %v1888_v60, %v4677_v63  ;;  %v2183_v40 = vpop.f32.mrf.mxu1 }
 0x342   : > { %v2778_v46 = vadd.f32 %v2720_v3, %v2436_v12  ;;  %v2722_v51 = vpop.f32.mrf.mxu3 }
 0x343   : > { %v2237_v1 = vadd.f32 %v2180_v18, %v1945_v10 }
 0x344   : > { %v3100_v30 = vmul.f32 %v3025_v28, %v2778_v46  ;;  %v3390_v16 = vpack.c.bf16 %v2778_v46, %v2778_v46 }
 0x346   : > { %v3184_v5 = vsel %vm3108_vm8, %v3100_v30, 0.0  ;;  %v3246_v37 = vmul.f32 %v3100_v30, %v2778_v46  ;;  %3437 = vst.msk [vmem:[%s4748_s13 + $0x98] sm:$0xf] %vm3398_vm7, %v3390_v16  ;;  %v3045_v30 = vpop.permute.xlu0 %3044 }
 0x347   : > { %v3185_v34 = vadd.f32 %v3184_v5, %v3183_v14  ;;  %v2380_v25 = vpop.f32.mrf.mxu2 }
 0x348   : > { %v3329_v8 = vsel %vm3108_vm8, %v3246_v37, 0.0  ;;  %v2437_v11 = vadd.f32 %v2380_v25, %v2237_v1  ;;  %v1891_v29 = vpop.f32.mrf.mxu0 }
 0x349   : > { %v3330_v44 = vadd.f32 %v3329_v8, %v3328_v47  ;;  %v1946_v42 = vadd.f32 %v1891_v29, %v4688_v22  ;;  %v2185_v19 = vpop.f32.mrf.mxu1 }
 0x34a   : > { %v2779_v63 = vadd.f32 %v2722_v51, %v2437_v11  ;;  %v2725_v56 = vpop.f32.mrf.mxu3 }
 0x34b   : > { %v2238_v43 = vadd.f32 %v2183_v40, %v1946_v42 }
 0x34c   : > { %v3101_v62 = vmul.f32 %v3030_v49, %v2779_v63  ;;  %v3391_v39 = vpack.c.bf16 %v2779_v63, %v2779_v63  ;;  %v3050_v49 = vpop.permute.xlu1 %3049 }
 0x34e   : > { %v3186_v21 = vsel %vm3108_vm8, %v3101_v62, 0.0  ;;  %v3247_v2 = vmul.f32 %v3101_v62, %v2779_v63  ;;  %3438 = vst.msk [vmem:[%s4748_s13 + $0x9c] sm:$0xf] %vm3398_vm7, %v3391_v39 }
 0x34f   : > { %v3187_v58 = vadd.f32 %v3186_v21, %v3185_v34  ;;  %v2383_v54 = vpop.f32.mrf.mxu2 }
 0x350   : > { %v3331_v55 = vsel %vm3108_vm8, %v3247_v2, 0.0  ;;  %v2438_v57 = vadd.f32 %v2383_v54, %v2238_v43  ;;  %v1893_v36 = vpop.f32.mrf.mxu0 }
 0x351   : > { %v3332_v24 = vadd.f32 %v3331_v55, %v3330_v44  ;;  %v1947_v41 = vadd.f32 %v1893_v36, %v4694_v9  ;;  %v2188_v20 = vpop.f32.mrf.mxu1 }
 0x352   : > { %v2780_v22 = vadd.f32 %v2725_v56, %v2438_v57  ;;  %v2727_v15 = vpop.f32.mrf.mxu3 }
 0x353   : > { %v2239_v45 = vadd.f32 %v2185_v19, %v1947_v41 }
 0x354   : > { %v3102_v61 = vmul.f32 %v3035_v48, %v2780_v22  ;;  %v3392_v53 = vpack.c.bf16 %v2780_v22, %v2780_v22 }
 0x356   : > { %v3188_v4 = vsel %vm3108_vm8, %v3102_v61, 0.0  ;;  %v3248_v32 = vmul.f32 %v3102_v61, %v2780_v22  ;;  %3439 = vst.msk [vmem:[%s4748_s13 + $0xa0] sm:$0xf] %vm3398_vm7, %v3392_v53 }
 0x357   : > { %v3189_v0 = vadd.f32 %v3188_v4, %v3187_v58  ;;  %v2385_v18 = vpop.f32.mrf.mxu2 }
 0x358   : > { %v3333_v26 = vsel %vm3108_vm8, %v3248_v32, 0.0  ;;  %v2439_v35 = vadd.f32 %v2385_v18, %v2239_v45  ;;  %v1896_v3 = vpop.f32.mrf.mxu0 }
 0x359   : > { %v3334_v31 = vadd.f32 %v3333_v26, %v3332_v24  ;;  %v1948_v52 = vadd.f32 %v1896_v3, %v4705_v13  ;;  %v2190_v28 = vpop.f32.mrf.mxu1 }
 0x35a   : > { %v2781_v9 = vadd.f32 %v2727_v15, %v2439_v35  ;;  %v2730_v27 = vpop.f32.mrf.mxu3  ;;  %v3055_v15 = vpop.permute.xlu2 %3054 }
 0x35b   : > { %v2240_v17 = vadd.f32 %v2188_v20, %v1948_v52 }
 0x35c   : > { %v3103_v33 = vmul.f32 %v3040_v23, %v2781_v9  ;;  %v3393_v50 = vpack.c.bf16 %v2781_v9, %v2781_v9 }
 0x35e   : > { %v3190_v14 = vsel %vm3108_vm8, %v3103_v33, 0.0  ;;  %v3249_v59 = vmul.f32 %v3103_v33, %v2781_v9  ;;  %3440 = vst.msk [vmem:[%s4748_s13 + $0xa4] sm:$0xf] %vm3398_vm7, %v3393_v50 }
 0x35f   : > { %v3191_v12 = vadd.f32 %v3190_v14, %v3189_v0  ;;  %v2388_v60 = vpop.f32.mrf.mxu2 }
 0x360   : > { %v3335_v47 = vsel %vm3108_vm8, %v3249_v59, 0.0  ;;  %v2440_v46 = vadd.f32 %v2388_v60, %v2240_v17  ;;  %v1898_v10 = vpop.f32.mrf.mxu0 }
 0x361   : > { %v3336_v51 = vadd.f32 %v3335_v47, %v3334_v31  ;;  %v1949_v40 = vadd.f32 %v1898_v10, %v4711_v38  ;;  %v2193_v62 = vpop.f32.mrf.mxu1  ;;  %v3060_v31 = vpop.permute.xlu0 %3059 }
 0x362   : > { %v2782_v13 = vadd.f32 %v2730_v27, %v2440_v46  ;;  %v2732_v37 = vpop.f32.mrf.mxu3 }
 0x363   : > { %v2241_v25 = vadd.f32 %v2190_v28, %v1949_v40 }
 0x364   : > { %v3104_v16 = vmul.f32 %v3045_v30, %v2782_v13  ;;  %v3394_v5 = vpack.c.bf16 %v2782_v13, %v2782_v13 }
 0x366   : > { %v3192_v1 = vsel %vm3108_vm8, %v3104_v16, 0.0  ;;  %v3250_v34 = vmul.f32 %v3104_v16, %v2782_v13  ;;  %3441 = vst.msk [vmem:[%s4748_s13 + $0xa8] sm:$0xf] %vm3398_vm7, %v3394_v5 }
 0x367   : > { %v3193_v8 = vadd.f32 %v3192_v1, %v3191_v12  ;;  %v2390_v11 = vpop.f32.mrf.mxu2 }
 0x368   : > { %v3337_v29 = vsel %vm3108_vm8, %v3250_v34, 0.0  ;;  %v2441_v44 = vadd.f32 %v2390_v11, %v2241_v25  ;;  %v1901_v63 = vpop.f32.mrf.mxu0 }
 0x369   : > { %v3338_v42 = vadd.f32 %v3337_v29, %v3336_v51  ;;  %v1950_v38 = vadd.f32 %v1901_v63, %v4722_v7  ;;  %v2195_v53 = vpop.f32.mrf.mxu1 }
 0x36a   : > { %v2783_v56 = vadd.f32 %v2732_v37, %v2441_v44  ;;  %v2735_v54 = vpop.f32.mrf.mxu3 }
 0x36b   : > { %v2242_v43 = vadd.f32 %v2193_v62, %v1950_v38 }
 0x36c   : > { %v3105_v39 = vmul.f32 %v3050_v49, %v2783_v56  ;;  %v3395_v19 = vpack.c.bf16 %v2783_v56, %v2783_v56 }
 0x36e   : > { %v3194_v21 = vsel %vm3108_vm8, %v3105_v39, 0.0  ;;  %v3251_v2 = vmul.f32 %v3105_v39, %v2783_v56  ;;  %3442 = vst.msk [vmem:[%s4748_s13 + $0xac] sm:$0xf] %vm3398_vm7, %v3395_v19 }
 0x36f   : > { %v3195_v58 = vadd.f32 %v3194_v21, %v3193_v8  ;;  %v2393_v55 = vpop.f32.mrf.mxu2 }
 0x370   : > { %v3339_v57 = vsel %vm3108_vm8, %v3251_v2, 0.0  ;;  %v2442_v36 = vadd.f32 %v2393_v55, %v2242_v43  ;;  %v1903_v24 = vpop.f32.mrf.mxu0 }
 0x371   : > { %v3340_v22 = vadd.f32 %v3339_v57, %v3338_v42  ;;  %v1951_v41 = vadd.f32 %v1903_v24, %v4729_v6 }
 0x372   : > { %v2784_v7 = vadd.f32 %v2735_v54, %v2442_v36  ;;  %v2737_v3 = vpop.f32.mrf.mxu3 }
 0x373   : > { %v2243_v45 = vadd.f32 %v2195_v53, %v1951_v41 }
 0x374   : > { %v3106_v48 = vmul.f32 %v3055_v15, %v2784_v7  ;;  %v3396_v61 = vpack.c.bf16 %v2784_v7, %v2784_v7 }
 0x376   : > { %v3196_v4 = vsel %vm3108_vm8, %v3106_v48, 0.0  ;;  %v3252_v32 = vmul.f32 %v3106_v48, %v2784_v7  ;;  %3443 = vst.msk [vmem:[%s4748_s13 + $0xb0] sm:$0xf] %vm3398_vm7, %v3396_v61 }
 0x377   : > { %v3197_v0 = vadd.f32 %v3196_v4, %v3195_v58  ;;  %v2395_v20 = vpop.f32.mrf.mxu2 }
 0x378   : > { %v3341_v18 = vsel %vm3108_vm8, %v3252_v32, 0.0  ;;  %v2443_v26 = vadd.f32 %v2395_v20, %v2243_v45 }
 0x379   : > { %v3342_v35 = vadd.f32 %v3341_v18, %v3340_v22 }
 0x37a   : > { %v2785_v6 = vadd.f32 %v2737_v3, %v2443_v26 }
 0x37c   : > { %v3107_v9 = vmul.f32 %v3060_v31, %v2785_v6  ;;  %v3397_v52 = vpack.c.bf16 %v2785_v6, %v2785_v6 }
 0x37e   : > { %v3198_v23 = vsel %vm3108_vm8, %v3107_v9, 0.0  ;;  %v3253_v27 = vmul.f32 %v3107_v9, %v2785_v6  ;;  %3444 = vst.msk [vmem:[%s4748_s13 + $0xb4] sm:$0xf] %vm3398_vm7, %v3397_v52 }
 0x37f   : > { %v3199_v33 = vadd.f32 %v3198_v23, %v3197_v0 }
 0x380   : > { %v3343_v50 = vsel %vm3108_vm8, %v3253_v27, 0.0 }
 0x381   : > { %v3200_v14 = vrot.slane %v3199_v33, 4  ;;  %v3344_v59 = vadd.f32 %v3343_v50, %v3342_v35 }
 0x383   : > { %v3201_v17 = vadd.f32 %v3200_v14, %v3199_v33  ;;  %v3345_v12 = vrot.slane %v3344_v59, 4 }
 0x385   : > { %v3202_v60 = vrot.slane %v3201_v17, 2  ;;  %v3346_v47 = vadd.f32 %v3345_v12, %v3344_v59 }
 0x387   : > { %v3203_v46 = vadd.f32 %v3202_v60, %v3201_v17  ;;  %v3347_v10 = vrot.slane %v3346_v47, 2 }
 0x389   : > { %v3204_v51 = vrot.slane %v3203_v46, 1  ;;  %v3348_v28 = vadd.f32 %v3347_v10, %v3346_v47 }
 0x38b   : > { %v3205_v13 = vadd.f32 %v3204_v51, %v3203_v46  ;;  %v3349_v40 = vrot.slane %v3348_v28, 1 }
 0x38d   : > { %3207 = vst.msk [vmem:[%s319_s15] sm:$0x1] %vm3206_vm9, %v3205_v13  ;;  %v3350_v30 = vadd.f32 %v3349_v40, %v3348_v28 }
 0x38f   : > { %3351 = vst.msk [vmem:[%s322_s18] sm:$0x1] %vm3206_vm9, %v3350_v30 }
 0x390 PF: > { %s17_s21 = sadd.s32 1, %s3958_s21  }
 0x391   : > { %p14_p7 = scmp.ge.s32.totalorder %s17_s21, 6  }
 0x393   :  { %16 = sbr.rel (!%p14_p7) target bundleno = 1 (0x1), region = 103 }

</bundles_post_ra>
